<compile_context>
chip_gen: v7x
topology: tpu7x:2x2x1
jax: 0.10.0
libtpu: 0.0.40
codegen_flags: <defaults>
</compile_context>

<pallas_src>
import functools

import jax
import jax.numpy as jnp
from jax import lax
from jax.experimental import pallas as pl
from jax.experimental.pallas import tpu as pltpu


# ----------------------------------------------------------------------------
# Fused kernel: for each of the 3 layers
#   z_k  = H @ bilin[k] @ H.T
#   a_k  = z_k * adj                      (== set_value(z[row,col]*value))
#   H    = [norm](conv_k([relu]H, a_k, edge_types))
# ----------------------------------------------------------------------------
def _ctd_fused_kernel(h_ref, adjm_ref, eye_ref, bilin_ref, w_ref, b_ref,
                      h_out_ref, z_out_ref, *, num_rel):
    f32 = jnp.float32
    bf16 = jnp.bfloat16
    r1 = num_rel + 1

    h = h_ref[...]                      # [N, C] f32
    # Layer-invariant masked adjacency (adj * 1[et==r]), lane-concatenated
    # [N, R*N] f32 — loaded once, masking hoisted out of the layer loop.
    adjm = adjm_ref[...]
    eye = eye_ref[...]                  # [N, N] bf16 identity (self block)

    relu_flags = (False, True, True)    # F.relu before conv2 and conv3 only
    norm_flags = (True, True, False)    # norm1, norm2, no norm after conv3

    for layer in range(3):              # static -> fully unrolled
        # ---- bilinear similarity  z = H @ B @ H.T  (bf16 MXU, f32 acc) ----
        h_mm = h.astype(bf16)
        hw = jnp.dot(h_mm, bilin_ref[layer], preferred_element_type=f32)
        # Contract dim 1 of both operands (A @ B^T form): same pattern as the
        # reference flash kernel, no materialized transpose of H on the XLU.
        z = lax.dot_general(
            hw.astype(bf16), h_mm,
            dimension_numbers=(((1,), (1,)), ((), ())),
            preferred_element_type=f32)                    # [N, N] f32
        z_out_ref[layer] = z            # f32 output (bf16 optional, see hdr)

        hin = jnp.maximum(h, 0.0) if relu_flags[layer] else h
        hin_mm = hin.astype(bf16)

        # ---- stage A (does NOT depend on z): transform-then-aggregate.
        # hw_stack = [hin@W_0; hin@W_1; hin@W_2; hin@W_self]  [(R+1)*N, C]
        # (R+1) small dots + sublane concat == one batched dot, but with the
        # vertical layout the wide stage-B dot needs and no block transpose.
        hw_stack = jnp.concatenate(
            [jnp.dot(hin_mm, w_ref[layer, r],
                     preferred_element_type=f32).astype(bf16)
             for r in range(r1)],
            axis=0)                                        # [(R+1)*N, C] bf16

        # ---- stage B (critical path after z): ONE wide K=(R+1)*N dot.
        # Acat = [z*adj_0 | z*adj_1 | z*adj_2 | I_N]  ->  [N, (R+1)*N] bf16
        # acc  = Acat @ hw_stack  ==  sum_r (z*adj_r) @ hin @ W_r + hin@W_self
        zrep = jnp.concatenate([z] * num_rel, axis=-1)     # [N, R*N] f32
        acat = jnp.concatenate(
            [(zrep * adjm).astype(bf16), eye], axis=-1)    # [N, (R+1)*N]
        acc = jnp.dot(acat, hw_stack, preferred_element_type=f32)  # [N, C] f32
        acc = acc + b_ref[layer]                           # [1, C] broadcast

        if norm_flags[layer]:
            # two-pass LayerNorm over the feature axis (no E[x^2]-E[x]^2
            # cancellation risk)
            mean = jnp.mean(acc, axis=-1, keepdims=True)
            d = acc - mean
            var = jnp.mean(d * d, axis=-1, keepdims=True)
            acc = d * lax.rsqrt(var + 1e-5)

        h = acc                                            # f32

    h_out_ref[...] = h


# ----------------------------------------------------------------------------
# Forward pass (mirrors CTDExplainer.forward): one pallas_call total.
# ----------------------------------------------------------------------------
@jax.jit
def ctd_explainer_forward(x, params, adj_dense, edge_types):
    # H = torch.cat((x, self.model.encoder.emb), 0)
    H0 = jnp.concatenate([x, params["emb"]], axis=0).astype(jnp.float32)
    n, c = H0.shape
    num_rel = params["wr"].shape[1]

    # [review #2] hoisted, layer-invariant masked adjacency per relation,
    # lane-concatenated to [N, R*N] so the per-layer in-kernel work is a
    # single [N, R*N] multiply by z.
    adjm_cat = jnp.concatenate(
        [adj_dense * (edge_types == r).astype(jnp.float32)
         for r in range(num_rel)], axis=-1)

    # Identity block that pairs with W_self in the wide conv dot.
    eye_bf16 = jnp.eye(n, dtype=jnp.bfloat16)

    # MXU operands pre-cast to bf16; per-layer relation + self weights packed
    # as [R+1, C, C] (relations 0..R-1, then W_self) for stage A.
    bilin_bf16 = params["bilin"].astype(jnp.bfloat16)                  # [3,C,C]
    w_all = jnp.concatenate(
        [params["wr"], params["wself"][:, None]], axis=1
    ).astype(jnp.bfloat16)                                             # [3,R+1,C,C]
    bias = params["b"].astype(jnp.float32)                             # [3,1,C]

    kernel = functools.partial(_ctd_fused_kernel, num_rel=num_rel)
    h_out, z_out = pl.pallas_call(
        kernel,
        out_shape=(jax.ShapeDtypeStruct((n, c), jnp.float32),
                   jax.ShapeDtypeStruct((3, n, n), jnp.float32)),
        grid=(1,),
        in_specs=[
            pl.BlockSpec((n, c), lambda i: (0, 0)),                    # H0
            pl.BlockSpec((n, num_rel * n), lambda i: (0, 0)),          # adjm
            pl.BlockSpec((n, n), lambda i: (0, 0)),                    # eye
            pl.BlockSpec((3, c, c), lambda i: (0, 0, 0)),              # bilin
            pl.BlockSpec((3, num_rel + 1, c, c),
                         lambda i: (0, 0, 0, 0)),                      # w_all
            pl.BlockSpec((3, 1, c), lambda i: (0, 0, 0)),              # bias
        ],
        out_specs=(
            pl.BlockSpec((n, c), lambda i: (0, 0)),
            pl.BlockSpec((3, n, n), lambda i: (0, 0, 0)),
        ),
        compiler_params=pltpu.CompilerParams(
            dimension_semantics=("arbitrary",),
            vmem_limit_bytes=32 << 20),     # explicit; safe on v5e/v6e/v7x
    )(H0, adjm_cat, eye_bf16, bilin_bf16, w_all, bias)
    return h_out, z_out                 # (H, torch.stack((z0, z1, z2)))


# ----------------------------------------------------------------------------
# Deterministic synthetic setup + run
# ----------------------------------------------------------------------------
def make_params(key, n_emb, c, num_rel):
    keys = jax.random.split(key, 8)
    return {
        # nn.Parameter(torch.rand((3, in_channels, in_channels)))
        "bilin": jax.random.uniform(keys[0], (3, c, c), jnp.float32),
        # self.model.encoder.emb
        "emb": jax.random.normal(keys[1], (n_emb, c), jnp.float32) * 0.5,
        # synthetic RGCN weights for conv1/2/3
        "wr": jnp.stack([
            jax.random.normal(keys[2 + l], (num_rel, c, c), jnp.float32) * 0.1
            for l in range(3)]),
        "wself": jnp.stack([
            jax.random.normal(keys[5 + l], (c, c), jnp.float32) * 0.1
            for l in range(3)]),
        "b": jnp.zeros((3, 1, c), jnp.float32),
    }


if __name__ == "__main__":
    N_X, N_EMB, C, R = 112, 16, 128, 3        # lane-dense: N = C = 128
    N = N_X + N_EMB

    key = jax.random.PRNGKey(0)
    kx, kadj, kval, ket, kparam = jax.random.split(key, 5)

    x = jax.random.normal(kx, (N_X, C), jnp.float32)
    params = make_params(kparam, N_EMB, C, R)

    # Synthetic sparse adjacency as dense value matrix + int32 edge-type map.
    has_edge = (jax.random.uniform(kadj, (N, N)) < 0.3).astype(jnp.float32)
    adj_vals = jax.random.uniform(kval, (N, N), jnp.float32)
    adj_dense = has_edge * adj_vals                       # adj_t values
    edge_types = jax.random.randint(ket, (N, N), 0, R).astype(jnp.int32)

    H, Z = ctd_explainer_forward(x, params, adj_dense, edge_types)
    H = jax.block_until_ready(H)
    Z = jax.block_until_ready(Z)

    assert H.shape == (N, C) and Z.shape == (3, N, N)
    assert bool(jnp.all(jnp.isfinite(H))) and bool(jnp.all(jnp.isfinite(Z)))
    print("KERNEL_OK")
</pallas_src>

<mosaic_0001>
module attributes {stable_mosaic.version = 11 : i64} {
  func.func @_ctd_fused_kernel(%arg0: i32, %arg1: memref<128x128xf32, #tpu.memory_space<vmem>>, %arg2: memref<128x384xf32, #tpu.memory_space<vmem>>, %arg3: memref<128x128xbf16, #tpu.memory_space<vmem>>, %arg4: memref<3x128x128xbf16, #tpu.memory_space<vmem>>, %arg5: memref<3x4x128x128xbf16, #tpu.memory_space<vmem>>, %arg6: memref<3x1x128xf32, #tpu.memory_space<vmem>>, %arg7: memref<128x128xf32, #tpu.memory_space<vmem>>, %arg8: memref<3x128x128xf32, #tpu.memory_space<vmem>>) attributes {dimension_semantics = [#tpu.dimension_semantics<arbitrary>], iteration_bounds = array<i64: 1>, scalar_prefetch = 0 : i64, scratch_operands = 0 : i64, tpu.core_type = #tpu.core_type<tc>, window_params = [{pipeline_mode = #tpu.pipeline_mode<synchronous>, transform_indices = @transform_0, window_bounds = array<i64: 128, 128>}, {pipeline_mode = #tpu.pipeline_mode<synchronous>, transform_indices = @transform_1, window_bounds = array<i64: 128, 384>}, {pipeline_mode = #tpu.pipeline_mode<synchronous>, transform_indices = @transform_2, window_bounds = array<i64: 128, 128>}, {pipeline_mode = #tpu.pipeline_mode<synchronous>, transform_indices = @transform_3, window_bounds = array<i64: 3, 128, 128>}, {pipeline_mode = #tpu.pipeline_mode<synchronous>, transform_indices = @transform_4, window_bounds = array<i64: 3, 4, 128, 128>}, {pipeline_mode = #tpu.pipeline_mode<synchronous>, transform_indices = @transform_5, window_bounds = array<i64: 3, 1, 128>}, {pipeline_mode = #tpu.pipeline_mode<synchronous>, transform_indices = @transform_6, window_bounds = array<i64: 128, 128>}, {pipeline_mode = #tpu.pipeline_mode<synchronous>, transform_indices = @transform_7, window_bounds = array<i64: 3, 128, 128>}]} {
    %c0 = arith.constant 0 : index
    %c0_0 = arith.constant 0 : index
    %0 = vector.load %arg1[%c0, %c0_0] : memref<128x128xf32, #tpu.memory_space<vmem>>, vector<128x128xf32>
    %c0_1 = arith.constant 0 : index
    %c0_2 = arith.constant 0 : index
    %1 = vector.load %arg2[%c0_1, %c0_2] : memref<128x384xf32, #tpu.memory_space<vmem>>, vector<128x384xf32>
    %c0_3 = arith.constant 0 : index
    %c0_4 = arith.constant 0 : index
    %2 = vector.load %arg3[%c0_3, %c0_4] : memref<128x128xbf16, #tpu.memory_space<vmem>>, vector<128x128xbf16>
    %3 = arith.truncf %0 : vector<128x128xf32> to vector<128x128xbf16>
    %c0_5 = arith.constant 0 : index
    %c0_6 = arith.constant 0 : index
    %c0_7 = arith.constant 0 : index
    %4 = vector.load %arg4[%c0_5, %c0_6, %c0_7] : memref<3x128x128xbf16, #tpu.memory_space<vmem>>, vector<1x128x128xbf16>
    %5 = vector.shape_cast %4 : vector<1x128x128xbf16> to vector<128x128xbf16>
    %cst = arith.constant dense<0.000000e+00> : vector<128x128xf32>
    %6 = tpu.matmul %3, %5, %cst {dimension_numbers = #tpu.dot_dimension_numbers<[1], [0], [0], [1], [0, 0, 1, 1], [], []>} : vector<128x128xbf16>, vector<128x128xbf16>, vector<128x128xf32> -> vector<128x128xf32>
    %7 = arith.truncf %6 : vector<128x128xf32> to vector<128x128xbf16>
    %cst_8 = arith.constant dense<0.000000e+00> : vector<128x128xf32>
    %8 = tpu.matmul %7, %3, %cst_8 {dimension_numbers = #tpu.dot_dimension_numbers<[1], [1], [0], [0], [0, 0, 1, 0], [], []>} : vector<128x128xbf16>, vector<128x128xbf16>, vector<128x128xf32> -> vector<128x128xf32>
    %c0_9 = arith.constant 0 : index
    %c0_10 = arith.constant 0 : index
    %c0_11 = arith.constant 0 : index
    %9 = vector.load %arg8[%c0_9, %c0_10, %c0_11] : memref<3x128x128xf32, #tpu.memory_space<vmem>>, vector<1x128x128xf32>
    %10 = vector.shape_cast %9 : vector<1x128x128xf32> to vector<128x128xf32>
    %11 = vector.shape_cast %8 : vector<128x128xf32> to vector<1x128x128xf32>
    tpu.vector_store %arg8[%c0_9, %c0_10, %c0_11], %11 {strides = array<i32>} : memref<3x128x128xf32, #tpu.memory_space<vmem>>, vector<1x128x128xf32>,
    %12 = arith.truncf %0 : vector<128x128xf32> to vector<128x128xbf16>
    %c0_12 = arith.constant 0 : index
    %c0_13 = arith.constant 0 : index
    %c0_14 = arith.constant 0 : index
    %c0_15 = arith.constant 0 : index
    %13 = vector.load %arg5[%c0_12, %c0_13, %c0_14, %c0_15] : memref<3x4x128x128xbf16, #tpu.memory_space<vmem>>, vector<1x1x128x128xbf16>
    %14 = vector.shape_cast %13 : vector<1x1x128x128xbf16> to vector<128x128xbf16>
    %cst_16 = arith.constant dense<0.000000e+00> : vector<128x128xf32>
    %15 = tpu.matmul %12, %14, %cst_16 {dimension_numbers = #tpu.dot_dimension_numbers<[1], [0], [0], [1], [0, 0, 1, 1], [], []>} : vector<128x128xbf16>, vector<128x128xbf16>, vector<128x128xf32> -> vector<128x128xf32>
    %16 = arith.truncf %15 : vector<128x128xf32> to vector<128x128xbf16>
    %c0_17 = arith.constant 0 : index
    %c1 = arith.constant 1 : index
    %c0_18 = arith.constant 0 : index
    %c0_19 = arith.constant 0 : index
    %17 = vector.load %arg5[%c0_17, %c1, %c0_18, %c0_19] : memref<3x4x128x128xbf16, #tpu.memory_space<vmem>>, vector<1x1x128x128xbf16>
    %18 = vector.shape_cast %17 : vector<1x1x128x128xbf16> to vector<128x128xbf16>
    %cst_20 = arith.constant dense<0.000000e+00> : vector<128x128xf32>
    %19 = tpu.matmul %12, %18, %cst_20 {dimension_numbers = #tpu.dot_dimension_numbers<[1], [0], [0], [1], [0, 0, 1, 1], [], []>} : vector<128x128xbf16>, vector<128x128xbf16>, vector<128x128xf32> -> vector<128x128xf32>
    %20 = arith.truncf %19 : vector<128x128xf32> to vector<128x128xbf16>
    %c0_21 = arith.constant 0 : index
    %c2 = arith.constant 2 : index
    %c0_22 = arith.constant 0 : index
    %c0_23 = arith.constant 0 : index
    %21 = vector.load %arg5[%c0_21, %c2, %c0_22, %c0_23] : memref<3x4x128x128xbf16, #tpu.memory_space<vmem>>, vector<1x1x128x128xbf16>
    %22 = vector.shape_cast %21 : vector<1x1x128x128xbf16> to vector<128x128xbf16>
    %cst_24 = arith.constant dense<0.000000e+00> : vector<128x128xf32>
    %23 = tpu.matmul %12, %22, %cst_24 {dimension_numbers = #tpu.dot_dimension_numbers<[1], [0], [0], [1], [0, 0, 1, 1], [], []>} : vector<128x128xbf16>, vector<128x128xbf16>, vector<128x128xf32> -> vector<128x128xf32>
    %24 = arith.truncf %23 : vector<128x128xf32> to vector<128x128xbf16>
    %c0_25 = arith.constant 0 : index
    %c3 = arith.constant 3 : index
    %c0_26 = arith.constant 0 : index
    %c0_27 = arith.constant 0 : index
    %25 = vector.load %arg5[%c0_25, %c3, %c0_26, %c0_27] : memref<3x4x128x128xbf16, #tpu.memory_space<vmem>>, vector<1x1x128x128xbf16>
    %26 = vector.shape_cast %25 : vector<1x1x128x128xbf16> to vector<128x128xbf16>
    %cst_28 = arith.constant dense<0.000000e+00> : vector<128x128xf32>
    %27 = tpu.matmul %12, %26, %cst_28 {dimension_numbers = #tpu.dot_dimension_numbers<[1], [0], [0], [1], [0, 0, 1, 1], [], []>} : vector<128x128xbf16>, vector<128x128xbf16>, vector<128x128xf32> -> vector<128x128xf32>
    %28 = arith.truncf %27 : vector<128x128xf32> to vector<128x128xbf16>
    %29 = tpu.concatenate %16, %20, %24, %28 in 0 : vector<128x128xbf16>, vector<128x128xbf16>, vector<128x128xbf16>, vector<128x128xbf16> -> vector<512x128xbf16>
    %30 = tpu.concatenate %8, %8, %8 in 1 : vector<128x128xf32>, vector<128x128xf32>, vector<128x128xf32> -> vector<128x384xf32>
    %31 = arith.mulf %30, %1 : vector<128x384xf32>
    %32 = arith.truncf %31 : vector<128x384xf32> to vector<128x384xbf16>
    %33 = tpu.concatenate %32, %2 in 1 : vector<128x384xbf16>, vector<128x128xbf16> -> vector<128x512xbf16>
    %cst_29 = arith.constant dense<0.000000e+00> : vector<128x128xf32>
    %34 = tpu.matmul %33, %29, %cst_29 {dimension_numbers = #tpu.dot_dimension_numbers<[1], [0], [0], [1], [0, 0, 1, 1], [], []>} : vector<128x512xbf16>, vector<512x128xbf16>, vector<128x128xf32> -> vector<128x128xf32>
    %c0_30 = arith.constant 0 : index
    %c0_31 = arith.constant 0 : index
    %c0_32 = arith.constant 0 : index
    %35 = vector.load %arg6[%c0_30, %c0_31, %c0_32] : memref<3x1x128xf32, #tpu.memory_space<vmem>>, vector<1x1x128xf32>
    %36 = vector.shape_cast %35 : vector<1x1x128xf32> to vector<1x128xf32>
    %37 = vector.broadcast %36 : vector<1x128xf32> to vector<128x128xf32>
    %38 = arith.addf %34, %37 : vector<128x128xf32>
    %cst_33 = arith.constant dense<0.000000e+00> : vector<128xf32>
    %39 = vector.multi_reduction <add>, %38, %cst_33 [1] : vector<128x128xf32> to vector<128xf32>
    %40 = vector.shape_cast %39 : vector<128xf32> to vector<128x1xf32>
    %cst_34 = arith.constant 1.280000e+02 : f32
    %41 = vector.broadcast %cst_34 : f32 to vector<128x1xf32>
    %42 = arith.divf %40, %41 : vector<128x1xf32>
    %43 = vector.broadcast %42 : vector<128x1xf32> to vector<128x128xf32>
    %44 = arith.subf %38, %43 : vector<128x128xf32>
    %45 = arith.mulf %44, %44 : vector<128x128xf32>
    %cst_35 = arith.constant dense<0.000000e+00> : vector<128xf32>
    %46 = vector.multi_reduction <add>, %45, %cst_35 [1] : vector<128x128xf32> to vector<128xf32>
    %47 = vector.shape_cast %46 : vector<128xf32> to vector<128x1xf32>
    %cst_36 = arith.constant 1.280000e+02 : f32
    %48 = vector.broadcast %cst_36 : f32 to vector<128x1xf32>
    %49 = arith.divf %47, %48 : vector<128x1xf32>
    %cst_37 = arith.constant 9.99999974E-6 : f32
    %50 = vector.broadcast %cst_37 : f32 to vector<128x1xf32>
    %51 = arith.addf %49, %50 : vector<128x1xf32>
    %52 = math.rsqrt %51 : vector<128x1xf32>
    %53 = vector.broadcast %52 : vector<128x1xf32> to vector<128x128xf32>
    %54 = arith.mulf %44, %53 : vector<128x128xf32>
    %55 = arith.truncf %54 : vector<128x128xf32> to vector<128x128xbf16>
    %c1_38 = arith.constant 1 : index
    %c0_39 = arith.constant 0 : index
    %c0_40 = arith.constant 0 : index
    %56 = vector.load %arg4[%c1_38, %c0_39, %c0_40] : memref<3x128x128xbf16, #tpu.memory_space<vmem>>, vector<1x128x128xbf16>
    %57 = vector.shape_cast %56 : vector<1x128x128xbf16> to vector<128x128xbf16>
    %cst_41 = arith.constant dense<0.000000e+00> : vector<128x128xf32>
    %58 = tpu.matmul %55, %57, %cst_41 {dimension_numbers = #tpu.dot_dimension_numbers<[1], [0], [0], [1], [0, 0, 1, 1], [], []>} : vector<128x128xbf16>, vector<128x128xbf16>, vector<128x128xf32> -> vector<128x128xf32>
    %59 = arith.truncf %58 : vector<128x128xf32> to vector<128x128xbf16>
    %cst_42 = arith.constant dense<0.000000e+00> : vector<128x128xf32>
    %60 = tpu.matmul %59, %55, %cst_42 {dimension_numbers = #tpu.dot_dimension_numbers<[1], [1], [0], [0], [0, 0, 1, 0], [], []>} : vector<128x128xbf16>, vector<128x128xbf16>, vector<128x128xf32> -> vector<128x128xf32>
    %c1_43 = arith.constant 1 : index
    %c0_44 = arith.constant 0 : index
    %c0_45 = arith.constant 0 : index
    %61 = vector.load %arg8[%c1_43, %c0_44, %c0_45] : memref<3x128x128xf32, #tpu.memory_space<vmem>>, vector<1x128x128xf32>
    %62 = vector.shape_cast %61 : vector<1x128x128xf32> to vector<128x128xf32>
    %63 = vector.shape_cast %60 : vector<128x128xf32> to vector<1x128x128xf32>
    tpu.vector_store %arg8[%c1_43, %c0_44, %c0_45], %63 {strides = array<i32>} : memref<3x128x128xf32, #tpu.memory_space<vmem>>, vector<1x128x128xf32>,
    %cst_46 = arith.constant 0.000000e+00 : f32
    %64 = vector.broadcast %cst_46 : f32 to vector<128x128xf32>
    %65 = arith.maximumf %54, %64 : vector<128x128xf32>
    %66 = arith.truncf %65 : vector<128x128xf32> to vector<128x128xbf16>
    %c1_47 = arith.constant 1 : index
    %c0_48 = arith.constant 0 : index
    %c0_49 = arith.constant 0 : index
    %c0_50 = arith.constant 0 : index
    %67 = vector.load %arg5[%c1_47, %c0_48, %c0_49, %c0_50] : memref<3x4x128x128xbf16, #tpu.memory_space<vmem>>, vector<1x1x128x128xbf16>
    %68 = vector.shape_cast %67 : vector<1x1x128x128xbf16> to vector<128x128xbf16>
    %cst_51 = arith.constant dense<0.000000e+00> : vector<128x128xf32>
    %69 = tpu.matmul %66, %68, %cst_51 {dimension_numbers = #tpu.dot_dimension_numbers<[1], [0], [0], [1], [0, 0, 1, 1], [], []>} : vector<128x128xbf16>, vector<128x128xbf16>, vector<128x128xf32> -> vector<128x128xf32>
    %70 = arith.truncf %69 : vector<128x128xf32> to vector<128x128xbf16>
    %c1_52 = arith.constant 1 : index
    %c1_53 = arith.constant 1 : index
    %c0_54 = arith.constant 0 : index
    %c0_55 = arith.constant 0 : index
    %71 = vector.load %arg5[%c1_52, %c1_53, %c0_54, %c0_55] : memref<3x4x128x128xbf16, #tpu.memory_space<vmem>>, vector<1x1x128x128xbf16>
    %72 = vector.shape_cast %71 : vector<1x1x128x128xbf16> to vector<128x128xbf16>
    %cst_56 = arith.constant dense<0.000000e+00> : vector<128x128xf32>
    %73 = tpu.matmul %66, %72, %cst_56 {dimension_numbers = #tpu.dot_dimension_numbers<[1], [0], [0], [1], [0, 0, 1, 1], [], []>} : vector<128x128xbf16>, vector<128x128xbf16>, vector<128x128xf32> -> vector<128x128xf32>
    %74 = arith.truncf %73 : vector<128x128xf32> to vector<128x128xbf16>
    %c1_57 = arith.constant 1 : index
    %c2_58 = arith.constant 2 : index
    %c0_59 = arith.constant 0 : index
    %c0_60 = arith.constant 0 : index
    %75 = vector.load %arg5[%c1_57, %c2_58, %c0_59, %c0_60] : memref<3x4x128x128xbf16, #tpu.memory_space<vmem>>, vector<1x1x128x128xbf16>
    %76 = vector.shape_cast %75 : vector<1x1x128x128xbf16> to vector<128x128xbf16>
    %cst_61 = arith.constant dense<0.000000e+00> : vector<128x128xf32>
    %77 = tpu.matmul %66, %76, %cst_61 {dimension_numbers = #tpu.dot_dimension_numbers<[1], [0], [0], [1], [0, 0, 1, 1], [], []>} : vector<128x128xbf16>, vector<128x128xbf16>, vector<128x128xf32> -> vector<128x128xf32>
    %78 = arith.truncf %77 : vector<128x128xf32> to vector<128x128xbf16>
    %c1_62 = arith.constant 1 : index
    %c3_63 = arith.constant 3 : index
    %c0_64 = arith.constant 0 : index
    %c0_65 = arith.constant 0 : index
    %79 = vector.load %arg5[%c1_62, %c3_63, %c0_64, %c0_65] : memref<3x4x128x128xbf16, #tpu.memory_space<vmem>>, vector<1x1x128x128xbf16>
    %80 = vector.shape_cast %79 : vector<1x1x128x128xbf16> to vector<128x128xbf16>
    %cst_66 = arith.constant dense<0.000000e+00> : vector<128x128xf32>
    %81 = tpu.matmul %66, %80, %cst_66 {dimension_numbers = #tpu.dot_dimension_numbers<[1], [0], [0], [1], [0, 0, 1, 1], [], []>} : vector<128x128xbf16>, vector<128x128xbf16>, vector<128x128xf32> -> vector<128x128xf32>
    %82 = arith.truncf %81 : vector<128x128xf32> to vector<128x128xbf16>
    %83 = tpu.concatenate %70, %74, %78, %82 in 0 : vector<128x128xbf16>, vector<128x128xbf16>, vector<128x128xbf16>, vector<128x128xbf16> -> vector<512x128xbf16>
    %84 = tpu.concatenate %60, %60, %60 in 1 : vector<128x128xf32>, vector<128x128xf32>, vector<128x128xf32> -> vector<128x384xf32>
    %85 = arith.mulf %84, %1 : vector<128x384xf32>
    %86 = arith.truncf %85 : vector<128x384xf32> to vector<128x384xbf16>
    %87 = tpu.concatenate %86, %2 in 1 : vector<128x384xbf16>, vector<128x128xbf16> -> vector<128x512xbf16>
    %cst_67 = arith.constant dense<0.000000e+00> : vector<128x128xf32>
    %88 = tpu.matmul %87, %83, %cst_67 {dimension_numbers = #tpu.dot_dimension_numbers<[1], [0], [0], [1], [0, 0, 1, 1], [], []>} : vector<128x512xbf16>, vector<512x128xbf16>, vector<128x128xf32> -> vector<128x128xf32>
    %c1_68 = arith.constant 1 : index
    %c0_69 = arith.constant 0 : index
    %c0_70 = arith.constant 0 : index
    %89 = vector.load %arg6[%c1_68, %c0_69, %c0_70] : memref<3x1x128xf32, #tpu.memory_space<vmem>>, vector<1x1x128xf32>
    %90 = vector.shape_cast %89 : vector<1x1x128xf32> to vector<1x128xf32>
    %91 = vector.broadcast %90 : vector<1x128xf32> to vector<128x128xf32>
    %92 = arith.addf %88, %91 : vector<128x128xf32>
    %cst_71 = arith.constant dense<0.000000e+00> : vector<128xf32>
    %93 = vector.multi_reduction <add>, %92, %cst_71 [1] : vector<128x128xf32> to vector<128xf32>
    %94 = vector.shape_cast %93 : vector<128xf32> to vector<128x1xf32>
    %cst_72 = arith.constant 1.280000e+02 : f32
    %95 = vector.broadcast %cst_72 : f32 to vector<128x1xf32>
    %96 = arith.divf %94, %95 : vector<128x1xf32>
    %97 = vector.broadcast %96 : vector<128x1xf32> to vector<128x128xf32>
    %98 = arith.subf %92, %97 : vector<128x128xf32>
    %99 = arith.mulf %98, %98 : vector<128x128xf32>
    %cst_73 = arith.constant dense<0.000000e+00> : vector<128xf32>
    %100 = vector.multi_reduction <add>, %99, %cst_73 [1] : vector<128x128xf32> to vector<128xf32>
    %101 = vector.shape_cast %100 : vector<128xf32> to vector<128x1xf32>
    %cst_74 = arith.constant 1.280000e+02 : f32
    %102 = vector.broadcast %cst_74 : f32 to vector<128x1xf32>
    %103 = arith.divf %101, %102 : vector<128x1xf32>
    %cst_75 = arith.constant 9.99999974E-6 : f32
    %104 = vector.broadcast %cst_75 : f32 to vector<128x1xf32>
    %105 = arith.addf %103, %104 : vector<128x1xf32>
    %106 = math.rsqrt %105 : vector<128x1xf32>
    %107 = vector.broadcast %106 : vector<128x1xf32> to vector<128x128xf32>
    %108 = arith.mulf %98, %107 : vector<128x128xf32>
    %109 = arith.truncf %108 : vector<128x128xf32> to vector<128x128xbf16>
    %c2_76 = arith.constant 2 : index
    %c0_77 = arith.constant 0 : index
    %c0_78 = arith.constant 0 : index
    %110 = vector.load %arg4[%c2_76, %c0_77, %c0_78] : memref<3x128x128xbf16, #tpu.memory_space<vmem>>, vector<1x128x128xbf16>
    %111 = vector.shape_cast %110 : vector<1x128x128xbf16> to vector<128x128xbf16>
    %cst_79 = arith.constant dense<0.000000e+00> : vector<128x128xf32>
    %112 = tpu.matmul %109, %111, %cst_79 {dimension_numbers = #tpu.dot_dimension_numbers<[1], [0], [0], [1], [0, 0, 1, 1], [], []>} : vector<128x128xbf16>, vector<128x128xbf16>, vector<128x128xf32> -> vector<128x128xf32>
    %113 = arith.truncf %112 : vector<128x128xf32> to vector<128x128xbf16>
    %cst_80 = arith.constant dense<0.000000e+00> : vector<128x128xf32>
    %114 = tpu.matmul %113, %109, %cst_80 {dimension_numbers = #tpu.dot_dimension_numbers<[1], [1], [0], [0], [0, 0, 1, 0], [], []>} : vector<128x128xbf16>, vector<128x128xbf16>, vector<128x128xf32> -> vector<128x128xf32>
    %c2_81 = arith.constant 2 : index
    %c0_82 = arith.constant 0 : index
    %c0_83 = arith.constant 0 : index
    %115 = vector.load %arg8[%c2_81, %c0_82, %c0_83] : memref<3x128x128xf32, #tpu.memory_space<vmem>>, vector<1x128x128xf32>
    %116 = vector.shape_cast %115 : vector<1x128x128xf32> to vector<128x128xf32>
    %117 = vector.shape_cast %114 : vector<128x128xf32> to vector<1x128x128xf32>
    tpu.vector_store %arg8[%c2_81, %c0_82, %c0_83], %117 {strides = array<i32>} : memref<3x128x128xf32, #tpu.memory_space<vmem>>, vector<1x128x128xf32>,
    %cst_84 = arith.constant 0.000000e+00 : f32
    %118 = vector.broadcast %cst_84 : f32 to vector<128x128xf32>
    %119 = arith.maximumf %108, %118 : vector<128x128xf32>
    %120 = arith.truncf %119 : vector<128x128xf32> to vector<128x128xbf16>
    %c2_85 = arith.constant 2 : index
    %c0_86 = arith.constant 0 : index
    %c0_87 = arith.constant 0 : index
    %c0_88 = arith.constant 0 : index
    %121 = vector.load %arg5[%c2_85, %c0_86, %c0_87, %c0_88] : memref<3x4x128x128xbf16, #tpu.memory_space<vmem>>, vector<1x1x128x128xbf16>
    %122 = vector.shape_cast %121 : vector<1x1x128x128xbf16> to vector<128x128xbf16>
    %cst_89 = arith.constant dense<0.000000e+00> : vector<128x128xf32>
    %123 = tpu.matmul %120, %122, %cst_89 {dimension_numbers = #tpu.dot_dimension_numbers<[1], [0], [0], [1], [0, 0, 1, 1], [], []>} : vector<128x128xbf16>, vector<128x128xbf16>, vector<128x128xf32> -> vector<128x128xf32>
    %124 = arith.truncf %123 : vector<128x128xf32> to vector<128x128xbf16>
    %c2_90 = arith.constant 2 : index
    %c1_91 = arith.constant 1 : index
    %c0_92 = arith.constant 0 : index
    %c0_93 = arith.constant 0 : index
    %125 = vector.load %arg5[%c2_90, %c1_91, %c0_92, %c0_93] : memref<3x4x128x128xbf16, #tpu.memory_space<vmem>>, vector<1x1x128x128xbf16>
    %126 = vector.shape_cast %125 : vector<1x1x128x128xbf16> to vector<128x128xbf16>
    %cst_94 = arith.constant dense<0.000000e+00> : vector<128x128xf32>
    %127 = tpu.matmul %120, %126, %cst_94 {dimension_numbers = #tpu.dot_dimension_numbers<[1], [0], [0], [1], [0, 0, 1, 1], [], []>} : vector<128x128xbf16>, vector<128x128xbf16>, vector<128x128xf32> -> vector<128x128xf32>
    %128 = arith.truncf %127 : vector<128x128xf32> to vector<128x128xbf16>
    %c2_95 = arith.constant 2 : index
    %c2_96 = arith.constant 2 : index
    %c0_97 = arith.constant 0 : index
    %c0_98 = arith.constant 0 : index
    %129 = vector.load %arg5[%c2_95, %c2_96, %c0_97, %c0_98] : memref<3x4x128x128xbf16, #tpu.memory_space<vmem>>, vector<1x1x128x128xbf16>
    %130 = vector.shape_cast %129 : vector<1x1x128x128xbf16> to vector<128x128xbf16>
    %cst_99 = arith.constant dense<0.000000e+00> : vector<128x128xf32>
    %131 = tpu.matmul %120, %130, %cst_99 {dimension_numbers = #tpu.dot_dimension_numbers<[1], [0], [0], [1], [0, 0, 1, 1], [], []>} : vector<128x128xbf16>, vector<128x128xbf16>, vector<128x128xf32> -> vector<128x128xf32>
    %132 = arith.truncf %131 : vector<128x128xf32> to vector<128x128xbf16>
    %c2_100 = arith.constant 2 : index
    %c3_101 = arith.constant 3 : index
    %c0_102 = arith.constant 0 : index
    %c0_103 = arith.constant 0 : index
    %133 = vector.load %arg5[%c2_100, %c3_101, %c0_102, %c0_103] : memref<3x4x128x128xbf16, #tpu.memory_space<vmem>>, vector<1x1x128x128xbf16>
    %134 = vector.shape_cast %133 : vector<1x1x128x128xbf16> to vector<128x128xbf16>
    %cst_104 = arith.constant dense<0.000000e+00> : vector<128x128xf32>
    %135 = tpu.matmul %120, %134, %cst_104 {dimension_numbers = #tpu.dot_dimension_numbers<[1], [0], [0], [1], [0, 0, 1, 1], [], []>} : vector<128x128xbf16>, vector<128x128xbf16>, vector<128x128xf32> -> vector<128x128xf32>
    %136 = arith.truncf %135 : vector<128x128xf32> to vector<128x128xbf16>
    %137 = tpu.concatenate %124, %128, %132, %136 in 0 : vector<128x128xbf16>, vector<128x128xbf16>, vector<128x128xbf16>, vector<128x128xbf16> -> vector<512x128xbf16>
    %138 = tpu.concatenate %114, %114, %114 in 1 : vector<128x128xf32>, vector<128x128xf32>, vector<128x128xf32> -> vector<128x384xf32>
    %139 = arith.mulf %138, %1 : vector<128x384xf32>
    %140 = arith.truncf %139 : vector<128x384xf32> to vector<128x384xbf16>
    %141 = tpu.concatenate %140, %2 in 1 : vector<128x384xbf16>, vector<128x128xbf16> -> vector<128x512xbf16>
    %cst_105 = arith.constant dense<0.000000e+00> : vector<128x128xf32>
    %142 = tpu.matmul %141, %137, %cst_105 {dimension_numbers = #tpu.dot_dimension_numbers<[1], [0], [0], [1], [0, 0, 1, 1], [], []>} : vector<128x512xbf16>, vector<512x128xbf16>, vector<128x128xf32> -> vector<128x128xf32>
    %c2_106 = arith.constant 2 : index
    %c0_107 = arith.constant 0 : index
    %c0_108 = arith.constant 0 : index
    %143 = vector.load %arg6[%c2_106, %c0_107, %c0_108] : memref<3x1x128xf32, #tpu.memory_space<vmem>>, vector<1x1x128xf32>
    %144 = vector.shape_cast %143 : vector<1x1x128xf32> to vector<1x128xf32>
    %145 = vector.broadcast %144 : vector<1x128xf32> to vector<128x128xf32>
    %146 = arith.addf %142, %145 : vector<128x128xf32>
    %c0_109 = arith.constant 0 : index
    %c0_110 = arith.constant 0 : index
    %147 = vector.load %arg7[%c0_109, %c0_110] : memref<128x128xf32, #tpu.memory_space<vmem>>, vector<128x128xf32>
    tpu.vector_store %arg7[%c0_109, %c0_110], %146 {strides = array<i32>} : memref<128x128xf32, #tpu.memory_space<vmem>>, vector<128x128xf32>,
    return
  }
  func.func @transform_0(%arg0: i32) -> (i32, i32) {
    %c0_i32 = arith.constant 0 : i32
    %c0_i32_0 = arith.constant 0 : i32
    %c0_i32_1 = arith.constant 0 : i32
    return %c0_i32, %c0_i32_0 : i32, i32
  }
  func.func @transform_1(%arg0: i32) -> (i32, i32) {
    %c0_i32 = arith.constant 0 : i32
    %c0_i32_0 = arith.constant 0 : i32
    %c0_i32_1 = arith.constant 0 : i32
    return %c0_i32, %c0_i32_0 : i32, i32
  }
  func.func @transform_2(%arg0: i32) -> (i32, i32) {
    %c0_i32 = arith.constant 0 : i32
    %c0_i32_0 = arith.constant 0 : i32
    %c0_i32_1 = arith.constant 0 : i32
    return %c0_i32, %c0_i32_0 : i32, i32
  }
  func.func @transform_3(%arg0: i32) -> (i32, i32, i32) {
    %c0_i32 = arith.constant 0 : i32
    %c0_i32_0 = arith.constant 0 : i32
    %c0_i32_1 = arith.constant 0 : i32
    %c0_i32_2 = arith.constant 0 : i32
    return %c0_i32, %c0_i32_0, %c0_i32_1 : i32, i32, i32
  }
  func.func @transform_4(%arg0: i32) -> (i32, i32, i32, i32) {
    %c0_i32 = arith.constant 0 : i32
    %c0_i32_0 = arith.constant 0 : i32
    %c0_i32_1 = arith.constant 0 : i32
    %c0_i32_2 = arith.constant 0 : i32
    %c0_i32_3 = arith.constant 0 : i32
    return %c0_i32, %c0_i32_0, %c0_i32_1, %c0_i32_2 : i32, i32, i32, i32
  }
  func.func @transform_5(%arg0: i32) -> (i32, i32, i32) {
    %c0_i32 = arith.constant 0 : i32
    %c0_i32_0 = arith.constant 0 : i32
    %c0_i32_1 = arith.constant 0 : i32
    %c0_i32_2 = arith.constant 0 : i32
    return %c0_i32, %c0_i32_0, %c0_i32_1 : i32, i32, i32
  }
  func.func @transform_6(%arg0: i32) -> (i32, i32) {
    %c0_i32 = arith.constant 0 : i32
    %c0_i32_0 = arith.constant 0 : i32
    %c0_i32_1 = arith.constant 0 : i32
    return %c0_i32, %c0_i32_0 : i32, i32
  }
  func.func @transform_7(%arg0: i32) -> (i32, i32, i32) {
    %c0_i32 = arith.constant 0 : i32
    %c0_i32_0 = arith.constant 0 : i32
    %c0_i32_1 = arith.constant 0 : i32
    %c0_i32_2 = arith.constant 0 : i32
    return %c0_i32, %c0_i32_0, %c0_i32_1 : i32, i32, i32
  }
}

</mosaic_0001>

<bundles_post_ra>
// kernel: ctd_explainer_forward.1
= control target key start
LH: loop header
LB: loop body
LE: loop exit
PB: predicated region body
PF: predicated region fallthrough
CT: control target
= control target key end

     0   :  { %13 = vsyncpa [#allocation3], 0  ;;  %s8809_s0 = inlined_call_operand.vmem [shape: f32[128,128], index: 0, kind: input, shape index: {}]   ;;  %s8810_s1 = inlined_call_operand.vmem [shape: f32[128,384], index: 1, kind: input, shape index: {}]   ;;  %s8811_s2 = inlined_call_operand.vmem [shape: bf16[128,128], index: 2, kind: input, shape index: {}]   ;;  %s8812_s3 = inlined_call_operand.vmem [shape: bf16[3,128,128], index: 3, kind: input, shape index: {}]   ;;  %s8813_s4 = inlined_call_operand.vmem [shape: bf16[3,4,128,128], index: 4, kind: input, shape index: {}]   ;;  %s8814_s5 = inlined_call_operand.vmem [shape: f32[3,1,128], index: 5, kind: input, shape index: {}]   ;;  %s8815_s6 = inlined_call_operand.hbm [shape: f32[128,128], index: 6, kind: output, shape index: {0}]   ;;  %s8816_s7 = inlined_call_operand.hbm [shape: f32[3,128,128], index: 7, kind: output, shape index: {1}]  }
   0x1   :  { %v5948_v0 = vld [vmem:[%s8812_s3] sm:$0xff]   ;;  %v5949_v1 = vld [vmem:[%s8812_s3 + $0x8] sm:$0xff]   ;;  %v5950_v2 = vld [vmem:[%s8812_s3 + $0x10] sm:$0xff]  }
   0x2   :  { %5352 = vmatprep.subr.bf16.mxu0 %v5948_v0  ;;  %v5951_v3 = vld [vmem:[%s8812_s3 + $0x18] sm:$0xff]   ;;  %v28_v4 = vld [vmem:[%s8809_s0] sm:$0xff]  ;;  %v29_v5 = vld [vmem:[%s8809_s0 + $0x8] sm:$0xff] }
   0x3   :  { %5353 = vmatpush3.bf16.msra.mxu0 %v5948_v0  ;;  %v6362_v6 = vpack.c.bf16 %v29_v5, %v28_v4  ;;  %v30_v7 = vld [vmem:[%s8809_s0 + $0x10] sm:$0xff]  ;;  %v31_v8 = vld [vmem:[%s8809_s0 + $0x18] sm:$0xff]  ;;  %v5952_v9 = vld [vmem:[%s8812_s3 + $0x20] sm:$0xff]  }
   0x4   :  { %5354 = vmatprep.subr.bf16.mxu0 %v5949_v1  ;;  %v6374_v10 = vpack.c.bf16 %v31_v8, %v30_v7  ;;  %v5953_v11 = vld [vmem:[%s8812_s3 + $0x28] sm:$0xff]   ;;  %v32_v12 = vld [vmem:[%s8809_s0 + $0x20] sm:$0xff]  ;;  %v5954_v14 = vld [vmem:[%s8812_s3 + $0x30] sm:$0xff]  }
   0x5   :  { %5368 = vmatprep.mubr.bf16.mxu0 %v6362_v6  ;;  %5384 = vmatprep.subr.bf16.mxu1 %v6362_v6  ;;  %v33_v13 = vld [vmem:[%s8809_s0 + $0x28] sm:$0xff]  ;;  %v5955_v16 = vld [vmem:[%s8812_s3 + $0x38] sm:$0xff]   ;;  %v34_v17 = vld [vmem:[%s8809_s0 + $0x30] sm:$0xff] }
   0x6   :  { %5385 = vmatpush3.bf16.xpose.msra.mxu1 %v6362_v6  ;;  %v6391_v15 = vpack.c.bf16 %v33_v13, %v32_v12  ;;  %v35_v18 = vld [vmem:[%s8809_s0 + $0x38] sm:$0xff]  ;;  %v5956_v20 = vld [vmem:[%s8813_s4] sm:$0xff]   ;;  %v5957_v21 = vld [vmem:[%s8813_s4 + $0x8] sm:$0xff]  }
   0x7   :  { %5355 = vmatpush3.bf16.msra.mxu0 %v5949_v1  ;;  %5386 = vmatprep.subr.bf16.mxu1 %v6374_v10  ;;  %v6404_v19 = vpack.c.bf16 %v35_v18, %v34_v17  ;;  %v36_v22 = vld [vmem:[%s8809_s0 + $0x40] sm:$0xff]  ;;  %v37_v23 = vld [vmem:[%s8809_s0 + $0x48] sm:$0xff]  ;;  %v5958_v24 = vld [vmem:[%s8813_s4 + $0x10] sm:$0xff]  }
   0x8   :  { %5356 = vmatprep.subr.bf16.mxu0 %v5950_v2  ;;  %v6425_v25 = vpack.c.bf16 %v37_v23, %v36_v22  ;;  %v5959_v26 = vld [vmem:[%s8813_s4 + $0x18] sm:$0xff]   ;;  %v38_v27 = vld [vmem:[%s8809_s0 + $0x50] sm:$0xff]  ;;  %v40_v29 = vld [vmem:[%s8809_s0 + $0x60] sm:$0xff] }
   0x9   :  { %v39_v28 = vld [vmem:[%s8809_s0 + $0x58] sm:$0xff]  ;;  %v41_v30 = vld [vmem:[%s8809_s0 + $0x68] sm:$0xff]  ;;  %v5960_v31 = vld [vmem:[%s8813_s4 + $0x20] sm:$0xff]  }
   0xa   :  { %v6449_v32 = vpack.c.bf16 %v39_v28, %v38_v27  ;;  %v5961_v33 = vld [vmem:[%s8813_s4 + $0x28] sm:$0xff]   ;;  %v6456_v34 = vpack.c.bf16 %v41_v30, %v40_v29  ;;  %v42_v35 = vld [vmem:[%s8809_s0 + $0x70] sm:$0xff]  ;;  %v43_v36 = vld [vmem:[%s8809_s0 + $0x78] sm:$0xff] }
   0xb   :  { %5357 = vmatpush3.bf16.msra.mxu0 %v5950_v2  ;;  %v5962_v37 = vld [vmem:[%s8813_s4 + $0x30] sm:$0xff]   ;;  %v6470_v38 = vpack.c.bf16 %v43_v36, %v42_v35  ;;  %v5963_v39 = vld [vmem:[%s8813_s4 + $0x38] sm:$0xff]   ;;  %v5964_v40 = vld [vmem:[%s8813_s4 + $0x40] sm:$0xff]  }
   0xc   :  { %5358 = vmatprep.subr.bf16.mxu0 %v5951_v3  ;;  %v5965_v41 = vld [vmem:[%s8813_s4 + $0x48] sm:$0xff]   ;;  %v5966_v42 = vld [vmem:[%s8813_s4 + $0x50] sm:$0xff]   ;;  %v5967_v43 = vld [vmem:[%s8813_s4 + $0x58] sm:$0xff]  }
   0xd   :  { %v5968_v44 = vld [vmem:[%s8813_s4 + $0x60] sm:$0xff]   ;;  %v5969_v45 = vld [vmem:[%s8813_s4 + $0x68] sm:$0xff]   ;;  %v5970_v46 = vld [vmem:[%s8813_s4 + $0x70] sm:$0xff]  }
   0xe   :  { %5387 = vmatpush3.bf16.xpose.msra.mxu1 %v6374_v10  ;;  %v5971_v47 = vld [vmem:[%s8813_s4 + $0x78] sm:$0xff]  }
   0xf   :  { %5359 = vmatpush3.bf16.msra.mxu0 %v5951_v3  ;;  %5388 = vmatprep.subr.bf16.mxu1 %v6391_v15 }
  0x10   :  { %5360 = vmatprep.subr.bf16.mxu0 %v5952_v9 }
  0x13   :  { %5361 = vmatpush3.bf16.msra.mxu0 %v5952_v9 }
  0x14   :  { %5362 = vmatprep.subr.bf16.mxu0 %v5953_v11 }
  0x16   :  { %5389 = vmatpush3.bf16.xpose.msra.mxu1 %v6391_v15 }
  0x17   :  { %5363 = vmatpush3.bf16.msra.mxu0 %v5953_v11  ;;  %5390 = vmatprep.subr.bf16.mxu1 %v6404_v19 }
  0x18   :  { %5364 = vmatprep.subr.bf16.mxu0 %v5954_v14 }
  0x1b   :  { %5365 = vmatpush3.bf16.msra.mxu0 %v5954_v14 }
  0x1c   :  { %5366 = vmatprep.subr.bf16.mxu0 %v5955_v16 }
  0x1e   :  { %5391 = vmatpush3.bf16.xpose.msra.mxu1 %v6404_v19 }
  0x1f   :  { %5367 = vmatpush3.bf16.msra.mxu0 %v5955_v16  ;;  %5392 = vmatprep.subr.bf16.mxu1 %v6425_v25 }
  0x20   :  { %5416 = vmatprep.subr.bf16.mxu0 %v5956_v20 }
  0x22   :  { %5369 = vmatmul.mubr.bf16.vlgmr.msra.gmra.mrb[0].mxu0 %v6374_v10 }
  0x23   :  { %5372 = vmatprep.mubr.bf16.mxu0 %v6391_v15  ;;  %5417 = vmatpush3.bf16.msra.mxu0 %v5956_v20 }
  0x24   :  { %5418 = vmatprep.subr.bf16.mxu0 %v5957_v21 }
  0x26   :  { %5393 = vmatpush3.bf16.xpose.msra.mxu1 %v6425_v25 }
  0x27   :  { %5419 = vmatpush3.bf16.msra.mxu0 %v5957_v21  ;;  %5394 = vmatprep.subr.bf16.mxu1 %v6449_v32 }
  0x28   :  { %5420 = vmatprep.subr.bf16.mxu0 %v5958_v24 }
  0x2a   :  { %5373 = vmatmul.mubr.bf16.gmra.mrb[4].mxu0 %v6404_v19 }
  0x2b   :  { %5376 = vmatprep.mubr.bf16.mxu0 %v6425_v25  ;;  %5421 = vmatpush3.bf16.msra.mxu0 %v5958_v24 }
  0x2c   :  { %5422 = vmatprep.subr.bf16.mxu0 %v5959_v26 }
  0x2e   :  { %5395 = vmatpush3.bf16.xpose.msra.mxu1 %v6449_v32 }
  0x2f   :  { %5423 = vmatpush3.bf16.msra.mxu0 %v5959_v26  ;;  %5396 = vmatprep.subr.bf16.mxu1 %v6456_v34 }
  0x30   :  { %5424 = vmatprep.subr.bf16.mxu0 %v5960_v31 }
  0x32   :  { %5377 = vmatmul.mubr.bf16.gmra.mrb[8].mxu0 %v6449_v32 }
  0x33   :  { %5380 = vmatprep.mubr.bf16.mxu0 %v6456_v34  ;;  %5425 = vmatpush3.bf16.msra.mxu0 %v5960_v31 }
  0x34   :  { %5426 = vmatprep.subr.bf16.mxu0 %v5961_v33 }
  0x36   :  { %5397 = vmatpush3.bf16.xpose.msra.mxu1 %v6456_v34 }
  0x37   :  { %5427 = vmatpush3.bf16.msra.mxu0 %v5961_v33  ;;  %5398 = vmatprep.subr.bf16.mxu1 %v6470_v38 }
  0x38   :  { %5428 = vmatprep.subr.bf16.mxu0 %v5962_v37 }
  0x3a   :  { %5381 = vmatmul.mubr.bf16.gmra.mrb[12].mxu0 %v6470_v38 }
  0x3b   :  { %5429 = vmatpush3.bf16.msra.mxu0 %v5962_v37  ;;  %5432 = vmatprep.mubr.bf16.mxu0 %v6362_v6 }
  0x3c   :  { %5430 = vmatprep.subr.bf16.mxu0 %v5963_v39 }
  0x3e   :  { %5399 = vmatpush3.bf16.xpose.msra.mxu1 %v6470_v38 }
  0x3f   :  { %5431 = vmatpush3.bf16.msra.mxu0 %v5963_v39 }
  0x40   :  { %5448 = vmatprep.subr.bf16.mxu0 %v5964_v40 }
  0x42   :  { %5433 = vmatmul.mubr.bf16.vlgmr.msra.gmra.mrb[16].mxu0 %v6374_v10 }
  0x43   :  { %5449 = vmatpush3.bf16.msra.mxu0 %v5964_v40  ;;  %5436 = vmatprep.mubr.bf16.mxu0 %v6391_v15 }
  0x44   :  { %5450 = vmatprep.subr.bf16.mxu0 %v5965_v41 }
  0x47   :  { %5451 = vmatpush3.bf16.msra.mxu0 %v5965_v41 }
  0x48   :  { %5452 = vmatprep.subr.bf16.mxu0 %v5966_v42 }
  0x4a   :  { %5437 = vmatmul.mubr.bf16.gmra.mrb[20].mxu0 %v6404_v19 }
  0x4b   :  { %5453 = vmatpush3.bf16.msra.mxu0 %v5966_v42  ;;  %5440 = vmatprep.mubr.bf16.mxu0 %v6425_v25 }
  0x4c   :  { %5454 = vmatprep.subr.bf16.mxu0 %v5967_v43 }
  0x4f   :  { %5455 = vmatpush3.bf16.msra.mxu0 %v5967_v43 }
  0x50   :  { %5456 = vmatprep.subr.bf16.mxu0 %v5968_v44 }
  0x52   :  { %5441 = vmatmul.mubr.bf16.gmra.mrb[24].mxu0 %v6449_v32 }
  0x53   :  { %5457 = vmatpush3.bf16.msra.mxu0 %v5968_v44  ;;  %5444 = vmatprep.mubr.bf16.mxu0 %v6456_v34 }
  0x54   :  { %5458 = vmatprep.subr.bf16.mxu0 %v5969_v45 }
  0x57   :  { %5459 = vmatpush3.bf16.msra.mxu0 %v5969_v45 }
  0x58   :  { %5460 = vmatprep.subr.bf16.mxu0 %v5970_v46 }
  0x5a   :  { %5445 = vmatmul.mubr.bf16.gmra.mrb[28].mxu0 %v6470_v38 }
  0x5b   :  { %5461 = vmatpush3.bf16.msra.mxu0 %v5970_v46  ;;  %5464 = vmatprep.mubr.bf16.mxu0 %v6362_v6 }
  0x5c   :  { %5462 = vmatprep.subr.bf16.mxu0 %v5971_v47 }
  0x5f   :  { %5463 = vmatpush3.bf16.msra.mxu0 %v5971_v47 }
  0x62   :  { %5465 = vmatmul.mubr.bf16.vlgmr.msra.gmra.mrb[32].mxu0 %v6374_v10 }
  0x63   :  { %14 = vsyncpa [#allocation5], 0  ;;  %5468 = vmatprep.mubr.bf16.mxu0 %v6391_v15  ;;  %v5972_v48 = vld [vmem:[%s8813_s4 + $0xc0] sm:$0xff]   ;;  %v5974_v50 = vld [vmem:[%s8813_s4 + $0xc8] sm:$0xff]   ;;  %s6300_s25 = smov [#allocation4]  }
  0x64   :  { %5512 = vmatprep.subr.bf16.mxu0 %v5972_v48  ;;  %v5973_v49 = vld [vmem:[%s8813_s4 + $0x80] sm:$0xff]   ;;  %v5976_v51 = vld [vmem:[%s8813_s4 + $0xd0] sm:$0xff]   ;;  %v5978_v52 = vld [vmem:[%s8813_s4 + $0xd8] sm:$0xff]   ;;  %s4324_s26 = sshll.u32 %s6300_s25, 4  ;;  %s4325_s26 = int_to_ptr.vmem [resolvable:$true] %s4324_s26 }
  0x65   :  { %5513 = vmatpush3.bf16.msra.mxu0 %v5972_v48  ;;  %5480 = vmatprep.subr.bf16.mxu1 %v5973_v49  ;;  %v5980_v53 = vld [vmem:[%s8813_s4 + $0xe0] sm:$0xff]   ;;  %v5982_v54 = vld [vmem:[%s8813_s4 + $0xe8] sm:$0xff]   ;;  %v5984_v55 = vld [vmem:[%s8813_s4 + $0xf0] sm:$0xff]   ;;  %s6252_s27 = scalar_lea.vmem %s4325_s26, 6144  ;;  %p6257_p1 = scmp.lt.s32.totalorder %s4325_s26, %s4325_s26 }
  0x66   :  { %5514 = vmatprep.subr.bf16.mxu0 %v5974_v50  ;;  %v5986_v56 = vld [vmem:[%s8813_s4 + $0xf8] sm:$0xff]   ;;  %v5975_v63 = vld [vmem:[%s8813_s4 + $0x88] sm:$0xff]   ;;  %v5977_v2 = vld [vmem:[%s8813_s4 + $0x90] sm:$0xff]   ;;  %p6253_p0 = scmp.ne.s32.totalorder %s4325_s26, %s6252_s27  ;;  %p6258_p2 = scmp.lt.s32.totalorder %s6252_s27, %s6252_s27 }
  0x67   :  { %v5979_v8 = vld [vmem:[%s8813_s4 + $0x98] sm:$0xff]   ;;  %v5981_v12 = vld [vmem:[%s8813_s4 + $0xa0] sm:$0xff]   ;;  %v5983_v18 = vld [vmem:[%s8813_s4 + $0xa8] sm:$0xff]  }
  0x68   :  { %v5985_v22 = vld [vmem:[%s8813_s4 + $0xb0] sm:$0xff]   ;;  %v5987_v28 = vld [vmem:[%s8813_s4 + $0xb8] sm:$0xff]   ;;  %p6259_p3 = por %p6258_p2, %p6257_p1 }
  0x69   :  { %5515 = vmatpush3.bf16.msra.mxu0 %v5974_v50 }
  0x6a   :  { %5469 = vmatmul.mubr.bf16.gmra.mrb[36].mxu0 %v6404_v19  ;;  %5516 = vmatprep.subr.bf16.mxu0 %v5976_v51  ;;  %p6260_p4 = pnand %p6259_p3, %p6253_p0 }
  0x6b   :  { %5472 = vmatprep.mubr.bf16.mxu0 %v6425_v25 }
  0x6d   :  { %5517 = vmatpush3.bf16.msra.mxu0 %v5976_v51 }
  0x6e   :  { %5518 = vmatprep.subr.bf16.mxu0 %v5978_v52 }
  0x71   :  { %5519 = vmatpush3.bf16.msra.mxu0 %v5978_v52 }
  0x72   :  { %5473 = vmatmul.mubr.bf16.gmra.mrb[40].mxu0 %v6449_v32  ;;  %5520 = vmatprep.subr.bf16.mxu0 %v5980_v53 }
  0x73   :  { %5476 = vmatprep.mubr.bf16.mxu0 %v6456_v34 }
  0x75   :  { %5521 = vmatpush3.bf16.msra.mxu0 %v5980_v53 }
  0x76   :  { %5522 = vmatprep.subr.bf16.mxu0 %v5982_v54 }
  0x79   :  { %5523 = vmatpush3.bf16.msra.mxu0 %v5982_v54 }
  0x7a   :  { %5477 = vmatmul.mubr.bf16.gmra.mrb[44].mxu0 %v6470_v38  ;;  %5524 = vmatprep.subr.bf16.mxu0 %v5984_v55 }
  0x7b   :  { %5528 = vmatprep.mubr.bf16.mxu0 %v6362_v6 }
  0x7d   :  { %5525 = vmatpush3.bf16.msra.mxu0 %v5984_v55 }
  0x7e   :  { %5526 = vmatprep.subr.bf16.mxu0 %v5986_v56 }
  0x81   :  { %5527 = vmatpush3.bf16.msra.mxu0 %v5986_v56 }
  0x84   :  { %5529 = vmatmul.mubr.bf16.vlgmr.msra.gmra.mrb[48].mxu0 %v6374_v10 }
  0x85   :  { %5532 = vmatprep.mubr.bf16.mxu0 %v6391_v15 }
  0x8c   :  { %5533 = vmatmul.mubr.bf16.gmra.mrb[52].mxu0 %v6404_v19 }
  0x8d   :  { %5536 = vmatprep.mubr.bf16.mxu0 %v6425_v25 }
  0x94   :  { %5537 = vmatmul.mubr.bf16.gmra.mrb[56].mxu0 %v6449_v32 }
  0x95   :  { %5540 = vmatprep.mubr.bf16.mxu0 %v6456_v34 }
  0x9c   :  { %5541 = vmatmul.mubr.bf16.gmra.mrb[60].mxu0 %v6470_v38 }
  0xf5   :  { %v5370_v57 = vpop.f32.mrb[0].mxu0 }
  0xf6   :  { %v214_v58 = vpop.f32.mrb[1].mxu0 }
  0xf7   :  { %v5371_v59 = vpop.f32.mrb[2].mxu0 }
  0xf8   :  { %v278_v60 = vpack.c.bf16 %v5371_v59, %v5370_v57  ;;  %v217_v61 = vpop.f32.mrb[3].mxu0 }
  0xf9   :  { %v277_v62 = vpack.c.bf16 %v217_v61, %v214_v58 }
  0xfb   :  { %5400 = vmatprep.mubr.bf16.mxu1 %v277_v62 }
  0xfc   :  { %5401 = vmatmul.mubr.bf16.vlgmr.msra.gmra.mrb[0].mxu1 %v278_v60 }
  0xfd   :  { %v5374_v0 = vpop.f32.mrb[4].mxu0  ;;  %5481 = vmatpush3.bf16.msra.mxu1 %v5973_v49 }
  0xfe   :  { %v230_v1 = vpop.f32.mrb[5].mxu0  ;;  %5482 = vmatprep.subr.bf16.mxu1 %v5975_v63 }
  0xff   :  { %v5375_v3 = vpop.f32.mrb[6].mxu0 }
 0x100   :  { %v280_v4 = vpack.c.bf16 %v5375_v3, %v5374_v0  ;;  %v233_v5 = vpop.f32.mrb[7].mxu0 }
 0x101   :  { %v279_v7 = vpack.c.bf16 %v233_v5, %v230_v1  ;;  %5483 = vmatpush3.bf16.msra.mxu1 %v5975_v63 }
 0x102   :  { %5484 = vmatprep.subr.bf16.mxu1 %v5977_v2 }
 0x103   :  { %5404 = vmatprep.mubr.bf16.mxu1 %v279_v7 }
 0x104   :  { %5405 = vmatmul.mubr.bf16.gmra.mrb[4].mxu1 %v280_v4 }
 0x105   :  { %v5378_v9 = vpop.f32.mrb[8].mxu0  ;;  %5485 = vmatpush3.bf16.msra.mxu1 %v5977_v2 }
 0x106   :  { %v246_v11 = vpop.f32.mrb[9].mxu0  ;;  %5486 = vmatprep.subr.bf16.mxu1 %v5979_v8 }
 0x107   :  { %v5379_v13 = vpop.f32.mrb[10].mxu0 }
 0x108   :  { %v282_v14 = vpack.c.bf16 %v5379_v13, %v5378_v9  ;;  %v249_v16 = vpop.f32.mrb[11].mxu0 }
 0x109   :  { %v281_v17 = vpack.c.bf16 %v249_v16, %v246_v11  ;;  %5487 = vmatpush3.bf16.msra.mxu1 %v5979_v8 }
 0x10a   :  { %5488 = vmatprep.subr.bf16.mxu1 %v5981_v12 }
 0x10b   :  { %5408 = vmatprep.mubr.bf16.mxu1 %v281_v17 }
 0x10c   :  { %5409 = vmatmul.mubr.bf16.gmra.mrb[8].mxu1 %v282_v14 }
 0x10d   :  { %v5382_v20 = vpop.f32.mrb[12].mxu0  ;;  %5489 = vmatpush3.bf16.msra.mxu1 %v5981_v12 }
 0x10e   :  { %v262_v21 = vpop.f32.mrb[13].mxu0  ;;  %5490 = vmatprep.subr.bf16.mxu1 %v5983_v18 }
 0x10f   :  { %v5383_v23 = vpop.f32.mrb[14].mxu0 }
 0x110   :  { %v284_v24 = vpack.c.bf16 %v5383_v23, %v5382_v20  ;;  %v265_v26 = vpop.f32.mrb[15].mxu0 }
 0x111   :  { %v283_v27 = vpack.c.bf16 %v265_v26, %v262_v21  ;;  %5491 = vmatpush3.bf16.msra.mxu1 %v5983_v18 }
 0x112   :  { %5492 = vmatprep.subr.bf16.mxu1 %v5985_v22 }
 0x113   :  { %5412 = vmatprep.mubr.bf16.mxu1 %v283_v27 }
 0x114   :  { %5413 = vmatmul.mubr.bf16.gmra.mrb[12].mxu1 %v284_v24 }
 0x115   :  { %5493 = vmatpush3.bf16.msra.mxu1 %v5985_v22  ;;  %5496 = vmatprep.mubr.bf16.mxu1 %v6362_v6  ;;  %v5434_v29 = vpop.f32.mrb[16].mxu0 }
 0x116   :  { %5494 = vmatprep.subr.bf16.mxu1 %v5987_v28  ;;  %v496_v30 = vpop.f32.mrb[17].mxu0 }
 0x117   :  { %v5435_v31 = vpop.f32.mrb[18].mxu0 }
 0x118   :  { %v560_v33 = vpack.c.bf16 %v5435_v31, %v5434_v29  ;;  %v499_v35 = vpop.f32.mrb[19].mxu0 }
 0x119   :  { %5495 = vmatpush3.bf16.msra.mxu1 %v5987_v28  ;;  %v559_v36 = vpack.c.bf16 %v499_v35, %v496_v30 }
 0x11c   :  { %5497 = vmatmul.mubr.bf16.vlgmr.msra.gmra.mrb[16].mxu1 %v6374_v10 }
 0x11d   :  { %5500 = vmatprep.mubr.bf16.mxu1 %v6391_v15  ;;  %v5438_v37 = vpop.f32.mrb[20].mxu0 }
 0x11e   :  { %v512_v39 = vpop.f32.mrb[21].mxu0 }
 0x11f   :  { %v5439_v40 = vpop.f32.mrb[22].mxu0 }
 0x120   :  { %v562_v41 = vpack.c.bf16 %v5439_v40, %v5438_v37  ;;  %v515_v42 = vpop.f32.mrb[23].mxu0  ;;  %v5988_v40 = vld [vmem:[%s8811_s2] sm:$0xff]  }
 0x121   :  { %v561_v43 = vpack.c.bf16 %v515_v42, %v512_v39  ;;  %1333 = vmatprep.mubr.bf16.mxu0 %v5988_v40  ;;  %v51_v42 = vld [vmem:[%s8810_s1 + $0x38] sm:$0xff]  ;;  %v66_v40 = vld [vmem:[%s8810_s1 + $0xb0] sm:$0xff] }
 0x124   :  { %5501 = vmatmul.mubr.bf16.gmra.mrb[20].mxu1 %v6404_v19 }
 0x125   :  { %5504 = vmatprep.mubr.bf16.mxu1 %v6425_v25  ;;  %v5442_v6 = vpop.f32.mrb[24].mxu0 }
 0x126   :  { %v528_v44 = vpop.f32.mrb[25].mxu0 }
 0x127   :  { %v5443_v45 = vpop.f32.mrb[26].mxu0 }
 0x128   :  { %v564_v46 = vpack.c.bf16 %v5443_v45, %v5442_v6  ;;  %v531_v47 = vpop.f32.mrb[27].mxu0  ;;  %v44_v6 = vld [vmem:[%s8810_s1] sm:$0xff]  ;;  %v46_v45 = vld [vmem:[%s8810_s1 + $0x10] sm:$0xff] }
 0x129   :  { %v563_v48 = vpack.c.bf16 %v531_v47, %v528_v44  ;;  %v45_v44 = vld [vmem:[%s8810_s1 + $0x8] sm:$0xff] }
 0x12a   :  { %v53_v47 = vld [vmem:[%s8810_s1 + $0x48] sm:$0xff] }
 0x12c   :  { %5505 = vmatmul.mubr.bf16.gmra.mrb[24].mxu1 %v6449_v32 }
 0x12d   :  { %5508 = vmatprep.mubr.bf16.mxu1 %v6456_v34  ;;  %v5446_v10 = vpop.f32.mrb[28].mxu0 }
 0x12e   :  { %v544_v15 = vpop.f32.mrb[29].mxu0 }
 0x12f   :  { %v5447_v49 = vpop.f32.mrb[30].mxu0 }
 0x130   :  { %v566_v50 = vpack.c.bf16 %v5447_v49, %v5446_v10  ;;  %v547_v51 = vpop.f32.mrb[31].mxu0  ;;  %v55_v10 = vld [vmem:[%s8810_s1 + $0x58] sm:$0xff] }
 0x131   :  { %v565_v52 = vpack.c.bf16 %v547_v51, %v544_v15  ;;  %v47_v49 = vld [vmem:[%s8810_s1 + $0x18] sm:$0xff]  ;;  %v49_v51 = vld [vmem:[%s8810_s1 + $0x28] sm:$0xff] }
 0x134   :  { %5509 = vmatmul.mubr.bf16.gmra.mrb[28].mxu1 %v6470_v38 }
 0x135   :  { %v5466_v19 = vpop.f32.mrb[32].mxu0 }
 0x136   :  { %v666_v25 = vpop.f32.mrb[33].mxu0 }
 0x137   :  { %v5467_v53 = vpop.f32.mrb[34].mxu0 }
 0x138   :  { %v730_v54 = vpack.c.bf16 %v5467_v53, %v5466_v19  ;;  %v669_v55 = vpop.f32.mrb[35].mxu0 }
 0x139   :  { %v729_v56 = vpack.c.bf16 %v669_v55, %v666_v25 }
 0x13b   :  { %4776 = vmatprep.subr.bf16.mxu1 %v729_v56 }
 0x13c   :  { %4777 = vmatpush3.bf16.msra.mxu1 %v559_v36 }
 0x13d   :  { %v5470_v57 = vpop.f32.mrb[36].mxu0  ;;  %4778 = vmatprep.subr.bf16.mxu1 %v730_v54 }
 0x13e   :  { %v682_v32 = vpop.f32.mrb[37].mxu0 }
 0x13f   :  { %v5471_v34 = vpop.f32.mrb[38].mxu0 }
 0x140   :  { %v732_v58 = vpack.c.bf16 %v5471_v34, %v5470_v57  ;;  %v685_v59 = vpop.f32.mrb[39].mxu0  ;;  %4779 = vmatpush3.bf16.msra.mxu1 %v560_v33 }
 0x141   :  { %v731_v60 = vpack.c.bf16 %v685_v59, %v682_v32 }
 0x143   :  { %4780 = vmatprep.subr.bf16.mxu1 %v731_v60 }
 0x144   :  { %4781 = vmatpush3.bf16.msra.mxu1 %v561_v43  ;;  %v52_v43 = vld [vmem:[%s8810_s1 + $0x40] sm:$0xff] }
 0x145   :  { %v5474_v61 = vpop.f32.mrb[40].mxu0  ;;  %4782 = vmatprep.subr.bf16.mxu1 %v732_v58 }
 0x146   :  { %v698_v38 = vpop.f32.mrb[41].mxu0 }
 0x147   :  { %v5475_v62 = vpop.f32.mrb[42].mxu0 }
 0x148   :  { %v734_v63 = vpack.c.bf16 %v5475_v62, %v5474_v61  ;;  %v701_v0 = vpop.f32.mrb[43].mxu0  ;;  %4783 = vmatpush3.bf16.msra.mxu1 %v562_v41  ;;  %v50_v41 = vld [vmem:[%s8810_s1 + $0x30] sm:$0xff] }
 0x149   :  { %v733_v1 = vpack.c.bf16 %v701_v0, %v698_v38 }
 0x14b   :  { %4784 = vmatprep.subr.bf16.mxu1 %v733_v1 }
 0x14c   :  { %4785 = vmatpush3.bf16.msra.mxu1 %v563_v48  ;;  %v54_v48 = vld [vmem:[%s8810_s1 + $0x50] sm:$0xff] }
 0x14d   :  { %v5478_v2 = vpop.f32.mrb[44].mxu0  ;;  %4786 = vmatprep.subr.bf16.mxu1 %v734_v63 }
 0x14e   :  { %v714_v3 = vpop.f32.mrb[45].mxu0 }
 0x14f   :  { %v5479_v4 = vpop.f32.mrb[46].mxu0 }
 0x150   :  { %v736_v5 = vpack.c.bf16 %v5479_v4, %v5478_v2  ;;  %v717_v7 = vpop.f32.mrb[47].mxu0  ;;  %4787 = vmatpush3.bf16.msra.mxu1 %v564_v46  ;;  %v62_v2 = vld [vmem:[%s8810_s1 + $0x90] sm:$0xff]  ;;  %v64_v4 = vld [vmem:[%s8810_s1 + $0xa0] sm:$0xff] }
 0x151   :  { %v735_v8 = vpack.c.bf16 %v717_v7, %v714_v3  ;;  %v63_v3 = vld [vmem:[%s8810_s1 + $0x98] sm:$0xff]  ;;  %v56_v7 = vld [vmem:[%s8810_s1 + $0x60] sm:$0xff] }
 0x153   :  { %4788 = vmatprep.subr.bf16.mxu1 %v735_v8  ;;  %v57_v8 = vld [vmem:[%s8810_s1 + $0x68] sm:$0xff] }
 0x154   :  { %4789 = vmatpush3.bf16.msra.mxu1 %v565_v52 }
 0x155   :  { %4790 = vmatprep.subr.bf16.mxu1 %v736_v5 }
 0x157   :  { %v6584_v9 = vpop.f32.mrb[48].mxu0 }
 0x158   :  { %4791 = vmatpush3.bf16.msra.mxu1 %v566_v50  ;;  %v1006_v11 = vpop.f32.mrb[49].mxu0  ;;  %v48_v50 = vld [vmem:[%s8810_s1 + $0x20] sm:$0xff] }
 0x159   :  { %v6586_v12 = vpop.f32.mrb[50].mxu0 }
 0x15a   :  { %v1070_v13 = vpack.c.bf16 %v6586_v12, %v6584_v9  ;;  %v1009_v14 = vpop.f32.mrb[51].mxu0 }
 0x15b   :  { %v1069_v16 = vpack.c.bf16 %v1009_v14, %v1006_v11  ;;  %v58_v11 = vld [vmem:[%s8810_s1 + $0x70] sm:$0xff] }
 0x15d   :  { %4840 = vmatprep.subr.bf16.mxu0 %v1069_v16  ;;  %v65_v16 = vld [vmem:[%s8810_s1 + $0xa8] sm:$0xff] }
 0x15f   :  { %v6590_v17 = vpop.f32.mrb[52].mxu0 }
 0x160   :  { %v6592_v18 = vpop.f32.mrb[53].mxu0 }
 0x161   :  { %v6594_v20 = vpop.f32.mrb[54].mxu0 }
 0x162   :  { %v6598_v22 = vpop.f32.mrb[55].mxu0 }
 0x163   :  { %v1071_v23 = vpack.c.bf16 %v6598_v22, %v6592_v18 }
 0x167   :  { %v6602_v24 = vpop.f32.mrb[56].mxu0 }
 0x168   :  { %v6604_v26 = vpop.f32.mrb[57].mxu0 }
 0x169   :  { %v6606_v27 = vpop.f32.mrb[58].mxu0 }
 0x16a   :  { %v6610_v29 = vpop.f32.mrb[59].mxu0 }
 0x16b   :  { %v8867_v18 = vpack.c.bf16 %v6610_v29, %v6604_v26 }
 0x16f   :  { %v6614_v31 = vpop.f32.mrb[60].mxu0 }
 0x170   :  { %v6616_v33 = vpop.f32.mrb[61].mxu0 }
 0x171   :  { %v6618_v35 = vpop.f32.mrb[62].mxu0 }
 0x172   :  { %v6622_v37 = vpop.f32.mrb[63].mxu0  ;;  %v8870_v29 = vpack.c.bf16 %v6618_v35, %v6614_v31  ;;  %v5991_v31 = vld [vmem:[%s8811_s2 + $0x18] sm:$0xff]  }
 0x1cf   :  { %v5402_v46 = vpop.f32.mrb[0].mxu1 }
 0x1d0   :  { %384 = vst [vmem:[#allocation4 + $0x10] sm:$0xff] %v5402_v46  ;;  %v319_v15 = vpop.f32.mrb[1].mxu1  ;;  %v6665_v52 = vmul.f32 %v5402_v46, %v50_v41  ;;  %v1084_v19 = vmul.f32 %v5402_v46, %v51_v42  ;;  %v6667_v25 = vmul.f32 %v5402_v46, %v52_v43  ;;  %v67_v41 = vld [vmem:[%s8810_s1 + $0xb8] sm:$0xff] }
 0x1d1   :  { %382 = vst [vmem:[#allocation4] sm:$0xff] %v319_v15  ;;  %v1077_v53 = vmul.f32 %v319_v15, %v44_v6  ;;  %v5403_v54 = vpop.f32.mrb[2].mxu1  ;;  %v1078_v55 = vmul.f32 %v319_v15, %v45_v44  ;;  %v6673_v58 = vmul.f32 %v319_v15, %v46_v45  ;;  %v59_v43 = vld [vmem:[%s8810_s1 + $0x78] sm:$0xff]  ;;  %v60_v6 = vld [vmem:[%s8810_s1 + $0x80] sm:$0xff]  ;;  %v61_v44 = vld [vmem:[%s8810_s1 + $0x88] sm:$0xff] }
 0x1d2   :  { %385 = vst [vmem:[#allocation4 + $0x18] sm:$0xff] %v5403_v54  ;;  %v6669_v56 = vmul.f32 %v5403_v54, %v53_v47  ;;  %v1087_v57 = vmul.f32 %v5403_v54, %v54_v48  ;;  %v6671_v32 = vmul.f32 %v5403_v54, %v55_v10  ;;  %v322_v34 = vpop.f32.mrb[3].mxu1 }
 0x1d3   :  { %383 = vst [vmem:[#allocation4 + $0x8] sm:$0xff] %v322_v34  ;;  %v1080_v59 = vmul.f32 %v322_v34, %v47_v49  ;;  %v1081_v60 = vmul.f32 %v322_v34, %v48_v50  ;;  %v6675_v61 = vmul.f32 %v322_v34, %v49_v51 }
 0x1d4   :  { %v1129_v38 = vpack.c.bf16 %v1087_v57, %v1084_v19  ;;  %v1128_v62 = vpack.c.bf16 %v6669_v56, %v6665_v52 }
 0x1d5   :  { %v1125_v0 = vpack.c.bf16 %v1080_v59, %v1077_v53  ;;  %v1126_v5 = vpack.c.bf16 %v1081_v60, %v1078_v55  ;;  %v74_v59 = vld [vmem:[%s8810_s1 + $0xf0] sm:$0xff]  ;;  %v75_v60 = vld [vmem:[%s8810_s1 + $0xf8] sm:$0xff] }
 0x1d7   :  { %v5406_v14 = vpop.f32.mrb[4].mxu1  ;;  %1236 = vmatprep.mubr.bf16.mxu1 %v1126_v5  ;;  %v69_v5 = vld [vmem:[%s8810_s1 + $0xc8] sm:$0xff] }
 0x1d8   :  { %388 = vst [vmem:[#allocation4 + $0x30] sm:$0xff] %v5406_v14  ;;  %v335_v42 = vpop.f32.mrb[5].mxu1  ;;  %1237 = vmatmul.mubr.bf16.vlgmr.msra.gmra.mrb[32].mxu1 %v1125_v0  ;;  %v6719_v45 = vmul.f32 %v5406_v14, %v62_v2  ;;  %v6721_v46 = vmul.f32 %v5406_v14, %v63_v3  ;;  %v6723_v47 = vmul.f32 %v5406_v14, %v64_v4  ;;  %v68_v4 = vld [vmem:[%s8810_s1 + $0xc0] sm:$0xff]  ;;  %v78_v14 = vld [vmem:[%s8810_s1 + $0x110] sm:$0xff] }
 0x1d9   :  { %386 = vst [vmem:[#allocation4 + $0x20] sm:$0xff] %v335_v42  ;;  %v6725_v48 = vmul.f32 %v335_v42, %v56_v7  ;;  %v5407_v10 = vpop.f32.mrb[6].mxu1  ;;  %1244 = vmatprep.mubr.bf16.mxu1 %v1129_v38  ;;  %v1090_v15 = vmul.f32 %v335_v42, %v57_v8  ;;  %v6733_v19 = vmul.f32 %v335_v42, %v58_v11  ;;  %v76_v38 = vld [vmem:[%s8810_s1 + $0x100] sm:$0xff]  ;;  %v70_v7 = vld [vmem:[%s8810_s1 + $0xd0] sm:$0xff]  ;;  %v77_v11 = vld [vmem:[%s8810_s1 + $0x108] sm:$0xff] }
 0x1da   :  { %389 = vst [vmem:[#allocation4 + $0x38] sm:$0xff] %v5407_v10  ;;  %v6727_v49 = vmul.f32 %v5407_v10, %v65_v16  ;;  %v6729_v50 = vmul.f32 %v5407_v10, %v66_v40  ;;  %v6731_v51 = vmul.f32 %v5407_v10, %v67_v41  ;;  %v338_v52 = vpop.f32.mrb[7].mxu1  ;;  %v79_v16 = vld [vmem:[%s8810_s1 + $0x118] sm:$0xff]  ;;  %v72_v42 = vld [vmem:[%s8810_s1 + $0xe0] sm:$0xff] }
 0x1db   :  { %387 = vst [vmem:[#allocation4 + $0x28] sm:$0xff] %v338_v52  ;;  %v1092_v53 = vmul.f32 %v338_v52, %v59_v43  ;;  %v1093_v54 = vmul.f32 %v338_v52, %v60_v6  ;;  %v6735_v55 = vmul.f32 %v338_v52, %v61_v44  ;;  %v71_v41 = vld [vmem:[%s8810_s1 + $0xd8] sm:$0xff]  ;;  %v73_v43 = vld [vmem:[%s8810_s1 + $0xe8] sm:$0xff] }
 0x1dc   :  { %v1135_v56 = vpack.c.bf16 %v6729_v50, %v6721_v46  ;;  %v1134_v57 = vpack.c.bf16 %v6727_v49, %v6719_v45  ;;  %v8865_v49 = vpack.c.bf16 %v6594_v20, %v6590_v17  ;;  %v8868_v17 = vpack.c.bf16 %v6606_v27, %v6602_v24  ;;  %v5989_v24 = vld [vmem:[%s8811_s2 + $0x8] sm:$0xff]  }
 0x1dd   :  { %v1132_v0 = vpack.c.bf16 %v1093_v54, %v1090_v15  ;;  %v1131_v2 = vpack.c.bf16 %v1092_v53, %v6725_v48  ;;  %v8871_v27 = vpack.c.bf16 %v6675_v61, %v6673_v58  ;;  %v8873_v35 = vpack.c.bf16 %v6735_v55, %v6733_v19  ;;  %v5992_v58 = vld [vmem:[%s8811_s2 + $0x20] sm:$0xff]   ;;  %v5994_v19 = vld [vmem:[%s8811_s2 + $0x30] sm:$0xff]  }
 0x1de   :  { %v8874_v61 = vpack.c.bf16 %v6731_v51, %v6723_v47  ;;  %v5995_v47 = vld [vmem:[%s8811_s2 + $0x38] sm:$0xff]  }
 0x1df   :  { %v5410_v8 = vpop.f32.mrb[8].mxu1 }
 0x1e0   :  { %392 = vst [vmem:[#allocation4 + $0x50] sm:$0xff] %v5410_v8  ;;  %v351_v40 = vpop.f32.mrb[9].mxu1  ;;  %1245 = vmatmul.mubr.bf16.gmra.mrb[36].mxu1 %v1128_v62  ;;  %v6782_v6 = vmul.f32 %v5410_v8, %v74_v59  ;;  %v6784_v44 = vmul.f32 %v5410_v8, %v75_v60  ;;  %v6786_v48 = vmul.f32 %v5410_v8, %v76_v38 }
 0x1e1   :  { %390 = vst [vmem:[#allocation4 + $0x40] sm:$0xff] %v351_v40  ;;  %v6788_v62 = vmul.f32 %v351_v40, %v68_v4  ;;  %v5411_v10 = vpop.f32.mrb[10].mxu1  ;;  %1252 = vmatprep.mubr.bf16.mxu1 %v1132_v0  ;;  %v1102_v15 = vmul.f32 %v351_v40, %v69_v5  ;;  %v6796_v59 = vmul.f32 %v351_v40, %v70_v7  ;;  %v87_v7 = vld [vmem:[%s8810_s1 + $0x158] sm:$0xff]  ;;  %v85_v5 = vld [vmem:[%s8810_s1 + $0x148] sm:$0xff] }
 0x1e2   :  { %393 = vst [vmem:[#allocation4 + $0x58] sm:$0xff] %v5411_v10  ;;  %v6790_v52 = vmul.f32 %v5411_v10, %v77_v11  ;;  %v6792_v53 = vmul.f32 %v5411_v10, %v78_v14  ;;  %v6794_v54 = vmul.f32 %v5411_v10, %v79_v16  ;;  %v354_v34 = vpop.f32.mrb[11].mxu1  ;;  %v86_v11 = vld [vmem:[%s8810_s1 + $0x150] sm:$0xff] }
 0x1e3   :  { %391 = vst [vmem:[#allocation4 + $0x48] sm:$0xff] %v354_v34  ;;  %v1104_v60 = vmul.f32 %v354_v34, %v71_v41  ;;  %v1105_v38 = vmul.f32 %v354_v34, %v72_v42  ;;  %v6798_v8 = vmul.f32 %v354_v34, %v73_v43  ;;  %v88_v34 = vld [vmem:[%s8810_s1 + $0x160] sm:$0xff]  ;;  %v81_v42 = vld [vmem:[%s8810_s1 + $0x128] sm:$0xff]  ;;  %v82_v43 = vld [vmem:[%s8810_s1 + $0x130] sm:$0xff] }
 0x1e4   :  { %v1141_v4 = vpack.c.bf16 %v6792_v53, %v6784_v44  ;;  %v80_v41 = vld [vmem:[%s8810_s1 + $0x120] sm:$0xff]  ;;  %v90_v10 = vld [vmem:[%s8810_s1 + $0x170] sm:$0xff]  ;;  %v8876_v55 = vpack.c.bf16 %v6794_v54, %v6786_v48 }
 0x1e5   :  { %v1138_v14 = vpack.c.bf16 %v1105_v38, %v1102_v15  ;;  %v1137_v16 = vpack.c.bf16 %v1104_v60, %v6788_v62  ;;  %v89_v62 = vld [vmem:[%s8810_s1 + $0x168] sm:$0xff]  ;;  %v91_v15 = vld [vmem:[%s8810_s1 + $0x178] sm:$0xff]  ;;  %v84_v38 = vld [vmem:[%s8810_s1 + $0x140] sm:$0xff] }
 0x1e6   :  { %v83_v60 = vld [vmem:[%s8810_s1 + $0x138] sm:$0xff] }
 0x1e7   :  { %v5414_v44 = vpop.f32.mrb[12].mxu1 }
 0x1e8   :  { %396 = vst [vmem:[#allocation4 + $0x70] sm:$0xff] %v5414_v44  ;;  %v367_v53 = vpop.f32.mrb[13].mxu1  ;;  %1253 = vmatmul.mubr.bf16.gmra.mrb[40].mxu1 %v1131_v2  ;;  %v6845_v40 = vmul.f32 %v5414_v44, %v86_v11  ;;  %v1120_v3 = vmul.f32 %v5414_v44, %v87_v7  ;;  %v6847_v63 = vmul.f32 %v5414_v44, %v88_v34 }
 0x1e9   :  { %394 = vst [vmem:[#allocation4 + $0x60] sm:$0xff] %v367_v53  ;;  %v1113_v1 = vmul.f32 %v367_v53, %v80_v41  ;;  %v5415_v2 = vpop.f32.mrb[14].mxu1  ;;  %1260 = vmatprep.mubr.bf16.mxu1 %v1135_v56  ;;  %v1114_v36 = vmul.f32 %v367_v53, %v81_v42  ;;  %v6854_v21 = vmul.f32 %v367_v53, %v82_v43 }
 0x1ea   :  { %397 = vst [vmem:[#allocation4 + $0x78] sm:$0xff] %v5415_v2  ;;  %v1122_v39 = vmul.f32 %v5415_v2, %v89_v62  ;;  %v1123_v28 = vmul.f32 %v5415_v2, %v90_v10  ;;  %v6852_v30 = vmul.f32 %v5415_v2, %v91_v15  ;;  %v370_v0 = vpop.f32.mrb[15].mxu1  ;;  %v8869_v15 = vpack.c.bf16 %v6622_v37, %v6616_v33  ;;  %v5990_v33 = vld [vmem:[%s8811_s2 + $0x10] sm:$0xff]  }
 0x1eb   :  { %395 = vst [vmem:[#allocation4 + $0x68] sm:$0xff] %v370_v0  ;;  %v1116_v11 = vmul.f32 %v370_v0, %v83_v60  ;;  %v1117_v7 = vmul.f32 %v370_v0, %v84_v38  ;;  %v6856_v34 = vmul.f32 %v370_v0, %v85_v5  ;;  %v8872_v37 = vpack.c.bf16 %v6671_v32, %v6667_v25  ;;  %v5993_v25 = vld [vmem:[%s8811_s2 + $0x28] sm:$0xff]  }
 0x1ec   :  { %v1147_v41 = vpack.c.bf16 %v1123_v28, %v1120_v3  ;;  %v1146_v44 = vpack.c.bf16 %v1122_v39, %v6845_v40  ;;  %v1148_v46 = vpack.c.bf16 %v6852_v30, %v6847_v63  ;;  %v8875_v32 = vpack.c.bf16 %v6798_v8, %v6796_v59 }
 0x1ed   :  { %v1144_v50 = vpack.c.bf16 %v1117_v7, %v1114_v36  ;;  %v1143_v56 = vpack.c.bf16 %v1116_v11, %v1113_v1  ;;  %v1145_v42 = vpack.c.bf16 %v6856_v34, %v6854_v21 }
 0x1ef   :  { %v5498_v62 = vpop.f32.mrb[16].mxu1 }
 0x1f0   :  { %v836_v10 = vpop.f32.mrb[17].mxu1  ;;  %1261 = vmatmul.mubr.bf16.gmra.mrb[44].mxu1 %v1134_v57 }
 0x1f1   :  { %v5499_v43 = vpop.f32.mrb[18].mxu1  ;;  %1268 = vmatprep.mubr.bf16.mxu1 %v1138_v14 }
 0x1f2   :  { %v900_v0 = vpack.c.bf16 %v5499_v43, %v5498_v62  ;;  %v839_v28 = vpop.f32.mrb[19].mxu1 }
 0x1f3   :  { %v899_v3 = vpack.c.bf16 %v839_v28, %v836_v10 }
 0x1f5   :  { %4841 = vmatpush3.bf16.msra.mxu0 %v899_v3 }
 0x1f6   :  { %4842 = vmatprep.subr.bf16.mxu0 %v1070_v13  ;;  %v8866_v13 = vpack.c.bf16 %v6790_v52, %v6782_v6 }
 0x1f7   :  { %v5502_v36 = vpop.f32.mrb[20].mxu1 }
 0x1f8   :  { %v852_v39 = vpop.f32.mrb[21].mxu1  ;;  %1269 = vmatmul.mubr.bf16.gmra.mrb[48].mxu1 %v1137_v16 }
 0x1f9   :  { %v5503_v1 = vpop.f32.mrb[22].mxu1  ;;  %1276 = vmatprep.mubr.bf16.mxu1 %v1141_v4  ;;  %4843 = vmatpush3.bf16.msra.mxu0 %v900_v0 }
 0x1fa   :  { %v902_v5 = vpack.c.bf16 %v5503_v1, %v5502_v36  ;;  %v855_v40 = vpop.f32.mrb[23].mxu1  ;;  %4844 = vmatprep.subr.bf16.mxu0 %v1071_v23 }
 0x1fb   :  { %v901_v45 = vpack.c.bf16 %v855_v40, %v852_v39 }
 0x1fd   :  { %4845 = vmatpush3.bf16.msra.mxu0 %v901_v45 }
 0x1fe   :  { %4846 = vmatprep.subr.bf16.mxu0 %v8865_v49 }
 0x1ff   :  { %v5506_v9 = vpop.f32.mrb[24].mxu1 }
 0x200   :  { %v868_v12 = vpop.f32.mrb[25].mxu1  ;;  %1277 = vmatmul.mubr.bf16.gmra.mrb[52].mxu1 %v8866_v13 }
 0x201   :  { %v5507_v57 = vpop.f32.mrb[26].mxu1  ;;  %1284 = vmatprep.mubr.bf16.mxu1 %v1144_v50  ;;  %4847 = vmatpush3.bf16.msra.mxu0 %v902_v5 }
 0x202   :  { %v904_v4 = vpack.c.bf16 %v5507_v57, %v5506_v9  ;;  %v871_v14 = vpop.f32.mrb[27].mxu1  ;;  %4848 = vmatprep.subr.bf16.mxu0 %v8867_v18 }
 0x203   :  { %v903_v22 = vpack.c.bf16 %v871_v14, %v868_v12 }
 0x205   :  { %4849 = vmatpush3.bf16.msra.mxu0 %v903_v22 }
 0x206   :  { %4850 = vmatprep.subr.bf16.mxu0 %v8868_v17 }
 0x207   :  { %v5510_v20 = vpop.f32.mrb[28].mxu1 }
 0x208   :  { %v884_v23 = vpop.f32.mrb[29].mxu1  ;;  %1285 = vmatmul.mubr.bf16.gmra.mrb[56].mxu1 %v1143_v56 }
 0x209   :  { %v5511_v6 = vpop.f32.mrb[30].mxu1  ;;  %1292 = vmatprep.mubr.bf16.mxu1 %v1147_v41  ;;  %4851 = vmatpush3.bf16.msra.mxu0 %v904_v4 }
 0x20a   :  { %v906_v52 = vpack.c.bf16 %v5511_v6, %v5510_v20  ;;  %v887_v16 = vpop.f32.mrb[31].mxu1  ;;  %4852 = vmatprep.subr.bf16.mxu0 %v8869_v15 }
 0x20b   :  { %v905_v26 = vpack.c.bf16 %v887_v16, %v884_v23 }
 0x20d   :  { %4853 = vmatpush3.bf16.msra.mxu0 %v905_v26 }
 0x20e   :  { %4854 = vmatprep.subr.bf16.mxu0 %v8870_v29 }
 0x210   :  { %1293 = vmatmul.mubr.bf16.gmra.mrb[60].mxu1 %v1146_v44 }
 0x211   :  { %4855 = vmatpush3.bf16.msra.mxu0 %v906_v52  ;;  %v6956_v52 = vld [vmem:[%s8814_s5] ss:$0 sm:$0xff] }
 0x214   :  { %1334 = vmatmul.mubr.bf16.vlgmr.msra.gmra.mrb[64].mxu0 %v8871_v27 }
 0x215   :  { %1341 = vmatprep.mubr.bf16.mxu0 %v5989_v24 }
 0x21c   :  { %1342 = vmatmul.mubr.bf16.gmra.mrb[68].mxu0 %v8872_v37 }
 0x21d   :  { %1349 = vmatprep.mubr.bf16.mxu0 %v5990_v33 }
 0x224   :  { %1350 = vmatmul.mubr.bf16.gmra.mrb[72].mxu0 %v8873_v35 }
 0x225   :  { %1357 = vmatprep.mubr.bf16.mxu0 %v5991_v31 }
 0x22c   :  { %1358 = vmatmul.mubr.bf16.gmra.mrb[76].mxu0 %v8874_v61 }
 0x22d   :  { %1365 = vmatprep.mubr.bf16.mxu0 %v5992_v58 }
 0x234   :  { %1366 = vmatmul.mubr.bf16.gmra.mrb[80].mxu0 %v8875_v32 }
 0x235   :  { %1373 = vmatprep.mubr.bf16.mxu0 %v5993_v25 }
 0x23c   :  { %1374 = vmatmul.mubr.bf16.gmra.mrb[84].mxu0 %v8876_v55 }
 0x23d   :  { %1381 = vmatprep.mubr.bf16.mxu0 %v5994_v19 }
 0x244   :  { %1382 = vmatmul.mubr.bf16.gmra.mrb[88].mxu0 %v1145_v42 }
 0x245   :  { %1389 = vmatprep.mubr.bf16.mxu0 %v5995_v47 }
 0x24c   :  { %1390 = vmatmul.mubr.bf16.gmra.mrb[92].mxu0 %v1148_v46 }
 0x2ab   :  { %v4792_v51 = vpop.f32.mrb[32].mxu1 }
 0x2ac   :  { %v4793_v59 = vpop.f32.mrb[33].mxu1 }
 0x2ad   :  { %v4794_v8 = vadd.f32 %v4793_v59, %v4792_v51  ;;  %v4795_v53 = vpop.f32.mrb[34].mxu1 }
 0x2ae   :  { %v4796_v48 = vpop.f32.mrb[35].mxu1 }
 0x2af   :  { %v4797_v54 = vadd.f32 %v4796_v48, %v4795_v53  ;;  %v1239_v24 = vadd.f32 %v4794_v8, %v6956_v52 }
 0x2b1   :  { %v1242_v31 = vadd.f32 %v4797_v54, %v6956_v52 }
 0x2b3   :  { %v4798_v60 = vpop.f32.mrb[36].mxu1 }
 0x2b4   :  { %v4799_v38 = vpop.f32.mrb[37].mxu1 }
 0x2b5   :  { %v4800_v2 = vadd.f32 %v4799_v38, %v4798_v60  ;;  %v4801_v11 = vpop.f32.mrb[38].mxu1 }
 0x2b6   :  { %v4802_v7 = vpop.f32.mrb[39].mxu1 }
 0x2b7   :  { %v4803_v41 = vadd.f32 %v4802_v7, %v4801_v11  ;;  %v1247_v19 = vadd.f32 %v4800_v2, %v6956_v52 }
 0x2b9   :  { %v1250_v59 = vadd.f32 %v4803_v41, %v6956_v52 }
 0x2bb   :  { %v4804_v44 = vpop.f32.mrb[40].mxu1 }
 0x2bc   :  { %v4805_v21 = vpop.f32.mrb[41].mxu1 }
 0x2bd   :  { %v4806_v34 = vadd.f32 %v4805_v21, %v4804_v44  ;;  %v4807_v50 = vpop.f32.mrb[42].mxu1 }
 0x2be   :  { %v4808_v56 = vpop.f32.mrb[43].mxu1 }
 0x2bf   :  { %v4809_v42 = vadd.f32 %v4808_v56, %v4807_v50  ;;  %v1255_v38 = vadd.f32 %v4806_v34, %v6956_v52 }
 0x2c1   :  { %v1258_v44 = vadd.f32 %v4809_v42, %v6956_v52 }
 0x2c3   :  { %v4810_v30 = vpop.f32.mrb[44].mxu1 }
 0x2c4   :  { %v4811_v63 = vpop.f32.mrb[45].mxu1 }
 0x2c5   :  { %v6935_v46 = vadd.f32 %v4811_v63, %v4810_v30  ;;  %v4813_v62 = vpop.f32.mrb[46].mxu1 }
 0x2c6   :  { %v4814_v10 = vpop.f32.mrb[47].mxu1 }
 0x2c7   :  { %v6937_v43 = vadd.f32 %v4814_v10, %v4813_v62  ;;  %v1263_v34 = vadd.f32 %v6935_v46, %v6956_v52 }
 0x2c9   :  { %v1266_v42 = vadd.f32 %v6937_v43, %v6956_v52 }
 0x2cb   :  { %v4816_v0 = vpop.f32.mrb[48].mxu1 }
 0x2cc   :  { %v4817_v28 = vpop.f32.mrb[49].mxu1 }
 0x2cd   :  { %v6939_v3 = vadd.f32 %v4817_v28, %v4816_v0  ;;  %v4819_v36 = vpop.f32.mrb[50].mxu1 }
 0x2ce   :  { %v4820_v39 = vpop.f32.mrb[51].mxu1 }
 0x2cf   :  { %v6941_v1 = vadd.f32 %v4820_v39, %v4819_v36  ;;  %v1271_v46 = vadd.f32 %v6939_v3, %v6956_v52 }
 0x2d1   :  { %v1274_v43 = vadd.f32 %v6941_v1, %v6956_v52 }
 0x2d3   :  { %v4822_v5 = vpop.f32.mrb[52].mxu1 }
 0x2d4   :  { %v4823_v40 = vpop.f32.mrb[53].mxu1 }
 0x2d5   :  { %v6943_v45 = vadd.f32 %v4823_v40, %v4822_v5  ;;  %v4825_v49 = vpop.f32.mrb[54].mxu1 }
 0x2d6   :  { %v4826_v9 = vpop.f32.mrb[55].mxu1 }
 0x2d7   :  { %v6945_v12 = vadd.f32 %v4826_v9, %v4825_v49  ;;  %v1279_v3 = vadd.f32 %v6943_v45, %v6956_v52 }
 0x2d9   :  { %v1282_v1 = vadd.f32 %v6945_v12, %v6956_v52 }
 0x2db   :  { %v4828_v13 = vpop.f32.mrb[56].mxu1 }
 0x2dc   :  { %v4829_v57 = vpop.f32.mrb[57].mxu1 }
 0x2dd   :  { %v6947_v4 = vadd.f32 %v4829_v57, %v4828_v13  ;;  %v4831_v14 = vpop.f32.mrb[58].mxu1 }
 0x2de   :  { %v4832_v18 = vpop.f32.mrb[59].mxu1 }
 0x2df   :  { %v6949_v22 = vadd.f32 %v4832_v18, %v4831_v14  ;;  %v1287_v45 = vadd.f32 %v6947_v4, %v6956_v52 }
 0x2e1   :  { %v1290_v12 = vadd.f32 %v6949_v22, %v6956_v52 }
 0x2e3   :  { %v4834_v17 = vpop.f32.mrb[60].mxu1 }
 0x2e4   :  { %v4835_v20 = vpop.f32.mrb[61].mxu1 }
 0x2e5   :  { %v6951_v23 = vadd.f32 %v4835_v20, %v4834_v17  ;;  %v4837_v6 = vpop.f32.mrb[62].mxu1 }
 0x2e6   :  { %v4838_v16 = vpop.f32.mrb[63].mxu1 }
 0x2e7   :  { %v6958_v15 = vadd.f32 %v4838_v16, %v4837_v6  ;;  %v4856_v26 = vpop.f32.mrb[64].mxu0  ;;  %v1295_v4 = vadd.f32 %v6951_v23, %v6956_v52  ;;  %v5997_v23 = vld [vmem:[%s8812_s3 + $0x48] sm:$0xff]  }
 0x2e8   :  { %v4857_v29 = vpop.f32.mrb[65].mxu0 }
 0x2e9   :  { %v4858_v27 = vadd.f32 %v4857_v29, %v4856_v26  ;;  %v4859_v33 = vpop.f32.mrb[66].mxu0  ;;  %v1298_v22 = vadd.f32 %v6958_v15, %v6956_v52 }
 0x2ea   :  { %v4860_v37 = vpop.f32.mrb[67].mxu0 }
 0x2eb   :  { %v4861_v35 = vadd.f32 %v4860_v37, %v4859_v33  ;;  %v6962_v58 = vadd.f32 %v4858_v27, %v1239_v24 }
 0x2ed   :  { %1398 = vadd.xlane.f32.xlu0 %v6962_v58  ;;  %v6965_v61 = vadd.f32 %v4861_v35, %v1242_v31 }
 0x2ef   :  { %v4862_v25 = vpop.f32.mrb[68].mxu0 }
 0x2f0   :  { %v4863_v32 = vpop.f32.mrb[69].mxu0 }
 0x2f1   :  { %v4864_v55 = vadd.f32 %v4863_v32, %v4862_v25  ;;  %v4865_v47 = vpop.f32.mrb[70].mxu0  ;;  %1400 = vadd.xlane.f32.xlu0 %v6965_v61 }
 0x2f2   :  { %v4866_v51 = vpop.f32.mrb[71].mxu0 }
 0x2f3   :  { %v4867_v8 = vadd.f32 %v4866_v51, %v4865_v47  ;;  %v6970_v53 = vadd.f32 %v4864_v55, %v1247_v19 }
 0x2f5   :  { %1402 = vadd.xlane.f32.xlu1 %v6970_v53  ;;  %v6973_v48 = vadd.f32 %v4867_v8, %v1250_v59 }
 0x2f7   :  { %v4868_v54 = vpop.f32.mrb[72].mxu0 }
 0x2f8   :  { %v4869_v60 = vpop.f32.mrb[73].mxu0 }
 0x2f9   :  { %v4870_v11 = vadd.f32 %v4869_v60, %v4868_v54  ;;  %v4871_v2 = vpop.f32.mrb[74].mxu0  ;;  %1404 = vadd.xlane.f32.xlu1 %v6973_v48 }
 0x2fa   :  { %v4872_v7 = vpop.f32.mrb[75].mxu0 }
 0x2fb   :  { %v4873_v21 = vadd.f32 %v4872_v7, %v4871_v2  ;;  %v6978_v41 = vadd.f32 %v4870_v11, %v1255_v38  ;;  %v5996_v11 = vld [vmem:[%s8812_s3 + $0x40] sm:$0xff]  }
 0x2fc   :  { %5544 = vmatprep.subr.bf16.mxu1 %v5996_v11 }
 0x2fd   :  { %1406 = vadd.xlane.f32.xlu0 %v6978_v41  ;;  %v6981_v50 = vadd.f32 %v4873_v21, %v1258_v44  ;;  %5545 = vmatpush3.bf16.msra.mxu1 %v5996_v11 }
 0x2fe   :  { %5546 = vmatprep.subr.bf16.mxu1 %v5997_v23 }
 0x2ff   :  { %v4874_v56 = vpop.f32.mrb[76].mxu0  ;;  %1408 = vadd.xlane.f32.xlu1 %v6981_v50 }
 0x300   :  { %v4875_v30 = vpop.f32.mrb[77].mxu0 }
 0x301   :  { %v4876_v63 = vadd.f32 %v4875_v30, %v4874_v56  ;;  %v4877_v62 = vpop.f32.mrb[78].mxu0  ;;  %5547 = vmatpush3.bf16.msra.mxu1 %v5997_v23 }
 0x302   :  { %v4878_v10 = vpop.f32.mrb[79].mxu0 }
 0x303   :  { %v4879_v0 = vadd.f32 %v4878_v10, %v4877_v62  ;;  %v6988_v28 = vadd.f32 %v4876_v63, %v1263_v34 }
 0x305   :  { %1410 = vadd.xlane.f32.xlu0 %v6988_v28  ;;  %v6991_v36 = vadd.f32 %v4879_v0, %v1266_v42 }
 0x307   :  { %v4880_v39 = vpop.f32.mrb[80].mxu0  ;;  %1412 = vadd.xlane.f32.xlu1 %v6991_v36 }
 0x308   :  { %v4881_v5 = vpop.f32.mrb[81].mxu0 }
 0x309   :  { %v4882_v40 = vadd.f32 %v4881_v5, %v4880_v39  ;;  %v4883_v49 = vpop.f32.mrb[82].mxu0 }
 0x30a   :  { %v4884_v9 = vpop.f32.mrb[83].mxu0 }
 0x30b   :  { %v4885_v13 = vadd.f32 %v4884_v9, %v4883_v49  ;;  %v6998_v57 = vadd.f32 %v4882_v40, %v1271_v46 }
 0x30d   :  { %1414 = vadd.xlane.f32.xlu0 %v6998_v57  ;;  %v7001_v14 = vadd.f32 %v4885_v13, %v1274_v43 }
 0x30f   :  { %v4886_v18 = vpop.f32.mrb[84].mxu0  ;;  %1416 = vadd.xlane.f32.xlu1 %v7001_v14 }
 0x310   :  { %v4887_v17 = vpop.f32.mrb[85].mxu0 }
 0x311   :  { %v4888_v20 = vadd.f32 %v4887_v17, %v4886_v18  ;;  %v4889_v6 = vpop.f32.mrb[86].mxu0 }
 0x312   :  { %v4890_v16 = vpop.f32.mrb[87].mxu0 }
 0x313   :  { %v4891_v26 = vadd.f32 %v4890_v16, %v4889_v6  ;;  %v7008_v29 = vadd.f32 %v4888_v20, %v1279_v3  ;;  %v5999_v6 = vld [vmem:[%s8812_s3 + $0x58] sm:$0xff]  }
 0x315   :  { %1418 = vadd.xlane.f32.xlu0 %v7008_v29  ;;  %v7011_v24 = vadd.f32 %v4891_v26, %v1282_v1 }
 0x317   :  { %v4892_v27 = vpop.f32.mrb[88].mxu0  ;;  %1420 = vadd.xlane.f32.xlu1 %v7011_v24 }
 0x318   :  { %v4893_v33 = vpop.f32.mrb[89].mxu0 }
 0x319   :  { %v4894_v37 = vadd.f32 %v4893_v33, %v4892_v27  ;;  %v4895_v31 = vpop.f32.mrb[90].mxu0 }
 0x31a   :  { %v4896_v35 = vpop.f32.mrb[91].mxu0 }
 0x31b   :  { %v4897_v25 = vadd.f32 %v4896_v35, %v4895_v31  ;;  %v7018_v32 = vadd.f32 %v4894_v37, %v1287_v45  ;;  %v6001_v31 = vld [vmem:[%s8812_s3 + $0x68] sm:$0xff]  }
 0x31d   :  { %1422 = vadd.xlane.f32.xlu0 %v7018_v32  ;;  %v7021_v19 = vadd.f32 %v4897_v25, %v1290_v12 }
 0x31f   :  { %v4898_v55 = vpop.f32.mrb[92].mxu0  ;;  %1424 = vadd.xlane.f32.xlu1 %v7021_v19 }
 0x320   :  { %v4899_v47 = vpop.f32.mrb[93].mxu0 }
 0x321   :  { %v4900_v51 = vadd.f32 %v4899_v47, %v4898_v55  ;;  %v4901_v59 = vpop.f32.mrb[94].mxu0 }
 0x322   :  { %v4902_v8 = vpop.f32.mrb[95].mxu0 }
 0x323   :  { %v4903_v54 = vadd.f32 %v4902_v8, %v4901_v59  ;;  %v7028_v60 = vadd.f32 %v4900_v51, %v1295_v4  ;;  %v6003_v59 = vld [vmem:[%s8812_s3 + $0x78] sm:$0xff]  }
 0x325   :  { %1426 = vadd.xlane.f32.xlu0 %v7028_v60  ;;  %v7031_v38 = vadd.f32 %v4903_v54, %v1298_v22 }
 0x327   :  { %1428 = vadd.xlane.f32.xlu1 %v7031_v38 }
 0x37a   :  { %v1399_v52 = vpop.xlane.xlu0 %1398 }
 0x37b   :  { %v1431_v15 = vmul.f32 0.0078125, %v1399_v52 }
 0x37d   :  { %v7041_v2 = vsub.f32 %v6962_v58, %v1431_v15 }
 0x37e   :  { %v1401_v7 = vpop.xlane.xlu0 %1400 }
 0x37f   :  { %v1432_v44 = vmul.f32 0.0078125, %v1401_v7  ;;  %v1463_v21 = vmul.f32 %v7041_v2, %v7041_v2 }
 0x381   :  { %v7046_v56 = vsub.f32 %v6965_v61, %v1432_v44  ;;  %1479 = vadd.xlane.f32.xlu0 %v1463_v21 }
 0x382   :  { %v1403_v30 = vpop.xlane.xlu1 %1402 }
 0x383   :  { %v1433_v34 = vmul.f32 0.0078125, %v1403_v30  ;;  %v1464_v63 = vmul.f32 %v7046_v56, %v7046_v56 }
 0x385   :  { %v7051_v62 = vsub.f32 %v6970_v53, %v1433_v34  ;;  %1481 = vadd.xlane.f32.xlu1 %v1464_v63 }
 0x386   :  { %v1405_v58 = vpop.xlane.xlu1 %1404 }
 0x387   :  { %v1434_v10 = vmul.f32 0.0078125, %v1405_v58  ;;  %v1465_v42 = vmul.f32 %v7051_v62, %v7051_v62  ;;  %v6004_v58 = vld [vmem:[%s8813_s4 + $0x100] sm:$0xff]  }
 0x389   :  { %v7056_v0 = vsub.f32 %v6973_v48, %v1434_v10  ;;  %1483 = vadd.xlane.f32.xlu0 %v1465_v42 }
 0x38a   :  { %v1407_v61 = vpop.xlane.xlu0 %1406 }
 0x38b   :  { %v1435_v39 = vmul.f32 0.0078125, %v1407_v61  ;;  %v1466_v5 = vmul.f32 %v7056_v0, %v7056_v0 }
 0x38c   :  { %v1409_v46 = vpop.xlane.xlu1 %1408 }
 0x38d   :  { %v7061_v40 = vsub.f32 %v6978_v41, %v1435_v39  ;;  %v1436_v53 = vmul.f32 0.0078125, %v1409_v46  ;;  %1485 = vadd.xlane.f32.xlu1 %v1466_v5  ;;  %v5998_v41 = vld [vmem:[%s8812_s3 + $0x50] sm:$0xff]  }
 0x38e   :  { %5548 = vmatprep.subr.bf16.mxu1 %v5998_v41 }
 0x38f   :  { %v7064_v49 = vsub.f32 %v6981_v50, %v1436_v53  ;;  %v1467_v9 = vmul.f32 %v7061_v40, %v7061_v40  ;;  %5549 = vmatpush3.bf16.msra.mxu1 %v5998_v41 }
 0x390   :  { %5550 = vmatprep.subr.bf16.mxu1 %v5999_v6 }
 0x391   :  { %1487 = vadd.xlane.f32.xlu0 %v1467_v9  ;;  %v1468_v48 = vmul.f32 %v7064_v49, %v7064_v49 }
 0x392   :  { %v1411_v43 = vpop.xlane.xlu0 %1410 }
 0x393   :  { %v1437_v13 = vmul.f32 0.0078125, %v1411_v43  ;;  %1489 = vadd.xlane.f32.xlu1 %v1468_v48  ;;  %5551 = vmatpush3.bf16.msra.mxu1 %v5999_v6 }
 0x394   :  { %v1413_v18 = vpop.xlane.xlu1 %1412 }
 0x395   :  { %v7074_v17 = vsub.f32 %v6988_v28, %v1437_v13  ;;  %v1438_v50 = vmul.f32 0.0078125, %v1413_v18 }
 0x397   :  { %v7077_v3 = vsub.f32 %v6991_v36, %v1438_v50  ;;  %v1469_v20 = vmul.f32 %v7074_v17, %v7074_v17  ;;  %v6000_v36 = vld [vmem:[%s8812_s3 + $0x60] sm:$0xff]  }
 0x398   :  { %5552 = vmatprep.subr.bf16.mxu1 %v6000_v36 }
 0x399   :  { %1491 = vadd.xlane.f32.xlu0 %v1469_v20  ;;  %v1470_v16 = vmul.f32 %v7077_v3, %v7077_v3  ;;  %5553 = vmatpush3.bf16.msra.mxu1 %v6000_v36 }
 0x39a   :  { %v1415_v1 = vpop.xlane.xlu0 %1414  ;;  %5554 = vmatprep.subr.bf16.mxu1 %v6001_v31 }
 0x39b   :  { %v1439_v28 = vmul.f32 0.0078125, %v1415_v1  ;;  %1493 = vadd.xlane.f32.xlu1 %v1470_v16 }
 0x39c   :  { %v1417_v26 = vpop.xlane.xlu1 %1416 }
 0x39d   :  { %v7090_v27 = vsub.f32 %v6998_v57, %v1439_v28  ;;  %v1440_v33 = vmul.f32 0.0078125, %v1417_v26  ;;  %5555 = vmatpush3.bf16.msra.mxu1 %v6001_v31 }
 0x39f   :  { %v7093_v45 = vsub.f32 %v7001_v14, %v1440_v33  ;;  %v1471_v37 = vmul.f32 %v7090_v27, %v7090_v27  ;;  %v6002_v14 = vld [vmem:[%s8812_s3 + $0x70] sm:$0xff]  }
 0x3a0   :  { %5556 = vmatprep.subr.bf16.mxu1 %v6002_v14 }
 0x3a1   :  { %1495 = vadd.xlane.f32.xlu0 %v1471_v37  ;;  %v1472_v35 = vmul.f32 %v7093_v45, %v7093_v45  ;;  %5557 = vmatpush3.bf16.msra.mxu1 %v6002_v14 }
 0x3a2   :  { %v1419_v12 = vpop.xlane.xlu0 %1418  ;;  %5558 = vmatprep.subr.bf16.mxu1 %v6003_v59 }
 0x3a3   :  { %v1441_v57 = vmul.f32 0.0078125, %v1419_v12  ;;  %1497 = vadd.xlane.f32.xlu1 %v1472_v35 }
 0x3a4   :  { %v1421_v25 = vpop.xlane.xlu1 %1420 }
 0x3a5   :  { %v7106_v55 = vsub.f32 %v7008_v29, %v1441_v57  ;;  %v1442_v47 = vmul.f32 0.0078125, %v1421_v25  ;;  %5559 = vmatpush3.bf16.msra.mxu1 %v6003_v59 }
 0x3a6   :  { %5608 = vmatprep.subr.bf16.mxu1 %v6004_v58 }
 0x3a7   :  { %v7109_v4 = vsub.f32 %v7011_v24, %v1442_v47  ;;  %v1473_v51 = vmul.f32 %v7106_v55, %v7106_v55 }
 0x3a9   :  { %1499 = vadd.xlane.f32.xlu0 %v1473_v51  ;;  %v1474_v8 = vmul.f32 %v7109_v4, %v7109_v4  ;;  %v6005_v51 = vld [vmem:[%s8813_s4 + $0x108] sm:$0xff]  }
 0x3aa   :  { %v1423_v22 = vpop.xlane.xlu0 %1422 }
 0x3ab   :  { %v1443_v29 = vmul.f32 0.0078125, %v1423_v22  ;;  %1501 = vadd.xlane.f32.xlu1 %v1474_v8 }
 0x3ac   :  { %v1425_v54 = vpop.xlane.xlu1 %1424 }
 0x3ad   :  { %v7119_v24 = vsub.f32 %v7018_v32, %v1443_v29  ;;  %v1444_v11 = vmul.f32 0.0078125, %v1425_v54 }
 0x3af   :  { %v7122_v23 = vsub.f32 %v7021_v19, %v1444_v11  ;;  %v1475_v52 = vmul.f32 %v7119_v24, %v7119_v24 }
 0x3b1   :  { %1503 = vadd.xlane.f32.xlu0 %v1475_v52  ;;  %v1476_v15 = vmul.f32 %v7122_v23, %v7122_v23 }
 0x3b2   :  { %v1427_v7 = vpop.xlane.xlu0 %1426 }
 0x3b3   :  { %v1445_v44 = vmul.f32 0.0078125, %v1427_v7  ;;  %1505 = vadd.xlane.f32.xlu1 %v1476_v15  ;;  %v6006_v15 = vld [vmem:[%s8813_s4 + $0x110] sm:$0xff]  }
 0x3b4   :  { %v1429_v21 = vpop.xlane.xlu1 %1428 }
 0x3b5   :  { %v7129_v30 = vsub.f32 %v7028_v60, %v1445_v44  ;;  %v1446_v32 = vmul.f32 0.0078125, %v1429_v21 }
 0x3b7   :  { %v7132_v34 = vsub.f32 %v7031_v38, %v1446_v32  ;;  %v1477_v19 = vmul.f32 %v7129_v30, %v7129_v30 }
 0x3b9   :  { %1507 = vadd.xlane.f32.xlu0 %v1477_v19  ;;  %v1478_v63 = vmul.f32 %v7132_v34, %v7132_v34 }
 0x3bb   :  { %1509 = vadd.xlane.f32.xlu1 %v1478_v63 }
 0x40e   :  { %v1480_v10 = vpop.xlane.xlu0 %1479 }
 0x40f   :  { %v1511_v60 = vmul.f32 0.0078125, %v1480_v10 }
 0x411   :  { %v1527_v42 = vadd.f32 1e-05, %v1511_v60 }
 0x412   :  { %v1482_v61 = vpop.xlane.xlu1 %1481 }
 0x413   :  { %v1512_v39 = vmul.f32 0.0078125, %v1482_v61  ;;  %6076 = vrsqrt.f32 %v1527_v42  ;;  %v6008_v61 = vld [vmem:[%s8813_s4 + $0x120] sm:$0xff]  }
 0x415   :  { %v1528_v38 = vadd.f32 1e-05, %v1512_v39 }
 0x416   :  { %v1484_v5 = vpop.xlane.xlu0 %1483 }
 0x417   :  { %6078 = vrsqrt.f32 %v1528_v38  ;;  %v1513_v46 = vmul.f32 0.0078125, %v1484_v5 }
 0x419   :  { %v1529_v53 = vadd.f32 1e-05, %v1513_v46 }
 0x41a   :  { %v1486_v9 = vpop.xlane.xlu1 %1485 }
 0x41b   :  { %v1514_v48 = vmul.f32 0.0078125, %v1486_v9  ;;  %6080 = vrsqrt.f32 %v1529_v53 }
 0x41d   :  { %v1530_v43 = vadd.f32 1e-05, %v1514_v48  ;;  %v6077_v18 = vpop.eup %6076 }
 0x41e   :  { %v1488_v13 = vpop.xlane.xlu0 %1487  ;;  %v7142_v1 = vmul.f32 %v6077_v18, %v7041_v2 }
 0x41f   :  { %6082 = vrsqrt.f32 %v1530_v43  ;;  %v1515_v41 = vmul.f32 0.0078125, %v1488_v13 }
 0x420   :  { %v1490_v50 = vpop.xlane.xlu1 %1489 }
 0x421   :  { %v6079_v20 = vpop.eup %6078  ;;  %v1531_v6 = vadd.f32 1e-05, %v1515_v41  ;;  %v1516_v16 = vmul.f32 0.0078125, %v1490_v50  ;;  %v6010_v41 = vld [vmem:[%s8813_s4 + $0x130] sm:$0xff]  }
 0x422   :  { %v7145_v28 = vmul.f32 %v6079_v20, %v7046_v56 }
 0x423   :  { %6084 = vrsqrt.f32 %v1531_v6  ;;  %v1532_v26 = vadd.f32 1e-05, %v1516_v16 }
 0x424   :  { %v1575_v36 = vpack.c.bf16 %v7145_v28, %v7142_v1 }
 0x425   :  { %6086 = vrsqrt.f32 %v1532_v26  ;;  %v6081_v37 = vpop.eup %6080 }
 0x426   :  { %5560 = vmatprep.mubr.bf16.mxu1 %v1575_v36  ;;  %5576 = vmatprep.subr.bf16.mxu0 %v1575_v36  ;;  %v1492_v33 = vpop.xlane.xlu0 %1491  ;;  %v7150_v25 = vmul.f32 %v6081_v37, %v7051_v62 }
 0x427   :  { %v1517_v31 = vmul.f32 0.0078125, %v1492_v33  ;;  %5577 = vmatpush3.bf16.xpose.msra.mxu0 %v1575_v36 }
 0x428   :  { %v1494_v35 = vpop.xlane.xlu1 %1493 }
 0x429   :  { %v6083_v12 = vpop.eup %6082  ;;  %v1533_v57 = vadd.f32 1e-05, %v1517_v31  ;;  %v1518_v2 = vmul.f32 0.0078125, %v1494_v35 }
 0x42a   :  { %v7153_v56 = vmul.f32 %v6083_v12, %v7056_v0  ;;  %v6012_v12 = vld [vmem:[%s8813_s4 + $0x180] sm:$0xff]  }
 0x42b   :  { %6088 = vrsqrt.f32 %v1533_v57  ;;  %v1534_v14 = vadd.f32 1e-05, %v1518_v2 }
 0x42c   :  { %v1576_v47 = vpack.c.bf16 %v7153_v56, %v7150_v25 }
 0x42d   :  { %v6085_v59 = vpop.eup %6084  ;;  %6090 = vrsqrt.f32 %v1534_v14 }
 0x42e   :  { %5561 = vmatmul.mubr.bf16.vlgmr.msra.gmra.mrb[64].mxu1 %v1576_v47  ;;  %5578 = vmatprep.subr.bf16.mxu0 %v1576_v47  ;;  %v1496_v8 = vpop.xlane.xlu0 %1495  ;;  %v7161_v29 = vmul.f32 %v6085_v59, %v7061_v40  ;;  %v6007_v40 = vld [vmem:[%s8813_s4 + $0x118] sm:$0xff]  }
 0x42f   :  { %v6087_v22 = vpop.eup %6086  ;;  %v1519_v62 = vmul.f32 0.0078125, %v1496_v8  ;;  %5579 = vmatpush3.bf16.xpose.msra.mxu0 %v1576_v47  ;;  %5609 = vmatpush3.bf16.msra.mxu1 %v6004_v58 }
 0x430   :  { %v1498_v0 = vpop.xlane.xlu1 %1497  ;;  %v7164_v54 = vmul.f32 %v6087_v22, %v7064_v49  ;;  %5610 = vmatprep.subr.bf16.mxu1 %v6005_v51  ;;  %v1868_v22 = vmax.f32 %v7145_v28, 0.0  ;;  %v1869_v28 = vmax.f32 %v7150_v25, 0.0  ;;  %v6014_v25 = vld [vmem:[%s8813_s4 + $0x190] sm:$0xff]  }
 0x431   :  { %v1535_v11 = vadd.f32 1e-05, %v1519_v62  ;;  %v1520_v52 = vmul.f32 0.0078125, %v1498_v0 }
 0x432   :  { %v1577_v7 = vpack.c.bf16 %v7164_v54, %v7161_v29 }
 0x433   :  { %6092 = vrsqrt.f32 %v1535_v11  ;;  %v1536_v44 = vadd.f32 1e-05, %v1520_v52  ;;  %5611 = vmatpush3.bf16.msra.mxu1 %v6005_v51  ;;  %v1867_v11 = vmax.f32 %v7142_v1, 0.0 }
 0x434   :  { %5564 = vmatprep.mubr.bf16.mxu1 %v1577_v7  ;;  %5580 = vmatprep.subr.bf16.mxu0 %v1577_v7 }
 0x435   :  { %v6089_v49 = vpop.eup %6088  ;;  %6094 = vrsqrt.f32 %v1536_v44  ;;  %5612 = vmatprep.subr.bf16.mxu1 %v6006_v15 }
 0x436   :  { %v1500_v21 = vpop.xlane.xlu0 %1499  ;;  %v7175_v58 = vmul.f32 %v6089_v49, %v7074_v17  ;;  %v6009_v17 = vld [vmem:[%s8813_s4 + $0x128] sm:$0xff]   ;;  %v6015_v49 = vld [vmem:[%s8813_s4 + $0x198] sm:$0xff]  }
 0x437   :  { %v6091_v32 = vpop.eup %6090  ;;  %v1521_v19 = vmul.f32 0.0078125, %v1500_v21  ;;  %5581 = vmatpush3.bf16.xpose.msra.mxu0 %v1577_v7  ;;  %5613 = vmatpush3.bf16.msra.mxu1 %v6006_v15  ;;  %v7219_v15 = vpack.c.bf16 %v1868_v22, %v1867_v11 }
 0x438   :  { %v1502_v63 = vpop.xlane.xlu1 %1501  ;;  %v7178_v10 = vmul.f32 %v6091_v32, %v7077_v3  ;;  %5614 = vmatprep.subr.bf16.mxu1 %v6007_v40 }
 0x439   :  { %v1537_v60 = vadd.f32 1e-05, %v1521_v19  ;;  %v1522_v42 = vmul.f32 0.0078125, %v1502_v63  ;;  %v6016_v19 = vld [vmem:[%s8813_s4 + $0x1a0] sm:$0xff]  }
 0x43a   :  { %v1578_v39 = vpack.c.bf16 %v7178_v10, %v7175_v58 }
 0x43b   :  { %6096 = vrsqrt.f32 %v1537_v60  ;;  %v1538_v38 = vadd.f32 1e-05, %v1522_v42  ;;  %5615 = vmatpush3.bf16.msra.mxu1 %v6007_v40  ;;  %v6017_v42 = vld [vmem:[%s8813_s4 + $0x1a8] sm:$0xff]  }
 0x43c   :  { %5565 = vmatmul.mubr.bf16.gmra.mrb[68].mxu1 %v1578_v39  ;;  %5582 = vmatprep.subr.bf16.mxu0 %v1578_v39 }
 0x43d   :  { %v6093_v3 = vpop.eup %6092  ;;  %6098 = vrsqrt.f32 %v1538_v38  ;;  %5616 = vmatprep.subr.bf16.mxu1 %v6008_v61  ;;  %v6018_v38 = vld [vmem:[%s8813_s4 + $0x1b0] sm:$0xff]  }
 0x43e   :  { %v1504_v5 = vpop.xlane.xlu0 %1503  ;;  %v7189_v48 = vmul.f32 %v6093_v3, %v7090_v27  ;;  %v6011_v27 = vld [vmem:[%s8813_s4 + $0x138] sm:$0xff]  }
 0x43f   :  { %v6095_v46 = vpop.eup %6094  ;;  %v1523_v53 = vmul.f32 0.0078125, %v1504_v5  ;;  %5583 = vmatpush3.bf16.xpose.msra.mxu0 %v1578_v39  ;;  %5617 = vmatpush3.bf16.msra.mxu1 %v6008_v61  ;;  %v6019_v5 = vld [vmem:[%s8813_s4 + $0x1b8] sm:$0xff]  }
 0x440   :  { %v1506_v9 = vpop.xlane.xlu1 %1505  ;;  %v7192_v43 = vmul.f32 %v6095_v46, %v7093_v45  ;;  %5618 = vmatprep.subr.bf16.mxu1 %v6009_v17  ;;  %v1875_v44 = vmax.f32 %v7189_v48, 0.0  ;;  %v6020_v46 = vld [vmem:[%s8813_s4 + $0x140] sm:$0xff]  }
 0x441   :  { %v1539_v13 = vadd.f32 1e-05, %v1523_v53  ;;  %v1524_v18 = vmul.f32 0.0078125, %v1506_v9 }
 0x442   :  { %v1579_v50 = vpack.c.bf16 %v7192_v43, %v7189_v48 }
 0x443   :  { %6100 = vrsqrt.f32 %v1539_v13  ;;  %v1540_v20 = vadd.f32 1e-05, %v1524_v18  ;;  %5619 = vmatpush3.bf16.msra.mxu1 %v6009_v17 }
 0x444   :  { %5568 = vmatprep.mubr.bf16.mxu1 %v1579_v50  ;;  %5584 = vmatprep.subr.bf16.mxu0 %v1579_v50 }
 0x445   :  { %v6097_v45 = vpop.eup %6096  ;;  %6102 = vrsqrt.f32 %v1540_v20  ;;  %5620 = vmatprep.subr.bf16.mxu1 %v6010_v41  ;;  %v6023_v20 = vld [vmem:[%s8813_s4 + $0x158] sm:$0xff]  }
 0x446   :  { %v1508_v6 = vpop.xlane.xlu0 %1507  ;;  %v7203_v33 = vmul.f32 %v6097_v45, %v7106_v55 }
 0x447   :  { %v6099_v16 = vpop.eup %6098  ;;  %v1525_v26 = vmul.f32 0.0078125, %v1508_v6  ;;  %5585 = vmatpush3.bf16.xpose.msra.mxu0 %v1579_v50  ;;  %5621 = vmatpush3.bf16.msra.mxu1 %v6010_v41  ;;  %v6021_v41 = vld [vmem:[%s8813_s4 + $0x148] sm:$0xff]   ;;  %v6022_v50 = vld [vmem:[%s8813_s4 + $0x150] sm:$0xff]  }
 0x448   :  { %v1510_v36 = vpop.xlane.xlu1 %1509  ;;  %v7206_v37 = vmul.f32 %v6099_v16, %v7109_v4  ;;  %5622 = vmatprep.subr.bf16.mxu1 %v6011_v27 }
 0x449   :  { %v1541_v31 = vadd.f32 1e-05, %v1525_v26  ;;  %v1526_v35 = vmul.f32 0.0078125, %v1510_v36  ;;  %v6024_v36 = vld [vmem:[%s8813_s4 + $0x160] sm:$0xff]  }
 0x44a   :  { %v1580_v57 = vpack.c.bf16 %v7206_v37, %v7203_v33  ;;  %v1878_v32 = vmax.f32 %v7206_v37, 0.0  ;;  %v6025_v37 = vld [vmem:[%s8813_s4 + $0x168] sm:$0xff]  }
 0x44b   :  { %6104 = vrsqrt.f32 %v1541_v31  ;;  %v1542_v2 = vadd.f32 1e-05, %v1526_v35  ;;  %5623 = vmatpush3.bf16.msra.mxu1 %v6011_v27  ;;  %v6026_v31 = vld [vmem:[%s8813_s4 + $0x170] sm:$0xff]   ;;  %v6027_v35 = vld [vmem:[%s8813_s4 + $0x178] sm:$0xff]  }
 0x44c   :  { %5569 = vmatmul.mubr.bf16.gmra.mrb[72].mxu1 %v1580_v57  ;;  %5586 = vmatprep.subr.bf16.mxu0 %v1580_v57 }
 0x44d   :  { %v6101_v55 = vpop.eup %6100  ;;  %6106 = vrsqrt.f32 %v1542_v2  ;;  %5672 = vmatprep.subr.bf16.mxu1 %v6012_v12 }
 0x44e   :  { %v1571_v14 = vmul.f32 %v6101_v55, %v7119_v24  ;;  %v1870_v24 = vmax.f32 %v7153_v56, 0.0  ;;  %v1874_v56 = vmax.f32 %v7178_v10, 0.0 }
 0x44f   :  { %v6103_v4 = vpop.eup %6102  ;;  %5587 = vmatpush3.bf16.xpose.msra.mxu0 %v1580_v57 }
 0x450   :  { %v1572_v47 = vmul.f32 %v6103_v4, %v7122_v23  ;;  %v1872_v23 = vmax.f32 %v7164_v54, 0.0  ;;  %v7226_v7 = vpack.c.bf16 %v1870_v24, %v1869_v28  ;;  %v1873_v54 = vmax.f32 %v7175_v58, 0.0 }
 0x451   :  { %v1877_v58 = vmax.f32 %v7203_v33, 0.0  ;;  %v1879_v10 = vmax.f32 %v1571_v14, 0.0 }
 0x452   :  { %v1581_v51 = vpack.c.bf16 %v1572_v47, %v1571_v14  ;;  %v7242_v40 = vpack.c.bf16 %v1874_v56, %v1873_v54  ;;  %v1880_v63 = vmax.f32 %v1572_v47, 0.0  ;;  %v6028_v14 = vld [vmem:[%s8813_s4 + $0x1c0] sm:$0xff]  }
 0x453   :  { %v7256_v60 = vpack.c.bf16 %v1878_v32, %v1877_v58 }
 0x454   :  { %5572 = vmatprep.mubr.bf16.mxu1 %v1581_v51  ;;  %5588 = vmatprep.subr.bf16.mxu0 %v1581_v51  ;;  %v7261_v61 = vpack.c.bf16 %v1880_v63, %v1879_v10  ;;  %v6032_v10 = vld [vmem:[%s8813_s4 + $0x1e0] sm:$0xff]  }
 0x455   :  { %v6105_v59 = vpop.eup %6104 }
 0x456   :  { %v1573_v62 = vmul.f32 %v6105_v59, %v7129_v30  ;;  %v1871_v30 = vmax.f32 %v7161_v29, 0.0  ;;  %v1876_v29 = vmax.f32 %v7192_v43, 0.0 }
 0x457   :  { %v6107_v8 = vpop.eup %6106  ;;  %5589 = vmatpush3.bf16.xpose.msra.mxu0 %v1581_v51 }
 0x458   :  { %v1574_v0 = vmul.f32 %v6107_v8, %v7132_v34  ;;  %v6013_v34 = vld [vmem:[%s8813_s4 + $0x188] sm:$0xff]   ;;  %v7231_v1 = vpack.c.bf16 %v1872_v23, %v1871_v30  ;;  %v7247_v21 = vpack.c.bf16 %v1876_v29, %v1875_v44  ;;  %v1881_v17 = vmax.f32 %v1573_v62, 0.0  ;;  %v6030_v29 = vld [vmem:[%s8813_s4 + $0x1d0] sm:$0xff]   ;;  %v6168_v23 = vld [vmem:[%s8810_s1 + $0xc0] sm:$0xff] }
 0x45a   :  { %v1582_v52 = vpack.c.bf16 %v1574_v0, %v1573_v62  ;;  %v1882_v39 = vmax.f32 %v1574_v0, 0.0 }
 0x45c   :  { %5573 = vmatmul.mubr.bf16.gmra.mrb[76].mxu1 %v1582_v52  ;;  %5590 = vmatprep.subr.bf16.mxu0 %v1582_v52  ;;  %v7268_v3 = vpack.c.bf16 %v1882_v39, %v1881_v17  ;;  %v6163_v39 = vld [vmem:[%s8810_s1 + $0x80] sm:$0xff] }
 0x45d   :  { %5624 = vmatprep.mubr.bf16.mxu1 %v7219_v15 }
 0x45f   :  { %5591 = vmatpush3.bf16.xpose.msra.mxu0 %v1582_v52 }
 0x460   :  { %5640 = vmatprep.subr.bf16.mxu0 %v6020_v46 }
 0x464   :  { %5625 = vmatmul.mubr.bf16.vlgmr.msra.gmra.mrb[80].mxu1 %v7226_v7 }
 0x465   :  { %5628 = vmatprep.mubr.bf16.mxu1 %v7231_v1  ;;  %5673 = vmatpush3.bf16.msra.mxu1 %v6012_v12 }
 0x466   :  { %5674 = vmatprep.subr.bf16.mxu1 %v6013_v34 }
 0x469   :  { %5675 = vmatpush3.bf16.msra.mxu1 %v6013_v34  ;;  %v6029_v34 = vld [vmem:[%s8813_s4 + $0x1c8] sm:$0xff]  }
 0x46a   :  { %5676 = vmatprep.subr.bf16.mxu1 %v6014_v25 }
 0x46c   :  { %5629 = vmatmul.mubr.bf16.gmra.mrb[84].mxu1 %v7242_v40 }
 0x46d   :  { %5632 = vmatprep.mubr.bf16.mxu1 %v7247_v21  ;;  %5677 = vmatpush3.bf16.msra.mxu1 %v6014_v25 }
 0x46e   :  { %5678 = vmatprep.subr.bf16.mxu1 %v6015_v49 }
 0x471   :  { %5679 = vmatpush3.bf16.msra.mxu1 %v6015_v49 }
 0x472   :  { %5680 = vmatprep.subr.bf16.mxu1 %v6016_v19 }
 0x474   :  { %5633 = vmatmul.mubr.bf16.gmra.mrb[88].mxu1 %v7256_v60 }
 0x475   :  { %5636 = vmatprep.mubr.bf16.mxu1 %v7261_v61  ;;  %5681 = vmatpush3.bf16.msra.mxu1 %v6016_v19  ;;  %v6031_v19 = vld [vmem:[%s8813_s4 + $0x1d8] sm:$0xff]  }
 0x476   :  { %5682 = vmatprep.subr.bf16.mxu1 %v6017_v42 }
 0x479   :  { %5683 = vmatpush3.bf16.msra.mxu1 %v6017_v42 }
 0x47a   :  { %5684 = vmatprep.subr.bf16.mxu1 %v6018_v38 }
 0x47c   :  { %5637 = vmatmul.mubr.bf16.gmra.mrb[92].mxu1 %v7268_v3 }
 0x47d   :  { %5685 = vmatpush3.bf16.msra.mxu1 %v6018_v38  ;;  %5688 = vmatprep.mubr.bf16.mxu1 %v7219_v15 }
 0x47e   :  { %5686 = vmatprep.subr.bf16.mxu1 %v6019_v5 }
 0x481   :  { %5687 = vmatpush3.bf16.msra.mxu1 %v6019_v5  ;;  %v6033_v5 = vld [vmem:[%s8813_s4 + $0x1e8] sm:$0xff]  }
 0x484   :  { %5689 = vmatmul.mubr.bf16.vlgmr.msra.gmra.mrb[96].mxu1 %v7226_v7 }
 0x485   :  { %5692 = vmatprep.mubr.bf16.mxu1 %v7231_v1 }
 0x48c   :  { %5693 = vmatmul.mubr.bf16.gmra.mrb[100].mxu1 %v7242_v40 }
 0x48d   :  { %5696 = vmatprep.mubr.bf16.mxu1 %v7247_v21 }
 0x494   :  { %5697 = vmatmul.mubr.bf16.gmra.mrb[104].mxu1 %v7256_v60 }
 0x495   :  { %5700 = vmatprep.mubr.bf16.mxu1 %v7261_v61 }
 0x49c   :  { %5701 = vmatmul.mubr.bf16.gmra.mrb[108].mxu1 %v7268_v3 }
 0x501   :  { %v5562_v53 = vpop.f32.mrb[64].mxu1 }
 0x502   :  { %v1682_v9 = vpop.f32.mrb[65].mxu1 }
 0x503   :  { %v5563_v48 = vpop.f32.mrb[66].mxu1 }
 0x504   :  { %v1746_v43 = vpack.c.bf16 %v5563_v48, %v5562_v53  ;;  %v1685_v13 = vpop.f32.mrb[67].mxu1 }
 0x505   :  { %v1745_v18 = vpack.c.bf16 %v1685_v13, %v1682_v9  ;;  %v6034_v9 = vld [vmem:[%s8813_s4 + $0x1f0] sm:$0xff]  }
 0x507   :  { %5592 = vmatprep.mubr.bf16.mxu0 %v1745_v18 }
 0x508   :  { %5593 = vmatmul.mubr.bf16.vlgmr.msra.gmra.mrb[96].mxu0 %v1746_v43  ;;  %v6161_v43 = vld [vmem:[%s8810_s1 + $0x70] sm:$0xff] }
 0x509   :  { %5641 = vmatpush3.bf16.msra.mxu0 %v6020_v46 }
 0x50a   :  { %5642 = vmatprep.subr.bf16.mxu0 %v6021_v41 }
 0x50d   :  { %5643 = vmatpush3.bf16.msra.mxu0 %v6021_v41  ;;  %v6035_v41 = vld [vmem:[%s8813_s4 + $0x1f8] sm:$0xff]  }
 0x50e   :  { %5644 = vmatprep.subr.bf16.mxu0 %v6022_v50 }
 0x50f   :  { %v5566_v27 = vpop.f32.mrb[68].mxu1 }
 0x510   :  { %v1698_v45 = vpop.f32.mrb[69].mxu1 }
 0x511   :  { %v5567_v6 = vpop.f32.mrb[70].mxu1  ;;  %5645 = vmatpush3.bf16.msra.mxu0 %v6022_v50 }
 0x512   :  { %v1748_v16 = vpack.c.bf16 %v5567_v6, %v5566_v27  ;;  %v1701_v26 = vpop.f32.mrb[71].mxu1  ;;  %5646 = vmatprep.subr.bf16.mxu0 %v6023_v20 }
 0x513   :  { %v1747_v33 = vpack.c.bf16 %v1701_v26, %v1698_v45  ;;  %v6157_v45 = vld [vmem:[%s8810_s1 + $0x68] sm:$0xff] }
 0x515   :  { %5596 = vmatprep.mubr.bf16.mxu0 %v1747_v33  ;;  %5647 = vmatpush3.bf16.msra.mxu0 %v6023_v20 }
 0x516   :  { %5597 = vmatmul.mubr.bf16.gmra.mrb[100].mxu0 %v1748_v16  ;;  %5648 = vmatprep.subr.bf16.mxu0 %v6024_v36  ;;  %v6159_v16 = vld [vmem:[%s8810_s1 + $0xb0] sm:$0xff] }
 0x519   :  { %5649 = vmatpush3.bf16.msra.mxu0 %v6024_v36 }
 0x51a   :  { %5650 = vmatprep.subr.bf16.mxu0 %v6025_v37 }
 0x51d   :  { %5651 = vmatpush3.bf16.msra.mxu0 %v6025_v37 }
 0x51e   :  { %5652 = vmatprep.subr.bf16.mxu0 %v6026_v31 }
 0x51f   :  { %v5570_v12 = vpop.f32.mrb[72].mxu1 }
 0x520   :  { %v1714_v57 = vpop.f32.mrb[73].mxu1 }
 0x521   :  { %v5571_v2 = vpop.f32.mrb[74].mxu1  ;;  %5653 = vmatpush3.bf16.msra.mxu0 %v6026_v31 }
 0x522   :  { %v1750_v55 = vpack.c.bf16 %v5571_v2, %v5570_v12  ;;  %v1717_v4 = vpop.f32.mrb[75].mxu1  ;;  %5654 = vmatprep.subr.bf16.mxu0 %v6027_v35 }
 0x523   :  { %v1749_v47 = vpack.c.bf16 %v1717_v4, %v1714_v57  ;;  %v6151_v4 = vld [vmem:[%s8810_s1 + $0x20] sm:$0xff] }
 0x525   :  { %5600 = vmatprep.mubr.bf16.mxu0 %v1749_v47  ;;  %5655 = vmatpush3.bf16.msra.mxu0 %v6027_v35 }
 0x526   :  { %5601 = vmatmul.mubr.bf16.gmra.mrb[104].mxu0 %v1750_v55  ;;  %5704 = vmatprep.subr.bf16.mxu0 %v6028_v14 }
 0x52f   :  { %v5574_v51 = vpop.f32.mrb[76].mxu1 }
 0x530   :  { %v1730_v59 = vpop.f32.mrb[77].mxu1 }
 0x531   :  { %v5575_v8 = vpop.f32.mrb[78].mxu1 }
 0x532   :  { %v1752_v22 = vpack.c.bf16 %v5575_v8, %v5574_v51  ;;  %v1733_v62 = vpop.f32.mrb[79].mxu1 }
 0x533   :  { %v1751_v0 = vpack.c.bf16 %v1733_v62, %v1730_v59  ;;  %v6141_v59 = vld [vmem:[%s8810_s1 + $0x30] sm:$0xff] }
 0x535   :  { %5604 = vmatprep.mubr.bf16.mxu0 %v1751_v0 }
 0x536   :  { %5605 = vmatmul.mubr.bf16.gmra.mrb[108].mxu0 %v1752_v22  ;;  %v6142_v22 = vld [vmem:[%s8810_s1 + $0x38] sm:$0xff] }
 0x537   :  { %v7309_v11 = vpop.f32.mrb[80].mxu1  ;;  %5656 = vmatprep.mubr.bf16.mxu0 %v7219_v15 }
 0x538   :  { %v7312_v52 = vpop.f32.mrb[81].mxu1 }
 0x539   :  { %v7314_v24 = vpop.f32.mrb[82].mxu1 }
 0x53a   :  { %v7318_v28 = vpop.f32.mrb[83].mxu1 }
 0x53e   :  { %5657 = vmatmul.mubr.bf16.vlgmr.msra.gmra.mrb[112].mxu0 %v7226_v7 }
 0x53f   :  { %v7326_v56 = vpop.f32.mrb[84].mxu1  ;;  %5660 = vmatprep.mubr.bf16.mxu0 %v7231_v1  ;;  %5705 = vmatpush3.bf16.msra.mxu0 %v6028_v14 }
 0x540   :  { %v7329_v25 = vpop.f32.mrb[85].mxu1  ;;  %5706 = vmatprep.subr.bf16.mxu0 %v6029_v34 }
 0x541   :  { %v7334_v54 = vpop.f32.mrb[86].mxu1 }
 0x542   :  { %v7338_v49 = vpop.f32.mrb[87].mxu1 }
 0x543   :  { %5707 = vmatpush3.bf16.msra.mxu0 %v6029_v34  ;;  %v6144_v34 = vld [vmem:[%s8810_s1] sm:$0xff] }
 0x544   :  { %5708 = vmatprep.subr.bf16.mxu0 %v6030_v29 }
 0x546   :  { %5661 = vmatmul.mubr.bf16.gmra.mrb[116].mxu0 %v7242_v40 }
 0x547   :  { %v7346_v63 = vpop.f32.mrb[88].mxu1  ;;  %5664 = vmatprep.mubr.bf16.mxu0 %v7247_v21  ;;  %5709 = vmatpush3.bf16.msra.mxu0 %v6030_v29 }
 0x548   :  { %v7349_v58 = vpop.f32.mrb[89].mxu1  ;;  %5710 = vmatprep.subr.bf16.mxu0 %v6031_v19 }
 0x549   :  { %v7354_v42 = vpop.f32.mrb[90].mxu1 }
 0x54a   :  { %v7358_v38 = vpop.f32.mrb[91].mxu1 }
 0x54b   :  { %5711 = vmatpush3.bf16.msra.mxu0 %v6031_v19 }
 0x54c   :  { %5712 = vmatprep.subr.bf16.mxu0 %v6032_v10 }
 0x54e   :  { %5665 = vmatmul.mubr.bf16.gmra.mrb[120].mxu0 %v7256_v60 }
 0x54f   :  { %v7366_v46 = vpop.f32.mrb[92].mxu1  ;;  %5668 = vmatprep.mubr.bf16.mxu0 %v7261_v61  ;;  %5713 = vmatpush3.bf16.msra.mxu0 %v6032_v10  ;;  %v6145_v10 = vld [vmem:[%s8810_s1 + $0x8] sm:$0xff] }
 0x550   :  { %v7369_v53 = vpop.f32.mrb[93].mxu1  ;;  %5714 = vmatprep.subr.bf16.mxu0 %v6033_v5 }
 0x551   :  { %v7374_v48 = vpop.f32.mrb[94].mxu1 }
 0x552   :  { %v7378_v13 = vpop.f32.mrb[95].mxu1 }
 0x553   :  { %5715 = vmatpush3.bf16.msra.mxu0 %v6033_v5 }
 0x554   :  { %5716 = vmatprep.subr.bf16.mxu0 %v6034_v9 }
 0x556   :  { %5669 = vmatmul.mubr.bf16.gmra.mrb[124].mxu0 %v7268_v3 }
 0x557   :  { %v7386_v50 = vpop.f32.mrb[96].mxu1  ;;  %5717 = vmatpush3.bf16.msra.mxu0 %v6034_v9  ;;  %5720 = vmatprep.mubr.bf16.mxu0 %v7219_v15  ;;  %v6146_v9 = vld [vmem:[%s8810_s1 + $0x48] sm:$0xff] }
 0x558   :  { %v7389_v20 = vpop.f32.mrb[97].mxu1  ;;  %5718 = vmatprep.subr.bf16.mxu0 %v6035_v41 }
 0x559   :  { %v7391_v27 = vpop.f32.mrb[98].mxu1 }
 0x55a   :  { %v7395_v6 = vpop.f32.mrb[99].mxu1 }
 0x55b   :  { %5719 = vmatpush3.bf16.msra.mxu0 %v6035_v41 }
 0x55e   :  { %5721 = vmatmul.mubr.bf16.vlgmr.msra.gmra.mrb[128].mxu0 %v7226_v7 }
 0x55f   :  { %v7400_v26 = vpop.f32.mrb[100].mxu1  ;;  %5724 = vmatprep.mubr.bf16.mxu0 %v7231_v1 }
 0x560   :  { %v7403_v15 = vpop.f32.mrb[101].mxu1 }
 0x561   :  { %v7405_v36 = vpop.f32.mrb[102].mxu1 }
 0x562   :  { %v7409_v37 = vpop.f32.mrb[103].mxu1 }
 0x566   :  { %5725 = vmatmul.mubr.bf16.gmra.mrb[132].mxu0 %v7242_v40 }
 0x567   :  { %v7414_v35 = vpop.f32.mrb[104].mxu1  ;;  %5728 = vmatprep.mubr.bf16.mxu0 %v7247_v21 }
 0x568   :  { %v7417_v7 = vpop.f32.mrb[105].mxu1 }
 0x569   :  { %v7419_v1 = vpop.f32.mrb[106].mxu1 }
 0x56a   :  { %v7423_v57 = vpop.f32.mrb[107].mxu1 }
 0x56e   :  { %5729 = vmatmul.mubr.bf16.gmra.mrb[136].mxu0 %v7256_v60  ;;  %v6140_v60 = vld [vmem:[%s8811_s2] sm:$0xff]  }
 0x56f   :  { %v7428_v55 = vpop.f32.mrb[108].mxu1  ;;  %5732 = vmatprep.mubr.bf16.mxu0 %v7261_v61 }
 0x570   :  { %8877 = vst [vmem:[#allocation8_spill] sm:$0xff] %v7428_v55  ;;  %v7431_v40 = vpop.f32.mrb[109].mxu1 }
 0x571   :  { %8878 = vst [vmem:[#allocation9_spill] sm:$0xff] %v7431_v40  ;;  %v7433_v21 = vpop.f32.mrb[110].mxu1 }
 0x572   :  { %8879 = vst [vmem:[#allocation10_spill] sm:$0xff] %v7433_v21  ;;  %v7437_v14 = vpop.f32.mrb[111].mxu1 }
 0x573   :  { %8880 = vst [vmem:[#allocation11_spill] sm:$0xff] %v7437_v14  ;;  %v8906_v14 = vpack.c.bf16 %v7314_v24, %v7309_v11  ;;  %v8909_v11 = vpack.c.bf16 %v7358_v38, %v7349_v58 }
 0x576   :  { %5733 = vmatmul.mubr.bf16.gmra.mrb[140].mxu0 %v7268_v3  ;;  %v6143_v3 = vld [vmem:[%s8810_s1 + $0x40] sm:$0xff] }
 0x577   :  { %2780 = vmatprep.mubr.bf16.mxu0 %v6140_v60  ;;  %v6147_v60 = vld [vmem:[%s8810_s1 + $0x50] sm:$0xff] }
 0x5db   :  { %v5594_v61 = vpop.f32.mrb[96].mxu0 }
 0x5dc   :  { %1853 = vst [vmem:[#allocation4 + $0x90] sm:$0xff] %v5594_v61  ;;  %v1787_v51 = vpop.f32.mrb[97].mxu0  ;;  %v7448_v8 = vmul.f32 %v6141_v59, %v5594_v61  ;;  %v7453_v62 = vmul.f32 %v6142_v22, %v5594_v61  ;;  %v7458_v0 = vmul.f32 %v6143_v3, %v5594_v61  ;;  %v6148_v59 = vld [vmem:[%s8810_s1 + $0x58] sm:$0xff] }
 0x5dd   :  { %1851 = vst [vmem:[#allocation4 + $0x80] sm:$0xff] %v1787_v51  ;;  %v7463_v29 = vmul.f32 %v6144_v34, %v1787_v51  ;;  %v5595_v19 = vpop.f32.mrb[98].mxu0  ;;  %v2572_v5 = vmul.f32 %v6145_v10, %v1787_v51  ;;  %v6149_v34 = vld [vmem:[%s8810_s1 + $0x10] sm:$0xff] }
 0x5de   :  { %8881 = vst [vmem:[#allocation12_spill] sm:$0xff] %v7458_v0  ;;  %1854 = vst [vmem:[#allocation4 + $0x98] sm:$0xff] %v5595_v19  ;;  %v7471_v41 = vmul.f32 %v6146_v9, %v5595_v19  ;;  %v7476_v61 = vmul.f32 %v6147_v60, %v5595_v19  ;;  %v7481_v22 = vmul.f32 %v6148_v59, %v5595_v19  ;;  %v1790_v3 = vpop.f32.mrb[99].mxu0  ;;  %v6150_v9 = vld [vmem:[%s8810_s1 + $0x18] sm:$0xff]  ;;  %v6152_v59 = vld [vmem:[%s8810_s1 + $0x28] sm:$0xff] }
 0x5df   :  { %v7486_v10 = vmul.f32 %v6149_v34, %v1787_v51  ;;  %1852 = vst [vmem:[#allocation4 + $0x88] sm:$0xff] %v1790_v3  ;;  %v7491_v60 = vmul.f32 %v6150_v9, %v1790_v3  ;;  %v2575_v19 = vmul.f32 %v6151_v4, %v1790_v3  ;;  %v7499_v47 = vmul.f32 %v6152_v59, %v1790_v3  ;;  %v6153_v59 = vld [vmem:[%s8810_s1 + $0x90] sm:$0xff]  ;;  %v6154_v9 = vld [vmem:[%s8810_s1 + $0x98] sm:$0xff] }
 0x5e0   :  { %8882 = vst [vmem:[#allocation13_spill] sm:$0xff] %v7481_v22  ;;  %v6160_v51 = vld [vmem:[%s8810_s1 + $0xb8] sm:$0xff]  ;;  %v6173_v0 = vld [vmem:[%s8810_s1 + $0xd0] sm:$0xff] }
 0x5e1   :  { %8883 = vst [vmem:[#allocation14_spill] sm:$0xff] %v7486_v10  ;;  %8884 = vst [vmem:[#allocation15_spill] sm:$0xff] %v7499_v47  ;;  %v2620_v2 = vpack.c.bf16 %v2575_v19, %v2572_v5  ;;  %v6155_v5 = vld [vmem:[%s8810_s1 + $0xa0] sm:$0xff] }
 0x5e2   :  { %v6156_v19 = vld [vmem:[%s8810_s1 + $0x60] sm:$0xff] }
 0x5e3   :  { %2683 = vmatprep.mubr.bf16.mxu1 %v2620_v2  ;;  %v6175_v10 = vld [vmem:[%s8810_s1 + $0xe0] sm:$0xff] }
 0x5e9   :  { %v5598_v33 = vpop.f32.mrb[100].mxu0 }
 0x5ea   :  { %1857 = vst [vmem:[#allocation4 + $0xb0] sm:$0xff] %v5598_v33  ;;  %v1803_v3 = vpop.f32.mrb[101].mxu0  ;;  %v7514_v31 = vmul.f32 %v6153_v59, %v5598_v33  ;;  %v7519_v34 = vmul.f32 %v6154_v9, %v5598_v33  ;;  %v7524_v2 = vmul.f32 %v6155_v5, %v5598_v33  ;;  %v6158_v33 = vld [vmem:[%s8810_s1 + $0xa8] sm:$0xff] }
 0x5eb   :  { %1855 = vst [vmem:[#allocation4 + $0xa0] sm:$0xff] %v1803_v3  ;;  %v7529_v4 = vmul.f32 %v6156_v19, %v1803_v3  ;;  %v5599_v59 = vpop.f32.mrb[102].mxu0  ;;  %v7534_v9 = vmul.f32 %v6157_v45, %v1803_v3  ;;  %v7554_v18 = vmul.f32 %v6161_v43, %v1803_v3  ;;  %v6165_v43 = vld [vmem:[%s8810_s1 + $0xf0] sm:$0xff] }
 0x5ec   :  { %8885 = vst [vmem:[#allocation16_spill] sm:$0xff] %v7524_v2  ;;  %1858 = vst [vmem:[#allocation4 + $0xb8] sm:$0xff] %v5599_v59  ;;  %v7539_v5 = vmul.f32 %v6158_v33, %v5599_v59  ;;  %v7544_v19 = vmul.f32 %v6159_v16, %v5599_v59  ;;  %v7549_v12 = vmul.f32 %v6160_v51, %v5599_v59  ;;  %v1806_v45 = vpop.f32.mrb[103].mxu0  ;;  %v6162_v33 = vld [vmem:[%s8810_s1 + $0x78] sm:$0xff]  ;;  %v6164_v59 = vld [vmem:[%s8810_s1 + $0x88] sm:$0xff] }
 0x5ed   :  { %8887 = vst [vmem:[#allocation18_spill] sm:$0xff] %v7554_v18  ;;  %1856 = vst [vmem:[#allocation4 + $0xa8] sm:$0xff] %v1806_v45  ;;  %v7559_v16 = vmul.f32 %v6162_v33, %v1806_v45  ;;  %v7564_v51 = vmul.f32 %v6163_v39, %v1806_v45  ;;  %v7569_v17 = vmul.f32 %v6164_v59, %v1806_v45  ;;  %v6166_v33 = vld [vmem:[%s8810_s1 + $0xf8] sm:$0xff]  ;;  %v6167_v39 = vld [vmem:[%s8810_s1 + $0x100] sm:$0xff] }
 0x5ee   :  { %8886 = vst [vmem:[#allocation17_spill] sm:$0xff] %v7549_v12  ;;  %v6169_v2 = vld [vmem:[%s8810_s1 + $0xc8] sm:$0xff]  ;;  %v6171_v12 = vld [vmem:[%s8810_s1 + $0x110] sm:$0xff]  ;;  %v6172_v18 = vld [vmem:[%s8810_s1 + $0x118] sm:$0xff] }
 0x5ef   :  { %8888 = vst [vmem:[#allocation19_spill] sm:$0xff] %v7569_v17 }
 0x5f9   :  { %v5602_v45 = vpop.f32.mrb[104].mxu0 }
 0x5fa   :  { %1861 = vst [vmem:[#allocation4 + $0xd0] sm:$0xff] %v5602_v45  ;;  %v1819_v59 = vpop.f32.mrb[105].mxu0  ;;  %v7586_v3 = vmul.f32 %v6165_v43, %v5602_v45  ;;  %v7591_v44 = vmul.f32 %v6166_v33, %v5602_v45  ;;  %v7596_v32 = vmul.f32 %v6167_v39, %v5602_v45  ;;  %v6170_v39 = vld [vmem:[%s8810_s1 + $0x108] sm:$0xff] }
 0x5fb   :  { %1859 = vst [vmem:[#allocation4 + $0xc0] sm:$0xff] %v1819_v59  ;;  %v7601_v30 = vmul.f32 %v6168_v23, %v1819_v59  ;;  %v5603_v43 = vpop.f32.mrb[106].mxu0  ;;  %v7606_v33 = vmul.f32 %v6169_v2, %v1819_v59  ;;  %v7626_v22 = vmul.f32 %v6173_v0, %v1819_v59  ;;  %v6177_v0 = vld [vmem:[%s8810_s1 + $0x150] sm:$0xff] }
 0x5fc   :  { %8889 = vst [vmem:[#allocation20_spill] sm:$0xff] %v7586_v3  ;;  %8890 = vst [vmem:[#allocation21_spill] sm:$0xff] %v7591_v44  ;;  %v7611_v45 = vmul.f32 %v6170_v39, %v5603_v43  ;;  %v7616_v23 = vmul.f32 %v6171_v12, %v5603_v43  ;;  %v7621_v17 = vmul.f32 %v6172_v18, %v5603_v43  ;;  %v1822_v2 = vpop.f32.mrb[107].mxu0  ;;  %v6174_v39 = vld [vmem:[%s8810_s1 + $0xd8] sm:$0xff]  ;;  %v6185_v44 = vld [vmem:[%s8810_s1 + $0x130] sm:$0xff] }
 0x5fd   :  { %8891 = vst [vmem:[#allocation22_spill] sm:$0xff] %v7596_v32  ;;  %8892 = vst [vmem:[#allocation23_spill] sm:$0xff] %v7601_v30  ;;  %v7631_v12 = vmul.f32 %v6174_v39, %v1822_v2  ;;  %v7636_v18 = vmul.f32 %v6175_v10, %v1822_v2  ;;  %v6178_v39 = vld [vmem:[%s8810_s1 + $0x158] sm:$0xff]  ;;  %v6179_v10 = vld [vmem:[%s8810_s1 + $0x160] sm:$0xff] }
 0x5fe   :  { %8893 = vst [vmem:[#allocation24_spill] sm:$0xff] %v7606_v33  ;;  %1862 = vst [vmem:[#allocation4 + $0xd8] sm:$0xff] %v5603_v43  ;;  %v6176_v43 = vld [vmem:[%s8810_s1 + $0xe8] sm:$0xff]  ;;  %v6180_v32 = vld [vmem:[%s8810_s1 + $0x120] sm:$0xff] }
 0x5ff   :  { %8894 = vst [vmem:[#allocation25_spill] sm:$0xff] %v7611_v45  ;;  %8895 = vst [vmem:[#allocation26_spill] sm:$0xff] %v7616_v23  ;;  %v7641_v47 = vmul.f32 %v6176_v43, %v1822_v2  ;;  %v6184_v3 = vld [vmem:[%s8810_s1 + $0x178] sm:$0xff]  ;;  %v6187_v30 = vld [vmem:[%s8810_s1 + $0x140] sm:$0xff] }
 0x600   :  { %8896 = vst [vmem:[#allocation27_spill] sm:$0xff] %v7621_v17  ;;  %8897 = vst [vmem:[#allocation28_spill] sm:$0xff] %v7626_v22  ;;  %v6181_v22 = vld [vmem:[%s8810_s1 + $0x128] sm:$0xff] }
 0x601   :  { %1860 = vst [vmem:[#allocation4 + $0xc8] sm:$0xff] %v1822_v2  ;;  %8898 = vst [vmem:[#allocation29_spill] sm:$0xff] %v7631_v12 }
 0x602   :  { %8899 = vst [vmem:[#allocation30_spill] sm:$0xff] %v7636_v18  ;;  %8900 = vst [vmem:[#allocation31_spill] sm:$0xff] %v7641_v47  ;;  %v6183_v47 = vld [vmem:[%s8810_s1 + $0x170] sm:$0xff] }
 0x609   :  { %v5606_v2 = vpop.f32.mrb[108].mxu0 }
 0x60a   :  { %1865 = vst [vmem:[#allocation4 + $0xf0] sm:$0xff] %v5606_v2  ;;  %v1835_v43 = vpop.f32.mrb[109].mxu0  ;;  %v7658_v59 = vmul.f32 %v6177_v0, %v5606_v2  ;;  %v7663_v55 = vmul.f32 %v6178_v39, %v5606_v2  ;;  %v7668_v21 = vmul.f32 %v6179_v10, %v5606_v2  ;;  %v6182_v10 = vld [vmem:[%s8810_s1 + $0x168] sm:$0xff] }
 0x60b   :  { %1863 = vst [vmem:[#allocation4 + $0xe0] sm:$0xff] %v1835_v43  ;;  %v7673_v17 = vmul.f32 %v6180_v32, %v1835_v43  ;;  %v5607_v0 = vpop.f32.mrb[110].mxu0  ;;  %v7678_v39 = vmul.f32 %v6181_v22, %v1835_v43  ;;  %v7698_v23 = vmul.f32 %v6185_v44, %v1835_v43  ;;  %v8905_v43 = vpack.c.bf16 %v7318_v28, %v7312_v52 }
 0x60c   :  { %8901 = vst [vmem:[#allocation32_spill] sm:$0xff] %v7663_v55  ;;  %8902 = vst [vmem:[#allocation33_spill] sm:$0xff] %v7668_v21  ;;  %v7683_v2 = vmul.f32 %v6182_v10, %v5607_v0  ;;  %v7688_v32 = vmul.f32 %v6183_v47, %v5607_v0  ;;  %v7693_v45 = vmul.f32 %v6184_v3, %v5607_v0  ;;  %v1838_v22 = vpop.f32.mrb[111].mxu0  ;;  %v6186_v10 = vld [vmem:[%s8810_s1 + $0x138] sm:$0xff] }
 0x60d   :  { %1866 = vst [vmem:[#allocation4 + $0xf8] sm:$0xff] %v5607_v0  ;;  %8904 = vst [vmem:[#allocation35_spill] sm:$0xff] %v7698_v23  ;;  %v7703_v47 = vmul.f32 %v6186_v10, %v1838_v22  ;;  %v7708_v3 = vmul.f32 %v6187_v30, %v1838_v22  ;;  %v6188_v0 = vld [vmem:[%s8810_s1 + $0x148] sm:$0xff] }
 0x60e   :  { %8903 = vst [vmem:[#allocation34_spill] sm:$0xff] %v7693_v45  ;;  %1864 = vst [vmem:[#allocation4 + $0xe8] sm:$0xff] %v1838_v22  ;;  %v7713_v12 = vmul.f32 %v6188_v0, %v1838_v22 }
 0x611   :  { %v5658_v22 = vpop.f32.mrb[112].mxu0 }
 0x612   :  { %v2160_v0 = vpop.f32.mrb[113].mxu0 }
 0x613   :  { %v5659_v33 = vpop.f32.mrb[114].mxu0 }
 0x614   :  { %v2224_v18 = vpack.c.bf16 %v5659_v33, %v5658_v22  ;;  %v2163_v44 = vpop.f32.mrb[115].mxu0  ;;  %v8907_v33 = vpack.c.bf16 %v7338_v49, %v7329_v25  ;;  %v8912_v22 = vpack.c.bf16 %v7374_v48, %v7366_v46 }
 0x615   :  { %v2223_v55 = vpack.c.bf16 %v2163_v44, %v2160_v0 }
 0x617   :  { %5000 = vmatprep.subr.bf16.mxu1 %v2223_v55 }
 0x618   :  { %5001 = vmatpush3.bf16.msra.mxu1 %v8905_v43 }
 0x619   :  { %v5662_v10 = vpop.f32.mrb[116].mxu0  ;;  %5002 = vmatprep.subr.bf16.mxu1 %v2224_v18 }
 0x61a   :  { %v2176_v40 = vpop.f32.mrb[117].mxu0 }
 0x61b   :  { %v5663_v21 = vpop.f32.mrb[118].mxu0 }
 0x61c   :  { %v2226_v45 = vpack.c.bf16 %v5663_v21, %v5662_v10  ;;  %v2179_v30 = vpop.f32.mrb[119].mxu0  ;;  %5003 = vmatpush3.bf16.msra.mxu1 %v8906_v14  ;;  %v8908_v21 = vpack.c.bf16 %v7334_v54, %v7326_v56  ;;  %v8911_v56 = vpack.c.bf16 %v7378_v13, %v7369_v53  ;;  %v8915_v53 = vpack.c.bf16 %v7395_v6, %v7389_v20 }
 0x61d   :  { %v2225_v23 = vpack.c.bf16 %v2179_v30, %v2176_v40  ;;  %v8918_v20 = vpack.c.bf16 %v7564_v51, %v7534_v9  ;;  %v8919_v6 = vpack.c.bf16 %v7409_v37, %v7403_v15  ;;  %v8922_v15 = vpack.c.bf16 %v7544_v19, %v7519_v34  ;;  %v8926_v34 = vld [vmem:[#allocation30_spill] sm:$0xff]  ;;  %v8927_v19 = vld [vmem:[#allocation24_spill] sm:$0xff] }
 0x61e   :  { %v8923_v37 = vpack.c.bf16 %v7423_v57, %v7417_v7  ;;  %v8928_v7 = vpack.c.bf16 %v8926_v34, %v8927_v19  ;;  %v8929_v57 = vld [vmem:[#allocation11_spill] sm:$0xff] }
 0x61f   :  { %5004 = vmatprep.subr.bf16.mxu1 %v2225_v23 }
 0x620   :  { %5005 = vmatpush3.bf16.msra.mxu1 %v8907_v33 }
 0x621   :  { %v5666_v55 = vpop.f32.mrb[120].mxu0  ;;  %5006 = vmatprep.subr.bf16.mxu1 %v2226_v45  ;;  %v8910_v45 = vpack.c.bf16 %v7354_v42, %v7346_v63  ;;  %v8913_v63 = vpack.c.bf16 %v7491_v60, %v7463_v29  ;;  %v8914_v42 = vpack.c.bf16 %v7476_v61, %v7453_v62  ;;  %v8917_v60 = vpack.c.bf16 %v7471_v41, %v7448_v8 }
 0x622   :  { %v2192_v52 = vpop.f32.mrb[121].mxu0  ;;  %v8921_v41 = vpack.c.bf16 %v7559_v16, %v7529_v4  ;;  %v8925_v16 = vpack.c.bf16 %v7539_v5, %v7514_v31  ;;  %v8938_v31 = vld [vmem:[#allocation15_spill] sm:$0xff]  ;;  %v8939_v5 = vld [vmem:[#allocation14_spill] sm:$0xff] }
 0x623   :  { %v5667_v28 = vpop.f32.mrb[122].mxu0 }
 0x624   :  { %v2228_v44 = vpack.c.bf16 %v5667_v28, %v5666_v55  ;;  %v2195_v18 = vpop.f32.mrb[123].mxu0  ;;  %5007 = vmatpush3.bf16.msra.mxu1 %v8908_v21  ;;  %v8924_v21 = vpack.c.bf16 %v7419_v1, %v7414_v35  ;;  %v8935_v35 = vld [vmem:[#allocation29_spill] sm:$0xff]  ;;  %v8936_v1 = vld [vmem:[#allocation23_spill] sm:$0xff] }
 0x625   :  { %v2227_v43 = vpack.c.bf16 %v2195_v18, %v2192_v52  ;;  %v8916_v52 = vpack.c.bf16 %v7391_v27, %v7386_v50 }
 0x627   :  { %5008 = vmatprep.subr.bf16.mxu1 %v2227_v43  ;;  %v8930_v43 = vld [vmem:[#allocation9_spill] sm:$0xff] }
 0x628   :  { %5009 = vmatpush3.bf16.msra.mxu1 %v8909_v11  ;;  %v8931_v11 = vpack.c.bf16 %v8929_v57, %v8930_v43 }
 0x629   :  { %v5670_v24 = vpop.f32.mrb[124].mxu0  ;;  %5010 = vmatprep.subr.bf16.mxu1 %v2228_v44  ;;  %v8920_v44 = vpack.c.bf16 %v7405_v36, %v7400_v26 }
 0x62a   :  { %v2208_v25 = vpop.f32.mrb[125].mxu0 }
 0x62b   :  { %v5671_v49 = vpop.f32.mrb[126].mxu0 }
 0x62c   :  { %v2230_v40 = vpack.c.bf16 %v5671_v49, %v5670_v24  ;;  %v2211_v14 = vpop.f32.mrb[127].mxu0  ;;  %5011 = vmatpush3.bf16.msra.mxu1 %v8910_v45  ;;  %v8932_v24 = vld [vmem:[#allocation10_spill] sm:$0xff] }
 0x62d   :  { %v2229_v23 = vpack.c.bf16 %v2211_v14, %v2208_v25  ;;  %v8933_v25 = vld [vmem:[#allocation8_spill] sm:$0xff]  ;;  %v8940_v14 = vpack.c.bf16 %v8938_v31, %v8939_v5  ;;  %v8941_v45 = vld [vmem:[#allocation26_spill] sm:$0xff] }
 0x62e   :  { %v8934_v49 = vpack.c.bf16 %v8932_v24, %v8933_v25  ;;  %v7872_v5 = vld [vmem:[%s8814_s5 + $0x1] ss:$0 sm:$0xff] }
 0x62f   :  { %5012 = vmatprep.subr.bf16.mxu1 %v2229_v23  ;;  %v8942_v23 = vld [vmem:[#allocation21_spill] sm:$0xff] }
 0x630   :  { %5013 = vmatpush3.bf16.msra.mxu1 %v8911_v56  ;;  %v8943_v56 = vpack.c.bf16 %v8941_v45, %v8942_v23 }
 0x631   :  { %v5722_v54 = vpop.f32.mrb[128].mxu0  ;;  %5014 = vmatprep.subr.bf16.mxu1 %v2230_v40  ;;  %v8937_v40 = vpack.c.bf16 %v8935_v35, %v8936_v1 }
 0x632   :  { %v2500_v58 = vpop.f32.mrb[129].mxu0 }
 0x633   :  { %v5723_v38 = vpop.f32.mrb[130].mxu0 }
 0x634   :  { %v2564_v10 = vpack.c.bf16 %v5723_v38, %v5722_v54  ;;  %v2503_v30 = vpop.f32.mrb[131].mxu0  ;;  %5015 = vmatpush3.bf16.msra.mxu1 %v8912_v22  ;;  %v6189_v54 = vld [vmem:[%s8811_s2 + $0x8] sm:$0xff]   ;;  %v8945_v38 = vld [vmem:[#allocation20_spill] sm:$0xff] }
 0x635   :  { %v2563_v0 = vpack.c.bf16 %v2503_v30, %v2500_v58  ;;  %v8944_v58 = vld [vmem:[#allocation25_spill] sm:$0xff]  ;;  %v8948_v22 = vld [vmem:[#allocation12_spill] sm:$0xff] }
 0x636   :  { %v8947_v30 = vld [vmem:[#allocation13_spill] sm:$0xff] }
 0x637   :  { %2684 = vmatmul.mubr.bf16.vlgmr.msra.gmra.mrb[112].mxu1 %v8913_v63  ;;  %5064 = vmatprep.subr.bf16.mxu0 %v2563_v0  ;;  %v8949_v0 = vpack.c.bf16 %v8947_v30, %v8948_v22  ;;  %v8950_v63 = vpack.c.bf16 %v7708_v3, %v7678_v39  ;;  %v6191_v39 = vld [vmem:[%s8811_s2 + $0x18] sm:$0xff]   ;;  %v8957_v3 = vpack.c.bf16 %v7683_v2, %v7658_v59  ;;  %v8965_v2 = vld [vmem:[#allocation22_spill] sm:$0xff] }
 0x638   :  { %2691 = vmatprep.mubr.bf16.mxu1 %v8914_v42  ;;  %5065 = vmatpush3.bf16.msra.mxu0 %v8915_v53  ;;  %v6190_v42 = vld [vmem:[%s8811_s2 + $0x10] sm:$0xff]   ;;  %v8951_v53 = vpack.c.bf16 %v7703_v47, %v7673_v17  ;;  %v8959_v17 = vld [vmem:[#allocation16_spill] sm:$0xff]  ;;  %v8964_v59 = vld [vmem:[#allocation27_spill] sm:$0xff] }
 0x639   :  { %v5726_v13 = vpop.f32.mrb[132].mxu0  ;;  %5066 = vmatprep.subr.bf16.mxu0 %v2564_v10  ;;  %v8946_v10 = vpack.c.bf16 %v8944_v58, %v8945_v38 }
 0x63a   :  { %v2516_v33 = vpop.f32.mrb[133].mxu0 }
 0x63b   :  { %v5727_v55 = vpop.f32.mrb[134].mxu0 }
 0x63c   :  { %v2566_v46 = vpack.c.bf16 %v5727_v55, %v5726_v13  ;;  %v2519_v48 = vpop.f32.mrb[135].mxu0  ;;  %5067 = vmatpush3.bf16.msra.mxu0 %v8916_v52  ;;  %v8952_v13 = vld [vmem:[#allocation19_spill] sm:$0xff]  ;;  %v8958_v52 = vld [vmem:[#allocation17_spill] sm:$0xff] }
 0x63d   :  { %v2565_v29 = vpack.c.bf16 %v2519_v48, %v2516_v33  ;;  %v8953_v33 = vld [vmem:[#allocation18_spill] sm:$0xff]  ;;  %v8960_v47 = vpack.c.bf16 %v8958_v52, %v8959_v17 }
 0x63e   :  { %v8954_v55 = vpack.c.bf16 %v8952_v13, %v8953_v33 }
 0x63f   :  { %2692 = vmatmul.mubr.bf16.gmra.mrb[116].mxu1 %v8917_v60  ;;  %5068 = vmatprep.subr.bf16.mxu0 %v2565_v29  ;;  %v6192_v29 = vld [vmem:[%s8811_s2 + $0x20] sm:$0xff]  }
 0x640   :  { %2699 = vmatprep.mubr.bf16.mxu1 %v8918_v20  ;;  %5069 = vmatpush3.bf16.msra.mxu0 %v8919_v6  ;;  %v8962_v60 = vld [vmem:[#allocation28_spill] sm:$0xff]  ;;  %v6193_v6 = vld [vmem:[%s8811_s2 + $0x28] sm:$0xff]  }
 0x641   :  { %v5730_v62 = vpop.f32.mrb[136].mxu0  ;;  %5070 = vmatprep.subr.bf16.mxu0 %v2566_v46  ;;  %v8955_v46 = vld [vmem:[#allocation32_spill] sm:$0xff] }
 0x642   :  { %v2532_v61 = vpop.f32.mrb[137].mxu0  ;;  %v8956_v48 = vpack.c.bf16 %v7688_v32, %v8955_v46  ;;  %v8961_v32 = vld [vmem:[#allocation31_spill] sm:$0xff] }
 0x643   :  { %v5731_v28 = vpop.f32.mrb[138].mxu0  ;;  %v8963_v20 = vpack.c.bf16 %v8961_v32, %v8962_v60 }
 0x644   :  { %v2568_v50 = vpack.c.bf16 %v5731_v28, %v5730_v62  ;;  %v2535_v27 = vpop.f32.mrb[139].mxu0  ;;  %5071 = vmatpush3.bf16.msra.mxu0 %v8920_v44  ;;  %v8966_v62 = vpack.c.bf16 %v8964_v59, %v8965_v2  ;;  %v8967_v28 = vld [vmem:[#allocation35_spill] sm:$0xff]  ;;  %v8969_v44 = vld [vmem:[#allocation34_spill] sm:$0xff] }
 0x645   :  { %v2567_v8 = vpack.c.bf16 %v2535_v27, %v2532_v61  ;;  %v6194_v61 = vld [vmem:[%s8811_s2 + $0x30] sm:$0xff]   ;;  %v6195_v27 = vld [vmem:[%s8811_s2 + $0x38] sm:$0xff]  }
 0x647   :  { %2700 = vmatmul.mubr.bf16.gmra.mrb[120].mxu1 %v8921_v41  ;;  %5072 = vmatprep.subr.bf16.mxu0 %v2567_v8  ;;  %v8970_v8 = vld [vmem:[#allocation33_spill] sm:$0xff] }
 0x648   :  { %2707 = vmatprep.mubr.bf16.mxu1 %v8922_v15  ;;  %5073 = vmatpush3.bf16.msra.mxu0 %v8923_v37  ;;  %v8971_v41 = vpack.c.bf16 %v8969_v44, %v8970_v8 }
 0x649   :  { %v5734_v9 = vpop.f32.mrb[140].mxu0  ;;  %5074 = vmatprep.subr.bf16.mxu0 %v2568_v50  ;;  %v8968_v50 = vpack.c.bf16 %v7713_v12, %v8967_v28 }
 0x64a   :  { %v2548_v51 = vpop.f32.mrb[141].mxu0 }
 0x64b   :  { %v5735_v18 = vpop.f32.mrb[142].mxu0 }
 0x64c   :  { %v2570_v26 = vpack.c.bf16 %v5735_v18, %v5734_v9  ;;  %v2551_v36 = vpop.f32.mrb[143].mxu0  ;;  %5075 = vmatpush3.bf16.msra.mxu0 %v8924_v21 }
 0x64d   :  { %v2569_v4 = vpack.c.bf16 %v2551_v36, %v2548_v51 }
 0x64f   :  { %2708 = vmatmul.mubr.bf16.gmra.mrb[124].mxu1 %v8925_v16  ;;  %5076 = vmatprep.subr.bf16.mxu0 %v2569_v4 }
 0x650   :  { %2715 = vmatprep.mubr.bf16.mxu1 %v8928_v7  ;;  %5077 = vmatpush3.bf16.msra.mxu0 %v8931_v11 }
 0x651   :  { %5078 = vmatprep.subr.bf16.mxu0 %v2570_v26 }
 0x654   :  { %5079 = vmatpush3.bf16.msra.mxu0 %v8934_v49 }
 0x657   :  { %2716 = vmatmul.mubr.bf16.gmra.mrb[128].mxu1 %v8937_v40  ;;  %2781 = vmatmul.mubr.bf16.vlgmr.msra.gmra.mrb[144].mxu0 %v8940_v14 }
 0x658   :  { %2723 = vmatprep.mubr.bf16.mxu1 %v8943_v56  ;;  %2788 = vmatprep.mubr.bf16.mxu0 %v6189_v54 }
 0x65f   :  { %2724 = vmatmul.mubr.bf16.gmra.mrb[132].mxu1 %v8946_v10  ;;  %2789 = vmatmul.mubr.bf16.gmra.mrb[148].mxu0 %v8949_v0 }
 0x660   :  { %2731 = vmatprep.mubr.bf16.mxu1 %v8950_v63  ;;  %2796 = vmatprep.mubr.bf16.mxu0 %v6190_v42 }
 0x667   :  { %2732 = vmatmul.mubr.bf16.gmra.mrb[136].mxu1 %v8951_v53  ;;  %2797 = vmatmul.mubr.bf16.gmra.mrb[152].mxu0 %v8954_v55 }
 0x668   :  { %2739 = vmatprep.mubr.bf16.mxu1 %v8956_v48  ;;  %2804 = vmatprep.mubr.bf16.mxu0 %v6191_v39 }
 0x66f   :  { %2740 = vmatmul.mubr.bf16.gmra.mrb[140].mxu1 %v8957_v3  ;;  %2805 = vmatmul.mubr.bf16.gmra.mrb[156].mxu0 %v8960_v47 }
 0x670   :  { %2812 = vmatprep.mubr.bf16.mxu0 %v6192_v29 }
 0x677   :  { %2813 = vmatmul.mubr.bf16.gmra.mrb[160].mxu0 %v8963_v20 }
 0x678   :  { %2820 = vmatprep.mubr.bf16.mxu0 %v6193_v6 }
 0x67f   :  { %2821 = vmatmul.mubr.bf16.gmra.mrb[164].mxu0 %v8966_v62 }
 0x680   :  { %2828 = vmatprep.mubr.bf16.mxu0 %v6194_v61 }
 0x687   :  { %2829 = vmatmul.mubr.bf16.gmra.mrb[168].mxu0 %v8968_v50 }
 0x688   :  { %2836 = vmatprep.mubr.bf16.mxu0 %v6195_v27 }
 0x68f   :  { %2837 = vmatmul.mubr.bf16.gmra.mrb[172].mxu0 %v8971_v41 }
 0x70a   :  { %v5016_v15 = vpop.f32.mrb[112].mxu1 }
 0x70b   :  { %v5017_v37 = vpop.f32.mrb[113].mxu1 }
 0x70c   :  { %v5018_v9 = vadd.f32 %v5017_v37, %v5016_v15  ;;  %v5019_v51 = vpop.f32.mrb[114].mxu1 }
 0x70d   :  { %v5020_v18 = vpop.f32.mrb[115].mxu1 }
 0x70e   :  { %v5021_v26 = vadd.f32 %v5020_v18, %v5019_v51  ;;  %v2686_v54 = vadd.f32 %v5018_v9, %v7872_v5 }
 0x710   :  { %v2689_v63 = vadd.f32 %v5021_v26, %v7872_v5 }
 0x712   :  { %v5022_v36 = vpop.f32.mrb[116].mxu1 }
 0x713   :  { %v5023_v21 = vpop.f32.mrb[117].mxu1 }
 0x714   :  { %v5024_v4 = vadd.f32 %v5023_v21, %v5022_v36  ;;  %v5025_v12 = vpop.f32.mrb[118].mxu1 }
 0x715   :  { %v5026_v16 = vpop.f32.mrb[119].mxu1 }
 0x716   :  { %v5027_v34 = vadd.f32 %v5026_v16, %v5025_v12  ;;  %v2694_v3 = vadd.f32 %v5024_v4, %v7872_v5 }
 0x718   :  { %v2697_v20 = vadd.f32 %v5027_v34, %v7872_v5 }
 0x71a   :  { %v5028_v19 = vpop.f32.mrb[120].mxu1 }
 0x71b   :  { %v5029_v7 = vpop.f32.mrb[121].mxu1 }
 0x71c   :  { %v5030_v57 = vadd.f32 %v5029_v7, %v5028_v19  ;;  %v5031_v43 = vpop.f32.mrb[122].mxu1 }
 0x71d   :  { %v5032_v11 = vpop.f32.mrb[123].mxu1 }
 0x71e   :  { %v5033_v24 = vadd.f32 %v5032_v11, %v5031_v43  ;;  %v2702_v44 = vadd.f32 %v5030_v57, %v7872_v5 }
 0x720   :  { %v2705_v18 = vadd.f32 %v5033_v24, %v7872_v5 }
 0x722   :  { %v5034_v25 = vpop.f32.mrb[124].mxu1 }
 0x723   :  { %v5035_v49 = vpop.f32.mrb[125].mxu1 }
 0x724   :  { %v7865_v35 = vadd.f32 %v5035_v49, %v5034_v25  ;;  %v5037_v1 = vpop.f32.mrb[126].mxu1 }
 0x725   :  { %v5038_v40 = vpop.f32.mrb[127].mxu1 }
 0x726   :  { %v7867_v31 = vadd.f32 %v5038_v40, %v5037_v1  ;;  %v2710_v7 = vadd.f32 %v7865_v35, %v7872_v5 }
 0x728   :  { %v2713_v1 = vadd.f32 %v7867_v31, %v7872_v5 }
 0x72a   :  { %v5040_v14 = vpop.f32.mrb[128].mxu1  ;;  %v5080_v45 = vpop.f32.mrb[144].mxu0 }
 0x72b   :  { %v5041_v23 = vpop.f32.mrb[129].mxu1  ;;  %v5081_v56 = vpop.f32.mrb[145].mxu0 }
 0x72c   :  { %v7875_v58 = vadd.f32 %v5041_v23, %v5040_v14  ;;  %v5082_v38 = vadd.f32 %v5081_v56, %v5080_v45  ;;  %v5043_v10 = vpop.f32.mrb[130].mxu1  ;;  %v5083_v30 = vpop.f32.mrb[146].mxu0 }
 0x72d   :  { %v5044_v22 = vpop.f32.mrb[131].mxu1  ;;  %v5084_v0 = vpop.f32.mrb[147].mxu0 }
 0x72e   :  { %v7878_v42 = vadd.f32 %v5044_v22, %v5043_v10  ;;  %v5085_v53 = vadd.f32 %v5084_v0, %v5083_v30  ;;  %v7880_v13 = vadd.f32 %v5082_v38, %v2686_v54  ;;  %v2718_v54 = vadd.f32 %v7875_v58, %v7872_v5 }
 0x730   :  { %2845 = vadd.xlane.f32.xlu0 %v7880_v13  ;;  %v7883_v33 = vadd.f32 %v5085_v53, %v2689_v63  ;;  %v2721_v31 = vadd.f32 %v7878_v42, %v7872_v5 }
 0x732   :  { %v5046_v55 = vpop.f32.mrb[132].mxu1  ;;  %v5086_v46 = vpop.f32.mrb[148].mxu0  ;;  %2847 = vadd.xlane.f32.xlu1 %v7883_v33 }
 0x733   :  { %v5047_v48 = vpop.f32.mrb[133].mxu1  ;;  %v5087_v39 = vpop.f32.mrb[149].mxu0 }
 0x734   :  { %v7887_v52 = vadd.f32 %v5047_v48, %v5046_v55  ;;  %v5088_v17 = vadd.f32 %v5087_v39, %v5086_v46  ;;  %v5049_v47 = vpop.f32.mrb[134].mxu1  ;;  %v5089_v29 = vpop.f32.mrb[150].mxu0 }
 0x735   :  { %v5050_v32 = vpop.f32.mrb[135].mxu1  ;;  %v5090_v60 = vpop.f32.mrb[151].mxu0 }
 0x736   :  { %v5051_v6 = vadd.f32 %v5050_v32, %v5049_v47  ;;  %v5091_v59 = vadd.f32 %v5090_v60, %v5089_v29  ;;  %v7890_v2 = vadd.f32 %v5088_v17, %v2694_v3  ;;  %v2726_v58 = vadd.f32 %v7887_v52, %v7872_v5 }
 0x738   :  { %2849 = vadd.xlane.f32.xlu0 %v7890_v2  ;;  %v7893_v62 = vadd.f32 %v5091_v59, %v2697_v20  ;;  %v2729_v3 = vadd.f32 %v5051_v6, %v7872_v5 }
 0x73a   :  { %v5052_v61 = vpop.f32.mrb[136].mxu1  ;;  %v5092_v28 = vpop.f32.mrb[152].mxu0  ;;  %2851 = vadd.xlane.f32.xlu1 %v7893_v62 }
 0x73b   :  { %v5053_v50 = vpop.f32.mrb[137].mxu1  ;;  %v5093_v27 = vpop.f32.mrb[153].mxu0 }
 0x73c   :  { %v5054_v8 = vadd.f32 %v5053_v50, %v5052_v61  ;;  %v5094_v41 = vadd.f32 %v5093_v27, %v5092_v28  ;;  %v5055_v15 = vpop.f32.mrb[138].mxu1  ;;  %v5095_v37 = vpop.f32.mrb[154].mxu0 }
 0x73d   :  { %v5056_v9 = vpop.f32.mrb[139].mxu1  ;;  %v5096_v51 = vpop.f32.mrb[155].mxu0 }
 0x73e   :  { %v5057_v26 = vadd.f32 %v5056_v9, %v5055_v15  ;;  %v5097_v36 = vadd.f32 %v5096_v51, %v5095_v37  ;;  %v7898_v21 = vadd.f32 %v5094_v41, %v2702_v44  ;;  %v2734_v60 = vadd.f32 %v5054_v8, %v7872_v5 }
 0x740   :  { %2853 = vadd.xlane.f32.xlu0 %v7898_v21  ;;  %v7901_v4 = vadd.f32 %v5097_v36, %v2705_v18  ;;  %v2737_v61 = vadd.f32 %v5057_v26, %v7872_v5  ;;  %v6036_v36 = vld [vmem:[%s8812_s3 + $0x80] sm:$0xff]  }
 0x741   :  { %5736 = vmatprep.subr.bf16.mxu1 %v6036_v36 }
 0x742   :  { %v5058_v12 = vpop.f32.mrb[140].mxu1  ;;  %v5098_v16 = vpop.f32.mrb[156].mxu0  ;;  %2855 = vadd.xlane.f32.xlu1 %v7901_v4  ;;  %5737 = vmatpush3.bf16.msra.mxu1 %v6036_v36 }
 0x743   :  { %v5059_v34 = vpop.f32.mrb[141].mxu1  ;;  %v5099_v19 = vpop.f32.mrb[157].mxu0 }
 0x744   :  { %v5060_v57 = vadd.f32 %v5059_v34, %v5058_v12  ;;  %v5100_v43 = vadd.f32 %v5099_v19, %v5098_v16  ;;  %v5061_v11 = vpop.f32.mrb[142].mxu1  ;;  %v5101_v24 = vpop.f32.mrb[158].mxu0  ;;  %v6037_v12 = vld [vmem:[%s8812_s3 + $0x88] sm:$0xff]  }
 0x745   :  { %v5062_v25 = vpop.f32.mrb[143].mxu1  ;;  %v5102_v49 = vpop.f32.mrb[159].mxu0  ;;  %5738 = vmatprep.subr.bf16.mxu1 %v6037_v12 }
 0x746   :  { %v5063_v40 = vadd.f32 %v5062_v25, %v5061_v11  ;;  %v5103_v14 = vadd.f32 %v5102_v49, %v5101_v24  ;;  %v7908_v45 = vadd.f32 %v5100_v43, %v2710_v7  ;;  %v2742_v41 = vadd.f32 %v5060_v57, %v7872_v5  ;;  %5739 = vmatpush3.bf16.msra.mxu1 %v6037_v12 }
 0x748   :  { %2857 = vadd.xlane.f32.xlu0 %v7908_v45  ;;  %v7911_v23 = vadd.f32 %v5103_v14, %v2713_v1  ;;  %v2745_v9 = vadd.f32 %v5063_v40, %v7872_v5 }
 0x74a   :  { %v5104_v56 = vpop.f32.mrb[160].mxu0  ;;  %2859 = vadd.xlane.f32.xlu1 %v7911_v23 }
 0x74b   :  { %v5105_v35 = vpop.f32.mrb[161].mxu0 }
 0x74c   :  { %v5106_v38 = vadd.f32 %v5105_v35, %v5104_v56  ;;  %v5107_v10 = vpop.f32.mrb[162].mxu0 }
 0x74d   :  { %v5108_v30 = vpop.f32.mrb[163].mxu0 }
 0x74e   :  { %v5109_v22 = vadd.f32 %v5108_v30, %v5107_v10  ;;  %v7918_v0 = vadd.f32 %v5106_v38, %v2718_v54 }
 0x750   :  { %2861 = vadd.xlane.f32.xlu0 %v7918_v0  ;;  %v7921_v63 = vadd.f32 %v5109_v22, %v2721_v31  ;;  %v6038_v22 = vld [vmem:[%s8812_s3 + $0x90] sm:$0xff]  }
 0x751   :  { %5740 = vmatprep.subr.bf16.mxu1 %v6038_v22 }
 0x752   :  { %v5110_v53 = vpop.f32.mrb[164].mxu0  ;;  %2863 = vadd.xlane.f32.xlu1 %v7921_v63  ;;  %5741 = vmatpush3.bf16.msra.mxu1 %v6038_v22 }
 0x753   :  { %v5111_v55 = vpop.f32.mrb[165].mxu0 }
 0x754   :  { %v5112_v46 = vadd.f32 %v5111_v55, %v5110_v53  ;;  %v5113_v48 = vpop.f32.mrb[166].mxu0 }
 0x755   :  { %v5114_v39 = vpop.f32.mrb[167].mxu0 }
 0x756   :  { %v5115_v42 = vadd.f32 %v5114_v39, %v5113_v48  ;;  %v7927_v17 = vadd.f32 %v5112_v46, %v2726_v58  ;;  %v6039_v58 = vld [vmem:[%s8812_s3 + $0x98] sm:$0xff]  }
 0x757   :  { %5742 = vmatprep.subr.bf16.mxu1 %v6039_v58 }
 0x758   :  { %2865 = vadd.xlane.f32.xlu0 %v7927_v17  ;;  %v7930_v47 = vadd.f32 %v5115_v42, %v2729_v3  ;;  %5743 = vmatpush3.bf16.msra.mxu1 %v6039_v58  ;;  %v6040_v3 = vld [vmem:[%s8812_s3 + $0xa0] sm:$0xff]  }
 0x759   :  { %5744 = vmatprep.subr.bf16.mxu1 %v6040_v3 }
 0x75a   :  { %v5116_v29 = vpop.f32.mrb[168].mxu0  ;;  %2867 = vadd.xlane.f32.xlu1 %v7930_v47 }
 0x75b   :  { %v5117_v32 = vpop.f32.mrb[169].mxu0 }
 0x75c   :  { %v5118_v20 = vadd.f32 %v5117_v32, %v5116_v29  ;;  %v5119_v52 = vpop.f32.mrb[170].mxu0  ;;  %5745 = vmatpush3.bf16.msra.mxu1 %v6040_v3 }
 0x75d   :  { %v5120_v59 = vpop.f32.mrb[171].mxu0 }
 0x75e   :  { %v5121_v28 = vadd.f32 %v5120_v59, %v5119_v52  ;;  %v7935_v6 = vadd.f32 %v5118_v20, %v2734_v60  ;;  %v6041_v60 = vld [vmem:[%s8812_s3 + $0xa8] sm:$0xff]  }
 0x75f   :  { %5746 = vmatprep.subr.bf16.mxu1 %v6041_v60 }
 0x760   :  { %2869 = vadd.xlane.f32.xlu0 %v7935_v6  ;;  %v7938_v50 = vadd.f32 %v5121_v28, %v2737_v61  ;;  %5747 = vmatpush3.bf16.msra.mxu1 %v6041_v60  ;;  %v6042_v61 = vld [vmem:[%s8812_s3 + $0xb0] sm:$0xff]  }
 0x761   :  { %5748 = vmatprep.subr.bf16.mxu1 %v6042_v61 }
 0x762   :  { %v5122_v27 = vpop.f32.mrb[172].mxu0  ;;  %2871 = vadd.xlane.f32.xlu1 %v7938_v50 }
 0x763   :  { %v5123_v44 = vpop.f32.mrb[173].mxu0 }
 0x764   :  { %v5124_v15 = vadd.f32 %v5123_v44, %v5122_v27  ;;  %v5125_v8 = vpop.f32.mrb[174].mxu0  ;;  %5749 = vmatpush3.bf16.msra.mxu1 %v6042_v61 }
 0x765   :  { %v5126_v37 = vpop.f32.mrb[175].mxu0 }
 0x766   :  { %v5127_v51 = vadd.f32 %v5126_v37, %v5125_v8  ;;  %v7943_v18 = vadd.f32 %v5124_v15, %v2742_v41  ;;  %v6043_v41 = vld [vmem:[%s8812_s3 + $0xb8] sm:$0xff]  }
 0x767   :  { %5750 = vmatprep.subr.bf16.mxu1 %v6043_v41 }
 0x768   :  { %2873 = vadd.xlane.f32.xlu0 %v7943_v18  ;;  %v7946_v26 = vadd.f32 %v5127_v51, %v2745_v9  ;;  %5751 = vmatpush3.bf16.msra.mxu1 %v6043_v41 }
 0x76a   :  { %2875 = vadd.xlane.f32.xlu1 %v7946_v26 }
 0x7bd   :  { %v2846_v5 = vpop.xlane.xlu0 %2845 }
 0x7be   :  { %v2877_v16 = vmul.f32 0.0078125, %v2846_v5 }
 0x7bf   :  { %v2848_v34 = vpop.xlane.xlu1 %2847 }
 0x7c0   :  { %v7956_v19 = vsub.f32 %v7880_v13, %v2877_v16  ;;  %v2878_v7 = vmul.f32 0.0078125, %v2848_v34 }
 0x7c2   :  { %v7959_v57 = vsub.f32 %v7883_v33, %v2878_v7  ;;  %v2909_v43 = vmul.f32 %v7956_v19, %v7956_v19 }
 0x7c4   :  { %2925 = vadd.xlane.f32.xlu0 %v2909_v43  ;;  %v2910_v11 = vmul.f32 %v7959_v57, %v7959_v57 }
 0x7c5   :  { %v2850_v24 = vpop.xlane.xlu0 %2849 }
 0x7c6   :  { %v2879_v25 = vmul.f32 0.0078125, %v2850_v24  ;;  %2927 = vadd.xlane.f32.xlu1 %v2910_v11 }
 0x7c7   :  { %v2852_v49 = vpop.xlane.xlu1 %2851 }
 0x7c8   :  { %v7966_v1 = vsub.f32 %v7890_v2, %v2879_v25  ;;  %v2880_v13 = vmul.f32 0.0078125, %v2852_v49  ;;  %v6044_v49 = vld [vmem:[%s8813_s4 + $0x200] sm:$0xff]  }
 0x7c9   :  { %5800 = vmatprep.subr.bf16.mxu1 %v6044_v49 }
 0x7ca   :  { %v7969_v40 = vsub.f32 %v7893_v62, %v2880_v13  ;;  %v2911_v33 = vmul.f32 %v7966_v1, %v7966_v1 }
 0x7cc   :  { %2929 = vadd.xlane.f32.xlu0 %v2911_v33  ;;  %v2912_v14 = vmul.f32 %v7969_v40, %v7969_v40 }
 0x7cd   :  { %v2854_v56 = vpop.xlane.xlu0 %2853 }
 0x7ce   :  { %v2881_v35 = vmul.f32 0.0078125, %v2854_v56  ;;  %2931 = vadd.xlane.f32.xlu1 %v2912_v14 }
 0x7cf   :  { %v2856_v54 = vpop.xlane.xlu1 %2855 }
 0x7d0   :  { %v7976_v38 = vsub.f32 %v7898_v21, %v2881_v35  ;;  %v2882_v2 = vmul.f32 0.0078125, %v2856_v54 }
 0x7d2   :  { %v7979_v10 = vsub.f32 %v7901_v4, %v2882_v2  ;;  %v2913_v62 = vmul.f32 %v7976_v38, %v7976_v38 }
 0x7d4   :  { %2933 = vadd.xlane.f32.xlu0 %v2913_v62  ;;  %v2914_v30 = vmul.f32 %v7979_v10, %v7979_v10 }
 0x7d5   :  { %v2858_v31 = vpop.xlane.xlu0 %2857 }
 0x7d6   :  { %v2883_v53 = vmul.f32 0.0078125, %v2858_v31  ;;  %2935 = vadd.xlane.f32.xlu1 %v2914_v30 }
 0x7d7   :  { %v2860_v21 = vpop.xlane.xlu1 %2859 }
 0x7d8   :  { %v7989_v55 = vsub.f32 %v7908_v45, %v2883_v53  ;;  %v2884_v4 = vmul.f32 0.0078125, %v2860_v21 }
 0x7da   :  { %v7995_v46 = vsub.f32 %v7911_v23, %v2884_v4  ;;  %v2915_v48 = vmul.f32 %v7989_v55, %v7989_v55 }
 0x7dc   :  { %2937 = vadd.xlane.f32.xlu0 %v2915_v48  ;;  %v2916_v39 = vmul.f32 %v7995_v46, %v7995_v46 }
 0x7dd   :  { %v2862_v45 = vpop.xlane.xlu0 %2861 }
 0x7de   :  { %v2885_v42 = vmul.f32 0.0078125, %v2862_v45  ;;  %2939 = vadd.xlane.f32.xlu1 %v2916_v39 }
 0x7df   :  { %v2864_v29 = vpop.xlane.xlu1 %2863 }
 0x7e0   :  { %v8005_v23 = vsub.f32 %v7918_v0, %v2885_v42  ;;  %v2886_v32 = vmul.f32 0.0078125, %v2864_v29 }
 0x7e2   :  { %v8011_v20 = vsub.f32 %v7921_v63, %v2886_v32  ;;  %v2917_v52 = vmul.f32 %v8005_v23, %v8005_v23 }
 0x7e4   :  { %2941 = vadd.xlane.f32.xlu0 %v2917_v52  ;;  %v2918_v59 = vmul.f32 %v8011_v20, %v8011_v20 }
 0x7e5   :  { %v2866_v0 = vpop.xlane.xlu0 %2865 }
 0x7e6   :  { %v2887_v28 = vmul.f32 0.0078125, %v2866_v0  ;;  %2943 = vadd.xlane.f32.xlu1 %v2918_v59 }
 0x7e7   :  { %v2868_v27 = vpop.xlane.xlu1 %2867 }
 0x7e8   :  { %v8021_v63 = vsub.f32 %v7927_v17, %v2887_v28  ;;  %v2888_v44 = vmul.f32 0.0078125, %v2868_v27 }
 0x7ea   :  { %v8027_v15 = vsub.f32 %v7930_v47, %v2888_v44  ;;  %v2919_v8 = vmul.f32 %v8021_v63, %v8021_v63  ;;  %v6045_v44 = vld [vmem:[%s8813_s4 + $0x208] sm:$0xff]  }
 0x7ec   :  { %2945 = vadd.xlane.f32.xlu0 %v2919_v8  ;;  %v2920_v37 = vmul.f32 %v8027_v15, %v8027_v15 }
 0x7ed   :  { %v2870_v17 = vpop.xlane.xlu0 %2869 }
 0x7ee   :  { %v2889_v9 = vmul.f32 0.0078125, %v2870_v17  ;;  %2947 = vadd.xlane.f32.xlu1 %v2920_v37 }
 0x7ef   :  { %v2872_v51 = vpop.xlane.xlu1 %2871 }
 0x7f0   :  { %v8034_v36 = vsub.f32 %v7935_v6, %v2889_v9  ;;  %v2890_v12 = vmul.f32 0.0078125, %v2872_v51 }
 0x7f2   :  { %v8037_v47 = vsub.f32 %v7938_v50, %v2890_v12  ;;  %v2921_v5 = vmul.f32 %v8034_v36, %v8034_v36 }
 0x7f4   :  { %2949 = vadd.xlane.f32.xlu0 %v2921_v5  ;;  %v2922_v16 = vmul.f32 %v8037_v47, %v8037_v47 }
 0x7f5   :  { %v2874_v34 = vpop.xlane.xlu0 %2873 }
 0x7f6   :  { %v2891_v7 = vmul.f32 0.0078125, %v2874_v34  ;;  %2951 = vadd.xlane.f32.xlu1 %v2922_v16 }
 0x7f7   :  { %v2876_v43 = vpop.xlane.xlu1 %2875 }
 0x7f8   :  { %v8044_v11 = vsub.f32 %v7943_v18, %v2891_v7  ;;  %v2892_v6 = vmul.f32 0.0078125, %v2876_v43  ;;  %v6047_v7 = vld [vmem:[%s8813_s4 + $0x218] sm:$0xff]  }
 0x7fa   :  { %v8047_v24 = vsub.f32 %v7946_v26, %v2892_v6  ;;  %v2923_v50 = vmul.f32 %v8044_v11, %v8044_v11  ;;  %v6048_v6 = vld [vmem:[%s8813_s4 + $0x220] sm:$0xff]  }
 0x7fc   :  { %2953 = vadd.xlane.f32.xlu0 %v2923_v50  ;;  %v2924_v25 = vmul.f32 %v8047_v24, %v8047_v24 }
 0x7fe   :  { %2955 = vadd.xlane.f32.xlu1 %v2924_v25 }
 0x851   :  { %v2926_v13 = vpop.xlane.xlu0 %2925 }
 0x852   :  { %v2957_v18 = vmul.f32 0.0078125, %v2926_v13 }
 0x853   :  { %v2928_v33 = vpop.xlane.xlu1 %2927 }
 0x854   :  { %v2973_v14 = vadd.f32 1e-05, %v2957_v18  ;;  %v2958_v56 = vmul.f32 0.0078125, %v2928_v33 }
 0x856   :  { %6108 = vrsqrt.f32 %v2973_v14  ;;  %v2974_v26 = vadd.f32 1e-05, %v2958_v56 }
 0x858   :  { %6110 = vrsqrt.f32 %v2974_v26  ;;  %v6049_v26 = vld [vmem:[%s8813_s4 + $0x228] sm:$0xff]  }
 0x859   :  { %v2930_v35 = vpop.xlane.xlu0 %2929 }
 0x85a   :  { %v2959_v54 = vmul.f32 0.0078125, %v2930_v35 }
 0x85b   :  { %v2932_v2 = vpop.xlane.xlu1 %2931 }
 0x85c   :  { %v2975_v62 = vadd.f32 1e-05, %v2959_v54  ;;  %v2960_v30 = vmul.f32 0.0078125, %v2932_v2  ;;  %v6050_v54 = vld [vmem:[%s8813_s4 + $0x230] sm:$0xff]  }
 0x85e   :  { %6112 = vrsqrt.f32 %v2975_v62  ;;  %v2976_v31 = vadd.f32 1e-05, %v2960_v30 }
 0x860   :  { %v6109_v22 = vpop.eup %6108  ;;  %6114 = vrsqrt.f32 %v2976_v31 }
 0x861   :  { %v2934_v53 = vpop.xlane.xlu0 %2933  ;;  %v8057_v48 = vmul.f32 %v6109_v22, %v7956_v19 }
 0x862   :  { %v6111_v21 = vpop.eup %6110  ;;  %v2961_v4 = vmul.f32 0.0078125, %v2934_v53 }
 0x863   :  { %v2936_v58 = vpop.xlane.xlu1 %2935  ;;  %v8060_v39 = vmul.f32 %v6111_v21, %v7959_v57 }
 0x864   :  { %v2977_v45 = vadd.f32 1e-05, %v2961_v4  ;;  %v2962_v3 = vmul.f32 0.0078125, %v2936_v58  ;;  %v6051_v58 = vld [vmem:[%s8813_s4 + $0x238] sm:$0xff]  }
 0x865   :  { %v3021_v42 = vpack.c.bf16 %v8060_v39, %v8057_v48 }
 0x866   :  { %6116 = vrsqrt.f32 %v2977_v45  ;;  %v2978_v29 = vadd.f32 1e-05, %v2962_v3  ;;  %v6052_v3 = vld [vmem:[%s8813_s4 + $0x280] sm:$0xff]  }
 0x867   :  { %5752 = vmatprep.mubr.bf16.mxu1 %v3021_v42  ;;  %5768 = vmatprep.subr.bf16.mxu0 %v3021_v42 }
 0x868   :  { %v6113_v32 = vpop.eup %6112  ;;  %6118 = vrsqrt.f32 %v2978_v29  ;;  %5769 = vmatpush3.bf16.xpose.msra.mxu0 %v3021_v42 }
 0x869   :  { %v2938_v60 = vpop.xlane.xlu0 %2937  ;;  %v8065_v19 = vmul.f32 %v6113_v32, %v7966_v1 }
 0x86a   :  { %v6115_v52 = vpop.eup %6114  ;;  %v2963_v59 = vmul.f32 0.0078125, %v2938_v60 }
 0x86b   :  { %v8068_v57 = vmul.f32 %v6115_v52, %v7969_v40  ;;  %v2940_v0 = vpop.xlane.xlu1 %2939  ;;  %v6046_v40 = vld [vmem:[%s8813_s4 + $0x210] sm:$0xff]  }
 0x86c   :  { %v2979_v61 = vadd.f32 1e-05, %v2963_v59  ;;  %v2964_v28 = vmul.f32 0.0078125, %v2940_v0 }
 0x86d   :  { %v3022_v27 = vpack.c.bf16 %v8068_v57, %v8065_v19 }
 0x86e   :  { %6120 = vrsqrt.f32 %v2979_v61  ;;  %v2980_v41 = vadd.f32 1e-05, %v2964_v28 }
 0x86f   :  { %5753 = vmatmul.mubr.bf16.vlgmr.msra.gmra.mrb[144].mxu1 %v3022_v27  ;;  %5770 = vmatprep.subr.bf16.mxu0 %v3022_v27 }
 0x870   :  { %v6117_v8 = vpop.eup %6116  ;;  %6122 = vrsqrt.f32 %v2980_v41  ;;  %5771 = vmatpush3.bf16.xpose.msra.mxu0 %v3022_v27  ;;  %5801 = vmatpush3.bf16.msra.mxu1 %v6044_v49 }
 0x871   :  { %v2942_v1 = vpop.xlane.xlu0 %2941  ;;  %5802 = vmatprep.subr.bf16.mxu1 %v6045_v44  ;;  %v8079_v51 = vmul.f32 %v6117_v8, %v7976_v38 }
 0x872   :  { %v6119_v37 = vpop.eup %6118  ;;  %v2965_v17 = vmul.f32 0.0078125, %v2942_v1 }
 0x873   :  { %v2944_v9 = vpop.xlane.xlu1 %2943  ;;  %v8082_v12 = vmul.f32 %v6119_v37, %v7979_v10 }
 0x874   :  { %v2981_v5 = vadd.f32 1e-05, %v2965_v17  ;;  %v2966_v16 = vmul.f32 0.0078125, %v2944_v9  ;;  %5803 = vmatpush3.bf16.msra.mxu1 %v6045_v44  ;;  %v3313_v9 = vmax.f32 %v8057_v48, 0.0 }
 0x875   :  { %v3023_v34 = vpack.c.bf16 %v8082_v12, %v8079_v51  ;;  %5804 = vmatprep.subr.bf16.mxu1 %v6046_v40 }
 0x876   :  { %6124 = vrsqrt.f32 %v2981_v5  ;;  %v2982_v43 = vadd.f32 1e-05, %v2966_v16 }
 0x877   :  { %5756 = vmatprep.mubr.bf16.mxu1 %v3023_v34  ;;  %5772 = vmatprep.subr.bf16.mxu0 %v3023_v34 }
 0x878   :  { %v6121_v38 = vpop.eup %6120  ;;  %6126 = vrsqrt.f32 %v2982_v43  ;;  %5773 = vmatpush3.bf16.xpose.msra.mxu0 %v3023_v34  ;;  %5805 = vmatpush3.bf16.msra.mxu1 %v6046_v40  ;;  %v3314_v40 = vmax.f32 %v8060_v39, 0.0  ;;  %v3315_v39 = vmax.f32 %v8065_v19, 0.0  ;;  %v6054_v19 = vld [vmem:[%s8813_s4 + $0x290] sm:$0xff]  }
 0x879   :  { %v2946_v10 = vpop.xlane.xlu0 %2945  ;;  %5806 = vmatprep.subr.bf16.mxu1 %v6047_v7  ;;  %v8093_v13 = vmul.f32 %v6121_v38, %v7989_v55  ;;  %v6055_v38 = vld [vmem:[%s8813_s4 + $0x298] sm:$0xff]  }
 0x87a   :  { %v6123_v50 = vpop.eup %6122  ;;  %v2967_v25 = vmul.f32 0.0078125, %v2946_v10  ;;  %v8134_v16 = vpack.c.bf16 %v3314_v40, %v3313_v9 }
 0x87b   :  { %v2948_v49 = vpop.xlane.xlu1 %2947  ;;  %v8096_v18 = vmul.f32 %v6123_v50, %v7995_v46  ;;  %v6056_v50 = vld [vmem:[%s8813_s4 + $0x2a0] sm:$0xff]  }
 0x87c   :  { %v2983_v33 = vadd.f32 1e-05, %v2967_v25  ;;  %v2968_v14 = vmul.f32 0.0078125, %v2948_v49  ;;  %5807 = vmatpush3.bf16.msra.mxu1 %v6047_v7 }
 0x87d   :  { %v3024_v56 = vpack.c.bf16 %v8096_v18, %v8093_v13  ;;  %5808 = vmatprep.subr.bf16.mxu1 %v6048_v6 }
 0x87e   :  { %6128 = vrsqrt.f32 %v2983_v33  ;;  %v2984_v35 = vadd.f32 1e-05, %v2968_v14  ;;  %v6057_v33 = vld [vmem:[%s8813_s4 + $0x2a8] sm:$0xff]  }
 0x87f   :  { %5757 = vmatmul.mubr.bf16.gmra.mrb[148].mxu1 %v3024_v56  ;;  %5774 = vmatprep.subr.bf16.mxu0 %v3024_v56 }
 0x880   :  { %v6125_v55 = vpop.eup %6124  ;;  %6130 = vrsqrt.f32 %v2984_v35  ;;  %5775 = vmatpush3.bf16.xpose.msra.mxu0 %v3024_v56  ;;  %5809 = vmatpush3.bf16.msra.mxu1 %v6048_v6 }
 0x881   :  { %v2950_v46 = vpop.xlane.xlu0 %2949  ;;  %5810 = vmatprep.subr.bf16.mxu1 %v6049_v26  ;;  %v8107_v31 = vmul.f32 %v6125_v55, %v8005_v23 }
 0x882   :  { %v6127_v2 = vpop.eup %6126  ;;  %v2969_v62 = vmul.f32 0.0078125, %v2950_v46  ;;  %v6059_v46 = vld [vmem:[%s8813_s4 + $0x2b8] sm:$0xff]  }
 0x883   :  { %v2952_v30 = vpop.xlane.xlu1 %2951  ;;  %v8110_v22 = vmul.f32 %v6127_v2, %v8011_v20  ;;  %v3321_v7 = vmax.f32 %v8107_v31, 0.0 }
 0x884   :  { %v2985_v53 = vadd.f32 1e-05, %v2969_v62  ;;  %v2970_v21 = vmul.f32 0.0078125, %v2952_v30  ;;  %5811 = vmatpush3.bf16.msra.mxu1 %v6049_v26  ;;  %v6058_v26 = vld [vmem:[%s8813_s4 + $0x2b0] sm:$0xff]  }
 0x885   :  { %v3025_v4 = vpack.c.bf16 %v8110_v22, %v8107_v31  ;;  %5812 = vmatprep.subr.bf16.mxu1 %v6050_v54 }
 0x886   :  { %6132 = vrsqrt.f32 %v2985_v53  ;;  %v2986_v45 = vadd.f32 1e-05, %v2970_v21  ;;  %v6061_v21 = vld [vmem:[%s8813_s4 + $0x248] sm:$0xff]  }
 0x887   :  { %5760 = vmatprep.mubr.bf16.mxu1 %v3025_v4  ;;  %5776 = vmatprep.subr.bf16.mxu0 %v3025_v4 }
 0x888   :  { %v6129_v23 = vpop.eup %6128  ;;  %6134 = vrsqrt.f32 %v2986_v45  ;;  %5777 = vmatpush3.bf16.xpose.msra.mxu0 %v3025_v4  ;;  %5813 = vmatpush3.bf16.msra.mxu1 %v6050_v54  ;;  %v6060_v54 = vld [vmem:[%s8813_s4 + $0x240] sm:$0xff]   ;;  %v6062_v4 = vld [vmem:[%s8813_s4 + $0x250] sm:$0xff]  }
 0x889   :  { %v2954_v20 = vpop.xlane.xlu0 %2953  ;;  %5814 = vmatprep.subr.bf16.mxu1 %v6051_v58  ;;  %v8121_v60 = vmul.f32 %v6129_v23, %v8021_v63 }
 0x88a   :  { %v6131_v42 = vpop.eup %6130  ;;  %v2971_v29 = vmul.f32 0.0078125, %v2954_v20  ;;  %v6064_v20 = vld [vmem:[%s8813_s4 + $0x260] sm:$0xff]  }
 0x88b   :  { %v2956_v32 = vpop.xlane.xlu1 %2955  ;;  %v8124_v52 = vmul.f32 %v6131_v42, %v8027_v15  ;;  %v3323_v49 = vmax.f32 %v8121_v60, 0.0 }
 0x88c   :  { %v2987_v59 = vadd.f32 1e-05, %v2971_v29  ;;  %v2972_v0 = vmul.f32 0.0078125, %v2956_v32  ;;  %5815 = vmatpush3.bf16.msra.mxu1 %v6051_v58  ;;  %v6063_v58 = vld [vmem:[%s8813_s4 + $0x258] sm:$0xff]  }
 0x88d   :  { %v3026_v61 = vpack.c.bf16 %v8124_v52, %v8121_v60  ;;  %5864 = vmatprep.subr.bf16.mxu1 %v6052_v3  ;;  %v3324_v6 = vmax.f32 %v8124_v52, 0.0  ;;  %v6065_v60 = vld [vmem:[%s8813_s4 + $0x268] sm:$0xff]   ;;  %v6066_v52 = vld [vmem:[%s8813_s4 + $0x270] sm:$0xff]  }
 0x88e   :  { %6136 = vrsqrt.f32 %v2987_v59  ;;  %v2988_v28 = vadd.f32 1e-05, %v2972_v0  ;;  %v6067_v59 = vld [vmem:[%s8813_s4 + $0x278] sm:$0xff]  }
 0x88f   :  { %5761 = vmatmul.mubr.bf16.gmra.mrb[152].mxu1 %v3026_v61  ;;  %5778 = vmatprep.subr.bf16.mxu0 %v3026_v61 }
 0x890   :  { %v6133_v27 = vpop.eup %6132  ;;  %6138 = vrsqrt.f32 %v2988_v28  ;;  %5779 = vmatpush3.bf16.xpose.msra.mxu0 %v3026_v61  ;;  %v6068_v28 = vld [vmem:[%s8813_s4 + $0x2c0] sm:$0xff]  }
 0x891   :  { %v3017_v63 = vmul.f32 %v6133_v27, %v8034_v36  ;;  %v3316_v36 = vmax.f32 %v8068_v57, 0.0  ;;  %v3320_v57 = vmax.f32 %v8096_v18, 0.0  ;;  %v8171_v18 = vpack.c.bf16 %v3324_v6, %v3323_v49 }
 0x892   :  { %v6135_v44 = vpop.eup %6134 }
 0x893   :  { %v3018_v15 = vmul.f32 %v6135_v44, %v8037_v47  ;;  %v3318_v47 = vmax.f32 %v8082_v12, 0.0  ;;  %v8141_v34 = vpack.c.bf16 %v3316_v36, %v3315_v39  ;;  %v3319_v12 = vmax.f32 %v8093_v13, 0.0 }
 0x894   :  { %v3325_v13 = vmax.f32 %v3017_v63, 0.0 }
 0x895   :  { %v3027_v41 = vpack.c.bf16 %v3018_v15, %v3017_v63  ;;  %v8157_v43 = vpack.c.bf16 %v3320_v57, %v3319_v12  ;;  %v3326_v25 = vmax.f32 %v3018_v15, 0.0 }
 0x897   :  { %5764 = vmatprep.mubr.bf16.mxu1 %v3027_v41  ;;  %5780 = vmatprep.subr.bf16.mxu0 %v3027_v41  ;;  %v8176_v14 = vpack.c.bf16 %v3326_v25, %v3325_v13  ;;  %v6072_v13 = vld [vmem:[%s8813_s4 + $0x2e0] sm:$0xff]  }
 0x898   :  { %v6137_v8 = vpop.eup %6136  ;;  %5781 = vmatpush3.bf16.xpose.msra.mxu0 %v3027_v41 }
 0x899   :  { %v3019_v37 = vmul.f32 %v6137_v8, %v8044_v11  ;;  %v3317_v11 = vmax.f32 %v8079_v51, 0.0  ;;  %v3322_v51 = vmax.f32 %v8110_v22, 0.0 }
 0x89a   :  { %v6139_v1 = vpop.eup %6138 }
 0x89b   :  { %v3020_v17 = vmul.f32 %v6139_v1, %v8047_v24  ;;  %v6053_v24 = vld [vmem:[%s8813_s4 + $0x288] sm:$0xff]   ;;  %v8146_v48 = vpack.c.bf16 %v3318_v47, %v3317_v11  ;;  %v8162_v10 = vpack.c.bf16 %v3322_v51, %v3321_v7  ;;  %v3327_v35 = vmax.f32 %v3019_v37, 0.0  ;;  %v6070_v51 = vld [vmem:[%s8813_s4 + $0x2d0] sm:$0xff]   ;;  %v6231_v47 = vld [vmem:[%s8810_s1 + $0xe0] sm:$0xff] }
 0x89c   :  { %v6229_v7 = vld [vmem:[%s8810_s1 + $0xd0] sm:$0xff] }
 0x89d   :  { %v3028_v5 = vpack.c.bf16 %v3020_v17, %v3019_v37  ;;  %v3328_v56 = vmax.f32 %v3020_v17, 0.0 }
 0x89f   :  { %5765 = vmatmul.mubr.bf16.gmra.mrb[156].mxu1 %v3028_v5  ;;  %5782 = vmatprep.subr.bf16.mxu0 %v3028_v5  ;;  %v8183_v55 = vpack.c.bf16 %v3328_v56, %v3327_v35  ;;  %v6228_v56 = vld [vmem:[%s8810_s1 + $0x118] sm:$0xff] }
 0x8a0   :  { %5783 = vmatpush3.bf16.xpose.msra.mxu0 %v3028_v5  ;;  %5816 = vmatprep.mubr.bf16.mxu1 %v8134_v16 }
 0x8a1   :  { %5832 = vmatprep.subr.bf16.mxu0 %v6060_v54 }
 0x8a7   :  { %5817 = vmatmul.mubr.bf16.vlgmr.msra.gmra.mrb[160].mxu1 %v8141_v34 }
 0x8a8   :  { %5820 = vmatprep.mubr.bf16.mxu1 %v8146_v48  ;;  %5865 = vmatpush3.bf16.msra.mxu1 %v6052_v3 }
 0x8a9   :  { %5866 = vmatprep.subr.bf16.mxu1 %v6053_v24 }
 0x8ac   :  { %5867 = vmatpush3.bf16.msra.mxu1 %v6053_v24  ;;  %v6069_v24 = vld [vmem:[%s8813_s4 + $0x2c8] sm:$0xff]  }
 0x8ad   :  { %5868 = vmatprep.subr.bf16.mxu1 %v6054_v19 }
 0x8af   :  { %5821 = vmatmul.mubr.bf16.gmra.mrb[164].mxu1 %v8157_v43 }
 0x8b0   :  { %5824 = vmatprep.mubr.bf16.mxu1 %v8162_v10  ;;  %5869 = vmatpush3.bf16.msra.mxu1 %v6054_v19 }
 0x8b1   :  { %5870 = vmatprep.subr.bf16.mxu1 %v6055_v38 }
 0x8b4   :  { %5871 = vmatpush3.bf16.msra.mxu1 %v6055_v38 }
 0x8b5   :  { %5872 = vmatprep.subr.bf16.mxu1 %v6056_v50 }
 0x8b7   :  { %5825 = vmatmul.mubr.bf16.gmra.mrb[168].mxu1 %v8171_v18 }
 0x8b8   :  { %5828 = vmatprep.mubr.bf16.mxu1 %v8176_v14  ;;  %5873 = vmatpush3.bf16.msra.mxu1 %v6056_v50  ;;  %v6071_v50 = vld [vmem:[%s8813_s4 + $0x2d8] sm:$0xff]  }
 0x8b9   :  { %5874 = vmatprep.subr.bf16.mxu1 %v6057_v33 }
 0x8bc   :  { %5875 = vmatpush3.bf16.msra.mxu1 %v6057_v33 }
 0x8bd   :  { %5876 = vmatprep.subr.bf16.mxu1 %v6058_v26 }
 0x8bf   :  { %5829 = vmatmul.mubr.bf16.gmra.mrb[172].mxu1 %v8183_v55 }
 0x8c0   :  { %5877 = vmatpush3.bf16.msra.mxu1 %v6058_v26  ;;  %5880 = vmatprep.mubr.bf16.mxu1 %v8134_v16 }
 0x8c1   :  { %5878 = vmatprep.subr.bf16.mxu1 %v6059_v46 }
 0x8c4   :  { %5879 = vmatpush3.bf16.msra.mxu1 %v6059_v46  ;;  %v6073_v46 = vld [vmem:[%s8813_s4 + $0x2e8] sm:$0xff]  }
 0x8c7   :  { %5881 = vmatmul.mubr.bf16.vlgmr.msra.gmra.mrb[176].mxu1 %v8141_v34 }
 0x8c8   :  { %5884 = vmatprep.mubr.bf16.mxu1 %v8146_v48 }
 0x8cf   :  { %5885 = vmatmul.mubr.bf16.gmra.mrb[180].mxu1 %v8157_v43 }
 0x8d0   :  { %5888 = vmatprep.mubr.bf16.mxu1 %v8162_v10 }
 0x8d7   :  { %5889 = vmatmul.mubr.bf16.gmra.mrb[184].mxu1 %v8171_v18 }
 0x8d8   :  { %5892 = vmatprep.mubr.bf16.mxu1 %v8176_v14 }
 0x8df   :  { %5893 = vmatmul.mubr.bf16.gmra.mrb[188].mxu1 %v8183_v55 }
 0x942   :  { %v5754_v2 = vpop.f32.mrb[144].mxu1 }
 0x943   :  { %v3128_v62 = vpop.f32.mrb[145].mxu1 }
 0x944   :  { %v5755_v30 = vpop.f32.mrb[146].mxu1 }
 0x945   :  { %v3192_v31 = vpack.c.bf16 %v5755_v30, %v5754_v2  ;;  %v3131_v22 = vpop.f32.mrb[147].mxu1 }
 0x946   :  { %v3191_v53 = vpack.c.bf16 %v3131_v22, %v3128_v62  ;;  %v6074_v62 = vld [vmem:[%s8813_s4 + $0x2f0] sm:$0xff]  }
 0x948   :  { %5784 = vmatprep.mubr.bf16.mxu0 %v3191_v53  ;;  %v6227_v53 = vld [vmem:[%s8810_s1 + $0x110] sm:$0xff] }
 0x949   :  { %5785 = vmatmul.mubr.bf16.vlgmr.msra.gmra.mrb[176].mxu0 %v3192_v31  ;;  %v6225_v31 = vld [vmem:[%s8810_s1 + $0xc8] sm:$0xff] }
 0x94a   :  { %5833 = vmatpush3.bf16.msra.mxu0 %v6060_v54 }
 0x94b   :  { %5834 = vmatprep.subr.bf16.mxu0 %v6061_v21 }
 0x94e   :  { %5835 = vmatpush3.bf16.msra.mxu0 %v6061_v21  ;;  %v6075_v21 = vld [vmem:[%s8813_s4 + $0x2f8] sm:$0xff]  }
 0x94f   :  { %5836 = vmatprep.subr.bf16.mxu0 %v6062_v4 }
 0x952   :  { %v5758_v45 = vpop.f32.mrb[148].mxu1  ;;  %5837 = vmatpush3.bf16.msra.mxu0 %v6062_v4 }
 0x953   :  { %v3144_v23 = vpop.f32.mrb[149].mxu1  ;;  %5838 = vmatprep.subr.bf16.mxu0 %v6063_v58 }
 0x954   :  { %v5759_v3 = vpop.f32.mrb[150].mxu1 }
 0x955   :  { %v3194_v42 = vpack.c.bf16 %v5759_v3, %v5758_v45  ;;  %v3147_v29 = vpop.f32.mrb[151].mxu1 }
 0x956   :  { %v3193_v32 = vpack.c.bf16 %v3147_v29, %v3144_v23  ;;  %5839 = vmatpush3.bf16.msra.mxu0 %v6063_v58 }
 0x957   :  { %5840 = vmatprep.subr.bf16.mxu0 %v6064_v20 }
 0x958   :  { %5788 = vmatprep.mubr.bf16.mxu0 %v3193_v32 }
 0x959   :  { %5789 = vmatmul.mubr.bf16.gmra.mrb[180].mxu0 %v3194_v42 }
 0x95a   :  { %5841 = vmatpush3.bf16.msra.mxu0 %v6064_v20 }
 0x95b   :  { %5842 = vmatprep.subr.bf16.mxu0 %v6065_v60 }
 0x95e   :  { %5843 = vmatpush3.bf16.msra.mxu0 %v6065_v60 }
 0x95f   :  { %5844 = vmatprep.subr.bf16.mxu0 %v6066_v52 }
 0x962   :  { %v5762_v0 = vpop.f32.mrb[152].mxu1  ;;  %5845 = vmatpush3.bf16.msra.mxu0 %v6066_v52 }
 0x963   :  { %v3160_v61 = vpop.f32.mrb[153].mxu1  ;;  %5846 = vmatprep.subr.bf16.mxu0 %v6067_v59 }
 0x964   :  { %v5763_v27 = vpop.f32.mrb[154].mxu1 }
 0x965   :  { %v3196_v44 = vpack.c.bf16 %v5763_v27, %v5762_v0  ;;  %v3163_v63 = vpop.f32.mrb[155].mxu1 }
 0x966   :  { %v3195_v15 = vpack.c.bf16 %v3163_v63, %v3160_v61  ;;  %5847 = vmatpush3.bf16.msra.mxu0 %v6067_v59 }
 0x967   :  { %5896 = vmatprep.subr.bf16.mxu0 %v6068_v28 }
 0x968   :  { %5792 = vmatprep.mubr.bf16.mxu0 %v3195_v15 }
 0x969   :  { %5793 = vmatmul.mubr.bf16.gmra.mrb[184].mxu0 %v3196_v44 }
 0x972   :  { %v5766_v41 = vpop.f32.mrb[156].mxu1 }
 0x973   :  { %v3176_v8 = vpop.f32.mrb[157].mxu1 }
 0x974   :  { %v5767_v1 = vpop.f32.mrb[158].mxu1 }
 0x975   :  { %v3198_v40 = vpack.c.bf16 %v5767_v1, %v5766_v41  ;;  %v3179_v37 = vpop.f32.mrb[159].mxu1 }
 0x976   :  { %v3197_v17 = vpack.c.bf16 %v3179_v37, %v3176_v8 }
 0x978   :  { %5796 = vmatprep.mubr.bf16.mxu0 %v3197_v17 }
 0x979   :  { %5797 = vmatmul.mubr.bf16.gmra.mrb[188].mxu0 %v3198_v40  ;;  %v6198_v40 = vld [vmem:[%s8810_s1 + $0x38] sm:$0xff] }
 0x97a   :  { %v8224_v9 = vpop.f32.mrb[160].mxu1  ;;  %5848 = vmatprep.mubr.bf16.mxu0 %v8134_v16 }
 0x97b   :  { %v8227_v5 = vpop.f32.mrb[161].mxu1 }
 0x97c   :  { %v8229_v36 = vpop.f32.mrb[162].mxu1 }
 0x97d   :  { %v8233_v39 = vpop.f32.mrb[163].mxu1 }
 0x981   :  { %5849 = vmatmul.mubr.bf16.vlgmr.msra.gmra.mrb[192].mxu0 %v8141_v34 }
 0x982   :  { %v8241_v57 = vpop.f32.mrb[164].mxu1  ;;  %5852 = vmatprep.mubr.bf16.mxu0 %v8146_v48  ;;  %5897 = vmatpush3.bf16.msra.mxu0 %v6068_v28 }
 0x983   :  { %v8244_v19 = vpop.f32.mrb[165].mxu1  ;;  %5898 = vmatprep.subr.bf16.mxu0 %v6069_v24 }
 0x984   :  { %v8249_v12 = vpop.f32.mrb[166].mxu1 }
 0x985   :  { %v8253_v38 = vpop.f32.mrb[167].mxu1 }
 0x986   :  { %5899 = vmatpush3.bf16.msra.mxu0 %v6069_v24  ;;  %v6200_v24 = vld [vmem:[%s8810_s1] sm:$0xff] }
 0x987   :  { %5900 = vmatprep.subr.bf16.mxu0 %v6070_v51 }
 0x989   :  { %5853 = vmatmul.mubr.bf16.gmra.mrb[196].mxu0 %v8157_v43 }
 0x98a   :  { %v8261_v25 = vpop.f32.mrb[168].mxu1  ;;  %5856 = vmatprep.mubr.bf16.mxu0 %v8162_v10  ;;  %5901 = vmatpush3.bf16.msra.mxu0 %v6070_v51 }
 0x98b   :  { %v8264_v49 = vpop.f32.mrb[169].mxu1  ;;  %5902 = vmatprep.subr.bf16.mxu0 %v6071_v50 }
 0x98c   :  { %v8269_v33 = vpop.f32.mrb[170].mxu1 }
 0x98d   :  { %v8273_v26 = vpop.f32.mrb[171].mxu1 }
 0x98e   :  { %5903 = vmatpush3.bf16.msra.mxu0 %v6071_v50 }
 0x98f   :  { %5904 = vmatprep.subr.bf16.mxu0 %v6072_v13 }
 0x991   :  { %5857 = vmatmul.mubr.bf16.gmra.mrb[200].mxu0 %v8171_v18 }
 0x992   :  { %v8281_v54 = vpop.f32.mrb[172].mxu1  ;;  %5860 = vmatprep.mubr.bf16.mxu0 %v8176_v14  ;;  %5905 = vmatpush3.bf16.msra.mxu0 %v6072_v13  ;;  %v6201_v13 = vld [vmem:[%s8810_s1 + $0x8] sm:$0xff] }
 0x993   :  { %v8284_v2 = vpop.f32.mrb[173].mxu1  ;;  %5906 = vmatprep.subr.bf16.mxu0 %v6073_v46 }
 0x994   :  { %v8289_v30 = vpop.f32.mrb[174].mxu1 }
 0x995   :  { %v8293_v22 = vpop.f32.mrb[175].mxu1 }
 0x996   :  { %5907 = vmatpush3.bf16.msra.mxu0 %v6073_v46 }
 0x997   :  { %5908 = vmatprep.subr.bf16.mxu0 %v6074_v62 }
 0x999   :  { %5861 = vmatmul.mubr.bf16.gmra.mrb[204].mxu0 %v8183_v55 }
 0x99a   :  { %v5882_v4 = vpop.f32.mrb[176].mxu1  ;;  %5909 = vmatpush3.bf16.msra.mxu0 %v6074_v62  ;;  %5912 = vmatprep.mubr.bf16.mxu0 %v8134_v16  ;;  %v6202_v62 = vld [vmem:[%s8810_s1 + $0x48] sm:$0xff] }
 0x99b   :  { %v3776_v58 = vpop.f32.mrb[177].mxu1  ;;  %5910 = vmatprep.subr.bf16.mxu0 %v6075_v21 }
 0x99c   :  { %v5883_v45 = vpop.f32.mrb[178].mxu1 }
 0x99d   :  { %v8302_v23 = vpack.c.bf16 %v5883_v45, %v5882_v4  ;;  %v3779_v20 = vpop.f32.mrb[179].mxu1  ;;  %v6203_v4 = vld [vmem:[%s8810_s1 + $0x50] sm:$0xff]  ;;  %v6204_v45 = vld [vmem:[%s8810_s1 + $0x58] sm:$0xff] }
 0x99e   :  { %v8304_v3 = vpack.c.bf16 %v3779_v20, %v3776_v58  ;;  %5911 = vmatpush3.bf16.msra.mxu0 %v6075_v21 }
 0x9a1   :  { %5913 = vmatmul.mubr.bf16.vlgmr.msra.gmra.mrb[208].mxu0 %v8141_v34 }
 0x9a2   :  { %v5886_v42 = vpop.f32.mrb[180].mxu1  ;;  %5916 = vmatprep.mubr.bf16.mxu0 %v8146_v48 }
 0x9a3   :  { %v3792_v29 = vpop.f32.mrb[181].mxu1 }
 0x9a4   :  { %v5887_v32 = vpop.f32.mrb[182].mxu1 }
 0x9a5   :  { %v8308_v60 = vpack.c.bf16 %v5887_v32, %v5886_v42  ;;  %v3795_v52 = vpop.f32.mrb[183].mxu1 }
 0x9a6   :  { %v8310_v16 = vpack.c.bf16 %v3795_v52, %v3792_v29  ;;  %v6205_v29 = vld [vmem:[%s8810_s1 + $0x10] sm:$0xff]  ;;  %v6206_v52 = vld [vmem:[%s8810_s1 + $0x18] sm:$0xff] }
 0x9a9   :  { %5917 = vmatmul.mubr.bf16.gmra.mrb[212].mxu0 %v8157_v43 }
 0x9aa   :  { %v5890_v59 = vpop.f32.mrb[184].mxu1  ;;  %5920 = vmatprep.mubr.bf16.mxu0 %v8162_v10  ;;  %v6196_v10 = vld [vmem:[%s8811_s2] sm:$0xff]  }
 0x9ab   :  { %v3808_v0 = vpop.f32.mrb[185].mxu1 }
 0x9ac   :  { %v5891_v61 = vpop.f32.mrb[186].mxu1 }
 0x9ad   :  { %v8314_v28 = vpack.c.bf16 %v5891_v61, %v5890_v59  ;;  %v3811_v34 = vpop.f32.mrb[187].mxu1 }
 0x9ae   :  { %v8316_v27 = vpack.c.bf16 %v3811_v34, %v3808_v0  ;;  %v6207_v0 = vld [vmem:[%s8810_s1 + $0x20] sm:$0xff]  ;;  %v6208_v34 = vld [vmem:[%s8810_s1 + $0x28] sm:$0xff] }
 0x9b1   :  { %5921 = vmatmul.mubr.bf16.gmra.mrb[216].mxu0 %v8171_v18 }
 0x9b2   :  { %v5894_v48 = vpop.f32.mrb[188].mxu1  ;;  %5924 = vmatprep.mubr.bf16.mxu0 %v8176_v14  ;;  %v6197_v14 = vld [vmem:[%s8810_s1 + $0x30] sm:$0xff] }
 0x9b3   :  { %v3824_v44 = vpop.f32.mrb[189].mxu1 }
 0x9b4   :  { %v5895_v63 = vpop.f32.mrb[190].mxu1 }
 0x9b5   :  { %v8320_v15 = vpack.c.bf16 %v5895_v63, %v5894_v48  ;;  %v3827_v43 = vpop.f32.mrb[191].mxu1 }
 0x9b6   :  { %v8322_v41 = vpack.c.bf16 %v3827_v43, %v3824_v44  ;;  %v6224_v44 = vld [vmem:[%s8810_s1 + $0xc0] sm:$0xff] }
 0x9b9   :  { %5925 = vmatmul.mubr.bf16.gmra.mrb[220].mxu0 %v8183_v55  ;;  %v6199_v55 = vld [vmem:[%s8810_s1 + $0x40] sm:$0xff] }
 0x9ba   :  { %4226 = vmatprep.mubr.bf16.mxu0 %v6196_v10 }
 0xa1c   :  { %v5786_v8 = vpop.f32.mrb[176].mxu0 }
 0xa1d   :  { %3299 = vst [vmem:[#allocation4 + $0x110] sm:$0xff] %v5786_v8  ;;  %v3233_v18 = vpop.f32.mrb[177].mxu0  ;;  %v8331_v1 = vmul.f32 %v6197_v14, %v5786_v8  ;;  %v8336_v37 = vmul.f32 %v6198_v40, %v5786_v8  ;;  %v8341_v17 = vmul.f32 %v6199_v55, %v5786_v8  ;;  %v6209_v55 = vld [vmem:[%s8810_s1 + $0x90] sm:$0xff] }
 0xa1e   :  { %3297 = vst [vmem:[#allocation4 + $0x100] sm:$0xff] %v3233_v18  ;;  %v8346_v51 = vmul.f32 %v6200_v24, %v3233_v18  ;;  %v5787_v50 = vpop.f32.mrb[178].mxu0  ;;  %v4018_v46 = vmul.f32 %v6201_v13, %v3233_v18  ;;  %v8369_v32 = vmul.f32 %v6205_v29, %v3233_v18  ;;  %v6213_v29 = vld [vmem:[%s8810_s1 + $0x68] sm:$0xff] }
 0xa1f   :  { %8972 = vst [vmem:[#allocation30_spill] sm:$0xff] %v8341_v17  ;;  %3300 = vst [vmem:[#allocation4 + $0x118] sm:$0xff] %v5787_v50  ;;  %v8354_v21 = vmul.f32 %v6202_v62, %v5787_v50  ;;  %v8359_v58 = vmul.f32 %v6203_v4, %v5787_v50  ;;  %v8364_v20 = vmul.f32 %v6204_v45, %v5787_v50  ;;  %v3236_v42 = vpop.f32.mrb[179].mxu0  ;;  %v6210_v50 = vld [vmem:[%s8810_s1 + $0x98] sm:$0xff]  ;;  %v6212_v4 = vld [vmem:[%s8810_s1 + $0x60] sm:$0xff] }
 0xa20   :  { %8974 = vst [vmem:[#allocation11_spill] sm:$0xff] %v8369_v32  ;;  %3298 = vst [vmem:[#allocation4 + $0x108] sm:$0xff] %v3236_v42  ;;  %v8374_v59 = vmul.f32 %v6206_v52, %v3236_v42  ;;  %v4021_v61 = vmul.f32 %v6207_v0, %v3236_v42  ;;  %v8382_v48 = vmul.f32 %v6208_v34, %v3236_v42  ;;  %v6214_v0 = vld [vmem:[%s8810_s1 + $0xa8] sm:$0xff]  ;;  %v6215_v34 = vld [vmem:[%s8810_s1 + $0xb0] sm:$0xff] }
 0xa21   :  { %8973 = vst [vmem:[#allocation24_spill] sm:$0xff] %v8364_v20  ;;  %v6241_v17 = vld [vmem:[%s8810_s1 + $0x130] sm:$0xff] }
 0xa22   :  { %8975 = vst [vmem:[#allocation9_spill] sm:$0xff] %v8382_v48  ;;  %v4066_v18 = vpack.c.bf16 %v4021_v61, %v4018_v46  ;;  %v6211_v46 = vld [vmem:[%s8810_s1 + $0xa0] sm:$0xff] }
 0xa24   :  { %4129 = vmatprep.mubr.bf16.mxu1 %v4066_v18 }
 0xa2c   :  { %v5790_v14 = vpop.f32.mrb[180].mxu0 }
 0xa2d   :  { %3303 = vst [vmem:[#allocation4 + $0x130] sm:$0xff] %v5790_v14  ;;  %v3249_v40 = vpop.f32.mrb[181].mxu0  ;;  %v8397_v24 = vmul.f32 %v6209_v55, %v5790_v14  ;;  %v8402_v13 = vmul.f32 %v6210_v50, %v5790_v14  ;;  %v8407_v62 = vmul.f32 %v6211_v46, %v5790_v14  ;;  %v6216_v14 = vld [vmem:[%s8810_s1 + $0xb8] sm:$0xff]  ;;  %v6217_v46 = vld [vmem:[%s8810_s1 + $0x70] sm:$0xff] }
 0xa2e   :  { %3301 = vst [vmem:[#allocation4 + $0x120] sm:$0xff] %v3249_v40  ;;  %v8412_v45 = vmul.f32 %v6212_v4, %v3249_v40  ;;  %v5791_v42 = vpop.f32.mrb[182].mxu0  ;;  %v8417_v52 = vmul.f32 %v6213_v29, %v3249_v40  ;;  %v8437_v4 = vmul.f32 %v6217_v46, %v3249_v40  ;;  %v6218_v29 = vld [vmem:[%s8810_s1 + $0x78] sm:$0xff]  ;;  %v6221_v40 = vld [vmem:[%s8810_s1 + $0xf0] sm:$0xff] }
 0xa2f   :  { %8976 = vst [vmem:[#allocation10_spill] sm:$0xff] %v8407_v62  ;;  %3304 = vst [vmem:[#allocation4 + $0x138] sm:$0xff] %v5791_v42  ;;  %v8422_v61 = vmul.f32 %v6214_v0, %v5791_v42  ;;  %v8427_v18 = vmul.f32 %v6215_v34, %v5791_v42  ;;  %v8432_v55 = vmul.f32 %v6216_v14, %v5791_v42  ;;  %v3252_v50 = vpop.f32.mrb[183].mxu0  ;;  %v6219_v34 = vld [vmem:[%s8810_s1 + $0x80] sm:$0xff]  ;;  %v6220_v14 = vld [vmem:[%s8810_s1 + $0x88] sm:$0xff] }
 0xa30   :  { %8978 = vst [vmem:[#allocation29_spill] sm:$0xff] %v8437_v4  ;;  %3302 = vst [vmem:[#allocation4 + $0x128] sm:$0xff] %v3252_v50  ;;  %v8442_v0 = vmul.f32 %v6218_v29, %v3252_v50  ;;  %v8447_v42 = vmul.f32 %v6219_v34, %v3252_v50  ;;  %v8452_v43 = vmul.f32 %v6220_v14, %v3252_v50  ;;  %v6222_v29 = vld [vmem:[%s8810_s1 + $0xf8] sm:$0xff]  ;;  %v6223_v34 = vld [vmem:[%s8810_s1 + $0x100] sm:$0xff] }
 0xa31   :  { %8977 = vst [vmem:[#allocation8_spill] sm:$0xff] %v8432_v55  ;;  %v6240_v4 = vld [vmem:[%s8810_s1 + $0x178] sm:$0xff] }
 0xa32   :  { %8979 = vst [vmem:[#allocation23_spill] sm:$0xff] %v8452_v43 }
 0xa3c   :  { %v5794_v50 = vpop.f32.mrb[184].mxu0 }
 0xa3d   :  { %3307 = vst [vmem:[#allocation4 + $0x150] sm:$0xff] %v5794_v50  ;;  %v3265_v14 = vpop.f32.mrb[185].mxu0  ;;  %v8469_v46 = vmul.f32 %v6221_v40, %v5794_v50  ;;  %v8474_v8 = vmul.f32 %v6222_v29, %v5794_v50  ;;  %v8479_v63 = vmul.f32 %v6223_v34, %v5794_v50  ;;  %v6226_v34 = vld [vmem:[%s8810_s1 + $0x108] sm:$0xff] }
 0xa3e   :  { %3305 = vst [vmem:[#allocation4 + $0x140] sm:$0xff] %v3265_v14  ;;  %v8484_v10 = vmul.f32 %v6224_v44, %v3265_v14  ;;  %v5795_v40 = vpop.f32.mrb[186].mxu0  ;;  %v8489_v29 = vmul.f32 %v6225_v31, %v3265_v14  ;;  %v8509_v6 = vmul.f32 %v6229_v7, %v3265_v14  ;;  %v6233_v7 = vld [vmem:[%s8810_s1 + $0x150] sm:$0xff] }
 0xa3f   :  { %8980 = vst [vmem:[#allocation15_spill] sm:$0xff] %v8469_v46  ;;  %8981 = vst [vmem:[#allocation14_spill] sm:$0xff] %v8474_v8  ;;  %v8494_v50 = vmul.f32 %v6226_v34, %v5795_v40  ;;  %v8499_v44 = vmul.f32 %v6227_v53, %v5795_v40  ;;  %v8504_v35 = vmul.f32 %v6228_v56, %v5795_v40  ;;  %v3268_v31 = vpop.f32.mrb[187].mxu0  ;;  %v6230_v34 = vld [vmem:[%s8810_s1 + $0xd8] sm:$0xff]  ;;  %v6243_v46 = vld [vmem:[%s8810_s1 + $0x140] sm:$0xff] }
 0xa40   :  { %8982 = vst [vmem:[#allocation26_spill] sm:$0xff] %v8479_v63  ;;  %3308 = vst [vmem:[#allocation4 + $0x158] sm:$0xff] %v5795_v40  ;;  %v8514_v53 = vmul.f32 %v6230_v34, %v3268_v31  ;;  %v8519_v56 = vmul.f32 %v6231_v47, %v3268_v31  ;;  %v6232_v40 = vld [vmem:[%s8810_s1 + $0xe8] sm:$0xff]  ;;  %v6234_v34 = vld [vmem:[%s8810_s1 + $0x158] sm:$0xff] }
 0xa41   :  { %8983 = vst [vmem:[#allocation21_spill] sm:$0xff] %v8494_v50  ;;  %8984 = vst [vmem:[#allocation25_spill] sm:$0xff] %v8499_v44  ;;  %v8524_v11 = vmul.f32 %v6232_v40, %v3268_v31  ;;  %v6235_v47 = vld [vmem:[%s8810_s1 + $0x160] sm:$0xff]  ;;  %v8993_v44 = vpack.c.bf16 %v8229_v36, %v8224_v9  ;;  %v8996_v9 = vpack.c.bf16 %v8273_v26, %v8264_v49 }
 0xa42   :  { %8985 = vst [vmem:[#allocation20_spill] sm:$0xff] %v8504_v35  ;;  %8986 = vst [vmem:[#allocation13_spill] sm:$0xff] %v8509_v6  ;;  %v6236_v63 = vld [vmem:[%s8810_s1 + $0x120] sm:$0xff]  ;;  %v6237_v6 = vld [vmem:[%s8810_s1 + $0x128] sm:$0xff] }
 0xa43   :  { %3306 = vst [vmem:[#allocation4 + $0x148] sm:$0xff] %v3268_v31  ;;  %8987 = vst [vmem:[#allocation12_spill] sm:$0xff] %v8524_v11  ;;  %v6239_v11 = vld [vmem:[%s8810_s1 + $0x170] sm:$0xff] }
 0xa4c   :  { %v5798_v31 = vpop.f32.mrb[188].mxu0 }
 0xa4d   :  { %3311 = vst [vmem:[#allocation4 + $0x170] sm:$0xff] %v5798_v31  ;;  %v3281_v40 = vpop.f32.mrb[189].mxu0  ;;  %v8541_v14 = vmul.f32 %v6233_v7, %v5798_v31  ;;  %v8546_v62 = vmul.f32 %v6234_v34, %v5798_v31  ;;  %v8551_v55 = vmul.f32 %v6235_v47, %v5798_v31  ;;  %v6238_v47 = vld [vmem:[%s8810_s1 + $0x168] sm:$0xff] }
 0xa4e   :  { %3309 = vst [vmem:[#allocation4 + $0x160] sm:$0xff] %v3281_v40  ;;  %v8556_v35 = vmul.f32 %v6236_v63, %v3281_v40  ;;  %v5799_v7 = vpop.f32.mrb[190].mxu0  ;;  %v8561_v34 = vmul.f32 %v6237_v6, %v3281_v40  ;;  %v8581_v20 = vmul.f32 %v6241_v17, %v3281_v40  ;;  %v8992_v40 = vpack.c.bf16 %v8233_v39, %v8227_v5 }
 0xa4f   :  { %8988 = vst [vmem:[#allocation19_spill] sm:$0xff] %v8546_v62  ;;  %8989 = vst [vmem:[#allocation18_spill] sm:$0xff] %v8551_v55  ;;  %v8566_v31 = vmul.f32 %v6238_v47, %v5799_v7  ;;  %v8571_v63 = vmul.f32 %v6239_v11, %v5799_v7  ;;  %v8576_v43 = vmul.f32 %v6240_v4, %v5799_v7  ;;  %v3284_v6 = vpop.f32.mrb[191].mxu0  ;;  %v6242_v47 = vld [vmem:[%s8810_s1 + $0x138] sm:$0xff] }
 0xa50   :  { %3312 = vst [vmem:[#allocation4 + $0x178] sm:$0xff] %v5799_v7  ;;  %8991 = vst [vmem:[#allocation17_spill] sm:$0xff] %v8581_v20  ;;  %v8586_v11 = vmul.f32 %v6242_v47, %v3284_v6  ;;  %v8591_v4 = vmul.f32 %v6243_v46, %v3284_v6  ;;  %v6244_v7 = vld [vmem:[%s8810_s1 + $0x148] sm:$0xff] }
 0xa51   :  { %8990 = vst [vmem:[#allocation32_spill] sm:$0xff] %v8576_v43  ;;  %3310 = vst [vmem:[#allocation4 + $0x168] sm:$0xff] %v3284_v6  ;;  %v8596_v50 = vmul.f32 %v6244_v7, %v3284_v6 }
 0xa54   :  { %v5850_v6 = vpop.f32.mrb[192].mxu0 }
 0xa55   :  { %v3606_v7 = vpop.f32.mrb[193].mxu0 }
 0xa56   :  { %v5851_v32 = vpop.f32.mrb[194].mxu0 }
 0xa57   :  { %v3670_v48 = vpack.c.bf16 %v5851_v32, %v5850_v6  ;;  %v3609_v17 = vpop.f32.mrb[195].mxu0  ;;  %v8994_v32 = vpack.c.bf16 %v8253_v38, %v8244_v19  ;;  %v8999_v6 = vpack.c.bf16 %v8289_v30, %v8281_v54 }
 0xa58   :  { %v3669_v62 = vpack.c.bf16 %v3609_v17, %v3606_v7 }
 0xa5a   :  { %5224 = vmatprep.subr.bf16.mxu1 %v3669_v62 }
 0xa5b   :  { %5225 = vmatpush3.bf16.msra.mxu1 %v8992_v40 }
 0xa5c   :  { %v5854_v47 = vpop.f32.mrb[196].mxu0  ;;  %5226 = vmatprep.subr.bf16.mxu1 %v3670_v48 }
 0xa5d   :  { %v3622_v8 = vpop.f32.mrb[197].mxu0 }
 0xa5e   :  { %v5855_v55 = vpop.f32.mrb[198].mxu0 }
 0xa5f   :  { %v3672_v43 = vpack.c.bf16 %v5855_v55, %v5854_v47  ;;  %v3625_v46 = vpop.f32.mrb[199].mxu0  ;;  %5227 = vmatpush3.bf16.msra.mxu1 %v8993_v44  ;;  %v8995_v55 = vpack.c.bf16 %v8249_v12, %v8241_v57  ;;  %v8998_v57 = vpack.c.bf16 %v8293_v22, %v8284_v2 }
 0xa60   :  { %v3671_v20 = vpack.c.bf16 %v3625_v46, %v3622_v8  ;;  %v8997_v8 = vpack.c.bf16 %v8269_v33, %v8261_v25  ;;  %v9000_v25 = vpack.c.bf16 %v8374_v59, %v8346_v51  ;;  %v9001_v33 = vpack.c.bf16 %v8359_v58, %v8336_v37 }
 0xa61   :  { %v9002_v37 = vpack.c.bf16 %v8354_v21, %v8331_v1  ;;  %v9004_v1 = vpack.c.bf16 %v8442_v0, %v8412_v45  ;;  %v9010_v45 = vld [vmem:[#allocation11_spill] sm:$0xff]  ;;  %v9013_v0 = vld [vmem:[#allocation14_spill] sm:$0xff] }
 0xa62   :  { %5228 = vmatprep.subr.bf16.mxu1 %v3671_v20 }
 0xa63   :  { %5229 = vmatpush3.bf16.msra.mxu1 %v8994_v32 }
 0xa64   :  { %v5858_v62 = vpop.f32.mrb[200].mxu0  ;;  %5230 = vmatprep.subr.bf16.mxu1 %v3672_v43 }
 0xa65   :  { %v3638_v5 = vpop.f32.mrb[201].mxu0 }
 0xa66   :  { %v5859_v39 = vpop.f32.mrb[202].mxu0 }
 0xa67   :  { %v3674_v17 = vpack.c.bf16 %v5859_v39, %v5858_v62  ;;  %v3641_v48 = vpop.f32.mrb[203].mxu0  ;;  %5231 = vmatpush3.bf16.msra.mxu1 %v8995_v55  ;;  %v9016_v55 = vld [vmem:[#allocation15_spill] sm:$0xff] }
 0xa68   :  { %v3673_v40 = vpack.c.bf16 %v3641_v48, %v3638_v5 }
 0xa6a   :  { %5232 = vmatprep.subr.bf16.mxu1 %v3673_v40  ;;  %v9018_v40 = vld [vmem:[#allocation24_spill] sm:$0xff] }
 0xa6b   :  { %5233 = vmatpush3.bf16.msra.mxu1 %v8996_v9  ;;  %v9021_v9 = vpack.c.bf16 %v8591_v4, %v8561_v34  ;;  %v6247_v34 = vld [vmem:[%s8811_s2 + $0x18] sm:$0xff]   ;;  %v9028_v4 = vpack.c.bf16 %v8566_v31, %v8541_v14  ;;  %v9034_v14 = vld [vmem:[#allocation12_spill] sm:$0xff]  ;;  %v9035_v31 = vld [vmem:[#allocation13_spill] sm:$0xff] }
 0xa6c   :  { %v5862_v36 = vpop.f32.mrb[204].mxu0  ;;  %5234 = vmatprep.subr.bf16.mxu1 %v3674_v17 }
 0xa6d   :  { %v3654_v19 = vpop.f32.mrb[205].mxu0 }
 0xa6e   :  { %v5863_v38 = vpop.f32.mrb[206].mxu0 }
 0xa6f   :  { %v3676_v20 = vpack.c.bf16 %v5863_v38, %v5862_v36  ;;  %v3657_v43 = vpop.f32.mrb[207].mxu0  ;;  %5235 = vmatpush3.bf16.msra.mxu1 %v8997_v8  ;;  %v6246_v36 = vld [vmem:[%s8811_s2 + $0x10] sm:$0xff]   ;;  %v9023_v38 = vld [vmem:[#allocation23_spill] sm:$0xff] }
 0xa70   :  { %v3675_v44 = vpack.c.bf16 %v3657_v43, %v3654_v19  ;;  %v9022_v19 = vpack.c.bf16 %v8586_v11, %v8556_v35  ;;  %v9026_v8 = vld [vmem:[#allocation19_spill] sm:$0xff]  ;;  %v9030_v35 = vld [vmem:[#allocation10_spill] sm:$0xff] }
 0xa72   :  { %5236 = vmatprep.subr.bf16.mxu1 %v3675_v44  ;;  %v9027_v44 = vpack.c.bf16 %v8571_v63, %v9026_v8  ;;  %v6249_v63 = vld [vmem:[%s8811_s2 + $0x20] sm:$0xff]  }
 0xa73   :  { %5237 = vmatpush3.bf16.msra.mxu1 %v8998_v57  ;;  %v9029_v57 = vld [vmem:[#allocation8_spill] sm:$0xff] }
 0xa74   :  { %v5914_v12 = vpop.f32.mrb[208].mxu0  ;;  %5238 = vmatprep.subr.bf16.mxu1 %v3676_v20  ;;  %v9024_v20 = vld [vmem:[#allocation29_spill] sm:$0xff]  ;;  %v9031_v11 = vpack.c.bf16 %v9029_v57, %v9030_v35 }
 0xa75   :  { %v3946_v49 = vpop.f32.mrb[209].mxu0  ;;  %v9025_v43 = vpack.c.bf16 %v9023_v38, %v9024_v20 }
 0xa76   :  { %v5915_v26 = vpop.f32.mrb[210].mxu0 }
 0xa77   :  { %v4010_v47 = vpack.c.bf16 %v5915_v26, %v5914_v12  ;;  %v3949_v46 = vpop.f32.mrb[211].mxu0  ;;  %5239 = vmatpush3.bf16.msra.mxu1 %v8999_v6  ;;  %v6248_v12 = vld [vmem:[%s8811_s2 + $0x30] sm:$0xff]   ;;  %v6251_v6 = vld [vmem:[%s8811_s2 + $0x28] sm:$0xff]  }
 0xa78   :  { %v4009_v7 = vpack.c.bf16 %v3949_v46, %v3946_v49  ;;  %v9032_v49 = vld [vmem:[#allocation17_spill] sm:$0xff]  ;;  %v6250_v46 = vld [vmem:[%s8811_s2 + $0x38] sm:$0xff]  }
 0xa79   :  { %v9033_v26 = vpack.c.bf16 %v8596_v50, %v9032_v49  ;;  %v9040_v50 = vld [vmem:[#allocation20_spill] sm:$0xff] }
 0xa7a   :  { %4130 = vmatmul.mubr.bf16.vlgmr.msra.gmra.mrb[192].mxu1 %v9000_v25  ;;  %5288 = vmatprep.subr.bf16.mxu0 %v4009_v7  ;;  %v9038_v25 = vld [vmem:[#allocation18_spill] sm:$0xff] }
 0xa7b   :  { %5928 = vmatprep.subr.bf16.mxu1 %v4009_v7  ;;  %4137 = vmatprep.mubr.bf16.mxu1 %v9001_v33  ;;  %v9037_v7 = vld [vmem:[#allocation32_spill] sm:$0xff] }
 0xa7c   :  { %5289 = vmatpush3.bf16.msra.mxu0 %v8304_v3  ;;  %5936 = vmatpush3.bf16.msra.mxu1 %v8304_v3  ;;  %v5918_v2 = vpop.f32.mrb[212].mxu0  ;;  %v9003_v3 = vpack.c.bf16 %v8447_v42, %v8417_v52  ;;  %v9039_v33 = vpack.c.bf16 %v9037_v7, %v9038_v25 }
 0xa7d   :  { %5290 = vmatprep.subr.bf16.mxu0 %v4010_v47  ;;  %5929 = vmatprep.subr.bf16.mxu1 %v4010_v47  ;;  %v3962_v54 = vpop.f32.mrb[213].mxu0  ;;  %v9036_v47 = vpack.c.bf16 %v9034_v14, %v9035_v31 }
 0xa7e   :  { %v5919_v30 = vpop.f32.mrb[214].mxu0 }
 0xa7f   :  { %v4012_v22 = vpack.c.bf16 %v5919_v30, %v5918_v2  ;;  %v3965_v32 = vpop.f32.mrb[215].mxu0  ;;  %v9041_v2 = vld [vmem:[#allocation26_spill] sm:$0xff] }
 0xa80   :  { %v4011_v62 = vpack.c.bf16 %v3965_v32, %v3962_v54  ;;  %5291 = vmatpush3.bf16.msra.mxu0 %v8302_v23  ;;  %5937 = vmatpush3.bf16.msra.mxu1 %v8302_v23  ;;  %v9042_v54 = vpack.c.bf16 %v9040_v50, %v9041_v2 }
 0xa82   :  { %4138 = vmatmul.mubr.bf16.gmra.mrb[196].mxu1 %v9002_v37  ;;  %5292 = vmatprep.subr.bf16.mxu0 %v4011_v62 }
 0xa83   :  { %5930 = vmatprep.subr.bf16.mxu1 %v4011_v62  ;;  %4145 = vmatprep.mubr.bf16.mxu1 %v9003_v3 }
 0xa84   :  { %5293 = vmatpush3.bf16.msra.mxu0 %v8310_v16  ;;  %5938 = vmatpush3.bf16.msra.mxu1 %v8310_v16  ;;  %v5922_v51 = vpop.f32.mrb[216].mxu0  ;;  %v9005_v16 = vpack.c.bf16 %v8427_v18, %v8402_v13  ;;  %v9006_v13 = vpack.c.bf16 %v8422_v61, %v8397_v24  ;;  %v9009_v24 = vld [vmem:[#allocation9_spill] sm:$0xff] }
 0xa85   :  { %5294 = vmatprep.subr.bf16.mxu0 %v4012_v22  ;;  %5931 = vmatprep.subr.bf16.mxu1 %v4012_v22  ;;  %v3978_v58 = vpop.f32.mrb[217].mxu0  ;;  %v9011_v61 = vpack.c.bf16 %v9009_v24, %v9010_v45  ;;  %v9012_v18 = vld [vmem:[#allocation25_spill] sm:$0xff] }
 0xa86   :  { %v5923_v59 = vpop.f32.mrb[218].mxu0 }
 0xa87   :  { %v4014_v23 = vpack.c.bf16 %v5923_v59, %v5922_v51  ;;  %v3981_v5 = vpop.f32.mrb[219].mxu0 }
 0xa88   :  { %v4013_v39 = vpack.c.bf16 %v3981_v5, %v3978_v58  ;;  %5295 = vmatpush3.bf16.msra.mxu0 %v8308_v60  ;;  %5939 = vmatpush3.bf16.msra.mxu1 %v8308_v60 }
 0xa8a   :  { %4146 = vmatmul.mubr.bf16.gmra.mrb[200].mxu1 %v9004_v1  ;;  %5296 = vmatprep.subr.bf16.mxu0 %v4013_v39 }
 0xa8b   :  { %5932 = vmatprep.subr.bf16.mxu1 %v4013_v39  ;;  %4153 = vmatprep.mubr.bf16.mxu1 %v9005_v16 }
 0xa8c   :  { %5297 = vmatpush3.bf16.msra.mxu0 %v8316_v27  ;;  %5940 = vmatpush3.bf16.msra.mxu1 %v8316_v27  ;;  %v5926_v21 = vpop.f32.mrb[220].mxu0  ;;  %v9007_v27 = vpack.c.bf16 %v8519_v56, %v8489_v29  ;;  %v9014_v29 = vpack.c.bf16 %v9012_v18, %v9013_v0  ;;  %v9015_v56 = vld [vmem:[#allocation21_spill] sm:$0xff] }
 0xa8d   :  { %5298 = vmatprep.subr.bf16.mxu0 %v4014_v23  ;;  %5933 = vmatprep.subr.bf16.mxu1 %v4014_v23  ;;  %v3994_v52 = vpop.f32.mrb[221].mxu0 }
 0xa8e   :  { %v5927_v42 = vpop.f32.mrb[222].mxu0 }
 0xa8f   :  { %v4016_v60 = vpack.c.bf16 %v5927_v42, %v5926_v21  ;;  %v3997_v17 = vpop.f32.mrb[223].mxu0 }
 0xa90   :  { %v4015_v48 = vpack.c.bf16 %v3997_v17, %v3994_v52  ;;  %5299 = vmatpush3.bf16.msra.mxu0 %v8314_v28  ;;  %5941 = vmatpush3.bf16.msra.mxu1 %v8314_v28  ;;  %v9008_v28 = vpack.c.bf16 %v8514_v53, %v8484_v10  ;;  %v9019_v10 = vld [vmem:[#allocation30_spill] sm:$0xff] }
 0xa91   :  { %v9020_v53 = vpack.c.bf16 %v9018_v40, %v9019_v10 }
 0xa92   :  { %4154 = vmatmul.mubr.bf16.gmra.mrb[204].mxu1 %v9006_v13  ;;  %5300 = vmatprep.subr.bf16.mxu0 %v4015_v48 }
 0xa93   :  { %5934 = vmatprep.subr.bf16.mxu1 %v4015_v48  ;;  %4161 = vmatprep.mubr.bf16.mxu1 %v9007_v27 }
 0xa94   :  { %5301 = vmatpush3.bf16.msra.mxu0 %v8322_v41  ;;  %5942 = vmatpush3.bf16.msra.mxu1 %v8322_v41  ;;  %v6245_v41 = vld [vmem:[%s8811_s2 + $0x8] sm:$0xff]  }
 0xa95   :  { %5302 = vmatprep.subr.bf16.mxu0 %v4016_v60  ;;  %5935 = vmatprep.subr.bf16.mxu1 %v4016_v60 }
 0xa98   :  { %5303 = vmatpush3.bf16.msra.mxu0 %v8320_v15  ;;  %5943 = vmatpush3.bf16.msra.mxu1 %v8320_v15  ;;  %v9017_v15 = vpack.c.bf16 %v9015_v56, %v9016_v55 }
 0xa9a   :  { %4162 = vmatmul.mubr.bf16.gmra.mrb[208].mxu1 %v9008_v28 }
 0xa9b   :  { %4227 = vmatmul.mubr.bf16.vlgmr.msra.gmra.mrb[224].mxu0 %v9011_v61  ;;  %4169 = vmatprep.mubr.bf16.mxu1 %v9014_v29 }
 0xa9c   :  { %4234 = vmatprep.mubr.bf16.mxu0 %v6245_v41 }
 0xaa2   :  { %4170 = vmatmul.mubr.bf16.gmra.mrb[212].mxu1 %v9017_v15 }
 0xaa3   :  { %4235 = vmatmul.mubr.bf16.gmra.mrb[228].mxu0 %v9020_v53  ;;  %4177 = vmatprep.mubr.bf16.mxu1 %v9021_v9 }
 0xaa4   :  { %4242 = vmatprep.mubr.bf16.mxu0 %v6246_v36 }
 0xaaa   :  { %4178 = vmatmul.mubr.bf16.gmra.mrb[216].mxu1 %v9022_v19 }
 0xaab   :  { %4243 = vmatmul.mubr.bf16.gmra.mrb[232].mxu0 %v9025_v43  ;;  %4185 = vmatprep.mubr.bf16.mxu1 %v9027_v44 }
 0xaac   :  { %4250 = vmatprep.mubr.bf16.mxu0 %v6247_v34 }
 0xab2   :  { %4186 = vmatmul.mubr.bf16.gmra.mrb[220].mxu1 %v9028_v4 }
 0xab3   :  { %4251 = vmatmul.mubr.bf16.gmra.mrb[236].mxu0 %v9031_v11  ;;  %4274 = vmatprep.mubr.bf16.mxu1 %v6248_v12 }
 0xab4   :  { %4258 = vmatprep.mubr.bf16.mxu0 %v6249_v63 }
 0xaba   :  { %4275 = vmatmul.mubr.bf16.vlgmr.msra.gmra.mrb[224].mxu1 %v9033_v26 }
 0xabb   :  { %4259 = vmatmul.mubr.bf16.gmra.mrb[240].mxu0 %v9036_v47  ;;  %4282 = vmatprep.mubr.bf16.mxu1 %v6250_v46 }
 0xabc   :  { %4266 = vmatprep.mubr.bf16.mxu0 %v6251_v6 }
 0xac2   :  { %4283 = vmatmul.mubr.bf16.gmra.mrb[228].mxu1 %v9039_v33 }
 0xac3   :  { %4267 = vmatmul.mubr.bf16.gmra.mrb[244].mxu0 %v9042_v54 }
 0xac4   :  { %6263 = shalt.err (!%p6260_p4)
}
 0xac5   :  { %s6264_s29 = scalar_lea.hbm %s8816_s7, 6144 }
 0xac6   :  { %p6265_p5 = scmp.ne.s32.totalorder %s8816_s7, %s6264_s29  ;;  %p6268_p6 = scmp.lt.u32.totalorder %s6264_s29, %s8816_s7 }
 0xac8   :  { %p6270_p7 = pnand %p6268_p6, %p6265_p5 }
 0xaca   :  { %6273 = shalt.err (!%p6270_p7)
}
 0xacb   :  { %s6301_s10 = smov 128   ;;  %s6302_s11 = smov 8   ;;  %v8762_v45 = vld [vmem:[%s8814_s5 + $0x2] ss:$0 sm:$0xff] }
 0xacc   :  { %4330 = dma.vmem_to_hbm [thread:$0]  %s4325_s26, 6144, %s8816_s7, [#allocation5], %s6301_s10, %s6301_s10, %s6302_s11  }
 0xacd   :  { %s6303_s5 = smov [#allocation2]  }
 0xace   :  { %s4312_s14 = sshll.u32 %s6303_s5, 4  ;;  %s4313_s14 = int_to_ptr.vmem [resolvable:$true] %s4312_s14 }
 0xacf   :  { %s6274_s15 = scalar_lea.vmem %s4313_s14, 2048  ;;  %p6279_p9 = scmp.lt.s32.totalorder %s4313_s14, %s4313_s14 }
 0xad0   :  { %p6275_p8 = scmp.ne.s32.totalorder %s4313_s14, %s6274_s15  ;;  %p6280_p10 = scmp.lt.s32.totalorder %s6274_s15, %s6274_s15 }
 0xad2   :  { %p6281_p11 = por %p6280_p10, %p6279_p9 }
 0xad4   :  { %p6282_p12 = pnand %p6281_p11, %p6275_p8 }
 0xb4d   :  { %v5240_v30 = vpop.f32.mrb[192].mxu1 }
 0xb4e   :  { %v5241_v22 = vpop.f32.mrb[193].mxu1 }
 0xb4f   :  { %v5242_v32 = vadd.f32 %v5241_v22, %v5240_v30  ;;  %v5243_v62 = vpop.f32.mrb[194].mxu1 }
 0xb50   :  { %v5244_v37 = vpop.f32.mrb[195].mxu1 }
 0xb51   :  { %v5245_v3 = vadd.f32 %v5244_v37, %v5243_v62  ;;  %v4132_v55 = vadd.f32 %v5242_v32, %v8762_v45 }
 0xb53   :  { %v4135_v36 = vadd.f32 %v5245_v3, %v8762_v45 }
 0xb55   :  { %v5246_v51 = vpop.f32.mrb[196].mxu1 }
 0xb56   :  { %v5247_v58 = vpop.f32.mrb[197].mxu1 }
 0xb57   :  { %v5248_v59 = vadd.f32 %v5247_v58, %v5246_v51  ;;  %v5249_v23 = vpop.f32.mrb[198].mxu1 }
 0xb58   :  { %v5250_v5 = vpop.f32.mrb[199].mxu1 }
 0xb59   :  { %v5251_v39 = vadd.f32 %v5250_v5, %v5249_v23  ;;  %v4140_v35 = vadd.f32 %v5248_v59, %v8762_v45 }
 0xb5b   :  { %v4143_v14 = vadd.f32 %v5251_v39, %v8762_v45 }
 0xb5d   :  { %v5252_v1 = vpop.f32.mrb[200].mxu1 }
 0xb5e   :  { %v5253_v16 = vpop.f32.mrb[201].mxu1 }
 0xb5f   :  { %v5254_v21 = vadd.f32 %v5253_v16, %v5252_v1  ;;  %v5255_v52 = vpop.f32.mrb[202].mxu1 }
 0xb60   :  { %v5256_v42 = vpop.f32.mrb[203].mxu1 }
 0xb61   :  { %v5257_v60 = vadd.f32 %v5256_v42, %v5255_v52  ;;  %v4148_v54 = vadd.f32 %v5254_v21, %v8762_v45 }
 0xb63   :  { %v4151_v3 = vadd.f32 %v5257_v60, %v8762_v45 }
 0xb65   :  { %v5258_v17 = vpop.f32.mrb[204].mxu1 }
 0xb66   :  { %v5259_v48 = vpop.f32.mrb[205].mxu1 }
 0xb67   :  { %v8755_v13 = vadd.f32 %v5259_v48, %v5258_v17  ;;  %v5261_v27 = vpop.f32.mrb[206].mxu1 }
 0xb68   :  { %v5262_v28 = vpop.f32.mrb[207].mxu1 }
 0xb69   :  { %v8757_v24 = vadd.f32 %v5262_v28, %v5261_v27  ;;  %v4156_v21 = vadd.f32 %v8755_v13, %v8762_v45 }
 0xb6b   :  { %v4159_v60 = vadd.f32 %v8757_v24, %v8762_v45 }
 0xb6d   :  { %v5264_v61 = vpop.f32.mrb[208].mxu1 }
 0xb6e   :  { %v5304_v18 = vpop.f32.mrb[224].mxu0  ;;  %v5265_v0 = vpop.f32.mrb[209].mxu1 }
 0xb6f   :  { %v8764_v29 = vadd.f32 %v5265_v0, %v5264_v61  ;;  %v5305_v41 = vpop.f32.mrb[225].mxu0  ;;  %v5267_v56 = vpop.f32.mrb[210].mxu1 }
 0xb70   :  { %v5306_v15 = vadd.f32 %v5305_v41, %v5304_v18  ;;  %v5307_v40 = vpop.f32.mrb[226].mxu0  ;;  %v5268_v10 = vpop.f32.mrb[211].mxu1 }
 0xb71   :  { %v8767_v53 = vadd.f32 %v5268_v10, %v5267_v56  ;;  %v5308_v9 = vpop.f32.mrb[227].mxu0 }
 0xb72   :  { %v4229_v19 = vadd.f32 %v5306_v15, %v4132_v55  ;;  %v5309_v38 = vadd.f32 %v5308_v9, %v5307_v40  ;;  %v4164_v9 = vadd.f32 %v8764_v29, %v8762_v45 }
 0xb74   :  { %4291 = vst [vmem:[#allocation2] sm:$0xff] %v4229_v19  ;;  %v4232_v20 = vadd.f32 %v5309_v38, %v4135_v36 }
 0xb75   :  { %v5270_v43 = vpop.f32.mrb[212].mxu1 }
 0xb76   :  { %4292 = vst [vmem:[#allocation2 + $0x8] sm:$0xff] %v4232_v20  ;;  %v5310_v8 = vpop.f32.mrb[228].mxu0  ;;  %v5271_v44 = vpop.f32.mrb[213].mxu1 }
 0xb77   :  { %v8770_v34 = vadd.f32 %v5271_v44, %v5270_v43  ;;  %v5311_v4 = vpop.f32.mrb[229].mxu0  ;;  %v5273_v57 = vpop.f32.mrb[214].mxu1  ;;  %v4167_v44 = vadd.f32 %v8767_v53, %v8762_v45 }
 0xb78   :  { %v5312_v11 = vadd.f32 %v5311_v4, %v5310_v8  ;;  %v5313_v12 = vpop.f32.mrb[230].mxu0  ;;  %v5274_v63 = vpop.f32.mrb[215].mxu1 }
 0xb79   :  { %v8773_v49 = vadd.f32 %v5274_v63, %v5273_v57  ;;  %v5314_v26 = vpop.f32.mrb[231].mxu0 }
 0xb7a   :  { %v4237_v31 = vadd.f32 %v5312_v11, %v4140_v35  ;;  %v5315_v47 = vadd.f32 %v5314_v26, %v5313_v12 }
 0xb7c   :  { %4293 = vst [vmem:[#allocation2 + $0x10] sm:$0xff] %v4237_v31  ;;  %v4240_v46 = vadd.f32 %v5315_v47, %v4143_v14 }
 0xb7d   :  { %v5276_v6 = vpop.f32.mrb[216].mxu1 }
 0xb7e   :  { %4294 = vst [vmem:[#allocation2 + $0x18] sm:$0xff] %v4240_v46  ;;  %v5316_v7 = vpop.f32.mrb[232].mxu0  ;;  %v5277_v25 = vpop.f32.mrb[217].mxu1  ;;  %v4172_v46 = vadd.f32 %v8770_v34, %v8762_v45 }
 0xb7f   :  { %v5278_v33 = vadd.f32 %v5277_v25, %v5276_v6  ;;  %v5317_v50 = vpop.f32.mrb[233].mxu0  ;;  %v5279_v2 = vpop.f32.mrb[218].mxu1 }
 0xb80   :  { %v5318_v30 = vadd.f32 %v5317_v50, %v5316_v7  ;;  %v5319_v22 = vpop.f32.mrb[234].mxu0  ;;  %v5280_v32 = vpop.f32.mrb[219].mxu1 }
 0xb81   :  { %v5281_v62 = vadd.f32 %v5280_v32, %v5279_v2  ;;  %v5320_v37 = vpop.f32.mrb[235].mxu0  ;;  %v4180_v15 = vadd.f32 %v5278_v33, %v8762_v45 }
 0xb82   :  { %v4245_v51 = vadd.f32 %v5318_v30, %v4148_v54  ;;  %v5321_v58 = vadd.f32 %v5320_v37, %v5319_v22  ;;  %v4175_v54 = vadd.f32 %v8773_v49, %v8762_v45 }
 0xb83   :  { %v4183_v24 = vadd.f32 %v5281_v62, %v8762_v45 }
 0xb84   :  { %4295 = vst [vmem:[#allocation2 + $0x20] sm:$0xff] %v4245_v51  ;;  %v4248_v59 = vadd.f32 %v5321_v58, %v4151_v3 }
 0xb85   :  { %v5282_v23 = vpop.f32.mrb[220].mxu1 }
 0xb86   :  { %4296 = vst [vmem:[#allocation2 + $0x28] sm:$0xff] %v4248_v59  ;;  %v5322_v5 = vpop.f32.mrb[236].mxu0  ;;  %v5283_v39 = vpop.f32.mrb[221].mxu1 }
 0xb87   :  { %v5284_v1 = vadd.f32 %v5283_v39, %v5282_v23  ;;  %v5323_v16 = vpop.f32.mrb[237].mxu0  ;;  %v5285_v52 = vpop.f32.mrb[222].mxu1 }
 0xb88   :  { %v5324_v42 = vadd.f32 %v5323_v16, %v5322_v5  ;;  %v5325_v17 = vpop.f32.mrb[238].mxu0  ;;  %v5286_v48 = vpop.f32.mrb[223].mxu1 }
 0xb89   :  { %v5287_v27 = vadd.f32 %v5286_v48, %v5285_v52  ;;  %v5326_v28 = vpop.f32.mrb[239].mxu0  ;;  %v4188_v26 = vadd.f32 %v5284_v1, %v8762_v45 }
 0xb8a   :  { %v4253_v61 = vadd.f32 %v5324_v42, %v4156_v21  ;;  %v5327_v18 = vadd.f32 %v5326_v28, %v5325_v17 }
 0xb8b   :  { %v4191_v25 = vadd.f32 %v5287_v27, %v8762_v45 }
 0xb8c   :  { %4297 = vst [vmem:[#allocation2 + $0x30] sm:$0xff] %v4253_v61  ;;  %v4256_v0 = vadd.f32 %v5327_v18, %v4159_v60 }
 0xb8d   :  { %v5340_v41 = vpop.f32.mrb[224].mxu1 }
 0xb8e   :  { %4298 = vst [vmem:[#allocation2 + $0x38] sm:$0xff] %v4256_v0  ;;  %v5328_v56 = vpop.f32.mrb[240].mxu0  ;;  %v5341_v55 = vpop.f32.mrb[225].mxu1 }
 0xb8f   :  { %v5329_v40 = vpop.f32.mrb[241].mxu0  ;;  %v5342_v13 = vadd.f32 %v5341_v55, %v5340_v41  ;;  %v5343_v10 = vpop.f32.mrb[226].mxu1 }
 0xb90   :  { %v5330_v36 = vadd.f32 %v5329_v40, %v5328_v56  ;;  %v5331_v19 = vpop.f32.mrb[242].mxu0  ;;  %v5344_v38 = vpop.f32.mrb[227].mxu1 }
 0xb91   :  { %v4277_v20 = vadd.f32 %v5342_v13, %v4180_v15  ;;  %v5332_v43 = vpop.f32.mrb[243].mxu0  ;;  %v5345_v8 = vadd.f32 %v5344_v38, %v5343_v10 }
 0xb92   :  { %v4261_v4 = vadd.f32 %v5330_v36, %v4164_v9  ;;  %v5333_v57 = vadd.f32 %v5332_v43, %v5331_v19 }
 0xb93   :  { %4303 = vst [vmem:[#allocation2 + $0x60] sm:$0xff] %v4277_v20  ;;  %v4280_v35 = vadd.f32 %v5345_v8, %v4183_v24 }
 0xb94   :  { %4299 = vst [vmem:[#allocation2 + $0x40] sm:$0xff] %v4261_v4  ;;  %v4264_v11 = vadd.f32 %v5333_v57, %v4167_v44 }
 0xb95   :  { %4304 = vst [vmem:[#allocation2 + $0x68] sm:$0xff] %v4280_v35  ;;  %v5346_v12 = vpop.f32.mrb[228].mxu1 }
 0xb96   :  { %4300 = vst [vmem:[#allocation2 + $0x48] sm:$0xff] %v4264_v11  ;;  %v5334_v29 = vpop.f32.mrb[244].mxu0  ;;  %v5347_v63 = vpop.f32.mrb[229].mxu1 }
 0xb97   :  { %v5335_v14 = vpop.f32.mrb[245].mxu0  ;;  %v5348_v31 = vadd.f32 %v5347_v63, %v5346_v12  ;;  %v5349_v47 = vpop.f32.mrb[230].mxu1 }
 0xb98   :  { %v5336_v53 = vadd.f32 %v5335_v14, %v5334_v29  ;;  %v5337_v6 = vpop.f32.mrb[246].mxu0  ;;  %v5350_v7 = vpop.f32.mrb[231].mxu1 }
 0xb99   :  { %v4285_v33 = vadd.f32 %v5348_v31, %v4188_v26  ;;  %v5338_v50 = vpop.f32.mrb[247].mxu0  ;;  %v5351_v2 = vadd.f32 %v5350_v7, %v5349_v47 }
 0xb9a   :  { %v4269_v30 = vadd.f32 %v5336_v53, %v4172_v46  ;;  %v5339_v22 = vadd.f32 %v5338_v50, %v5337_v6 }
 0xb9b   :  { %4305 = vst [vmem:[#allocation2 + $0x70] sm:$0xff] %v4285_v33  ;;  %v4288_v32 = vadd.f32 %v5351_v2, %v4191_v25 }
 0xb9c   :  { %4301 = vst [vmem:[#allocation2 + $0x50] sm:$0xff] %v4269_v30  ;;  %v4272_v62 = vadd.f32 %v5339_v22, %v4175_v54 }
 0xb9d   :  { %4306 = vst [vmem:[#allocation2 + $0x78] sm:$0xff] %v4288_v32 }
 0xb9e   :  { %4302 = vst [vmem:[#allocation2 + $0x58] sm:$0xff] %v4272_v62 }
 0xb9f   :  { %6285 = shalt.err (!%p6282_p12)
}
 0xba0   :  { %s6286_s18 = scalar_lea.hbm %s8815_s6, 2048 }
 0xba1   :  { %p6287_p13 = scmp.ne.s32.totalorder %s8815_s6, %s6286_s18  ;;  %p6290_p0 = scmp.lt.u32.totalorder %s6286_s18, %s8815_s6 }
 0xba3   :  { %p6292_p1 = pnand %p6290_p0, %p6287_p13 }
 0xba5   :  { %6295 = shalt.err (!%p6292_p1)
}
 0xba6   :  { %4318 = dma.vmem_to_hbm [thread:$0]  %s4313_s14, 2048, %s8815_s6, [#allocation3], %s6301_s10, %s6301_s10, %s6302_s11  }
 0xba7   :  { %6296 = dma.done.wait [#allocation3], 2048  }
 0xba8   :  { %6297 = vsyncadd [#allocation3], 4294965248 }
 0xba9   :  { %6298 = dma.done.wait [#allocation5], 6144  }
 0xbaa   :  { %6299 = vsyncadd [#allocation5], 4294961152 }
 0xbab   :  { %4337 = vsyncpa [#allocation3], 1 }
 0xbac   :  { %4338 = vsyncpa [#allocation5], 1 }

</bundles_post_ra>
